<compile_context>
chip_gen: v5e
topology: v5e:2x2
jax: 0.10.0
libtpu: 0.0.40
codegen_flags: <defaults>
</compile_context>

<pallas_src>
import jax
import jax.numpy as jnp
from jax.experimental import pallas as pl
from jax.experimental.pallas import tpu as pltpu


ROW_ALIGN = 16  # keep row tiles multiples of the bf16 sublane tile


def _round_up(x, m):
    return (x + m - 1) // m * m


# ----------------------------- Pallas kernels -----------------------------

def conv1_pool_kernel(x_ref, w_ref, b_ref, o_ref):
    """conv1 as pool-packed matmul: x (TM, 36) @ block-diag W (36, 4*32).

    The (TM, 128) product holds the 4 pool-window conv results side by side
    in the lane dim; take the max over the 4 groups, add bias, ReLU.
    """
    cout = o_ref.shape[-1]
    y = jnp.dot(x_ref[...], w_ref[...], preferred_element_type=jnp.float32)
    m = y[:, 0:cout]
    for p in range(1, 4):
        m = jnp.maximum(m, y[:, p * cout:(p + 1) * cout])
    o_ref[...] = jnp.maximum(m + b_ref[...], 0.0).astype(o_ref.dtype)


def conv2_pool_kernel(p_ref, w_ref, b_ref, o_ref):
    """Fused conv2: one (4*TM, K) x (K, Cout) dot, 4-way pool max, bias, ReLU.

    p_ref: (4, TM, K) im2col patches for the 4 pool-window positions.
    """
    n_pool, tm, k = p_ref.shape
    p = p_ref[...].reshape(n_pool * tm, k)              # pure view (TM % 16 == 0)
    y = jnp.dot(p, w_ref[...], preferred_element_type=jnp.float32)
    y = y.reshape(n_pool, tm, y.shape[-1])
    m = jnp.max(y, axis=0)                              # 2x2 max-pool
    o_ref[...] = jnp.maximum(m + b_ref[...], 0.0).astype(o_ref.dtype)


def mlp_logsoftmax_kernel(x_ref, w3_ref, b3_ref, w4_ref, b4_ref, o_ref):
    """Fused fc3 + ReLU + fc4 + numerically-stable log_softmax."""
    h = jnp.dot(x_ref[...], w3_ref[...], preferred_element_type=jnp.float32)
    h = jnp.maximum(h + b3_ref[...], 0.0)
    logits = jnp.dot(h.astype(w4_ref.dtype), w4_ref[...],
                     preferred_element_type=jnp.float32) + b4_ref[...]
    m = jnp.max(logits, axis=-1, keepdims=True)
    s = logits - m
    lse = jnp.log(jnp.sum(jnp.exp(s), axis=-1, keepdims=True))
    o_ref[...] = (s - lse).astype(o_ref.dtype)


# ------------------------------ JAX glue -----------------------------------

def _im2col_3x3_pad1(x):
    # x: (N, H, W, C) -> (N, H, W, 9*C); feature ordering (dh, dw, ci),
    # matching the weight reshape in init_params.
    N, H, W, C = x.shape
    xp = jnp.pad(x, ((0, 0), (1, 1), (1, 1), (0, 0)))
    cols = [xp[:, dh:dh + H, dw:dw + W, :] for dh in range(3) for dw in range(3)]
    return jnp.concatenate(cols, axis=-1)


def conv1_relu_pool(x, w_big, b, *, tm=512):
    # x: (N, 28, 28, 1) bf16; w_big: (36, 128) bf16 block-diag; b: (1, 32) f32
    N, H, W, _ = x.shape
    Ho, Wo = H // 2, W // 2
    cout = b.shape[-1]

    patches = _im2col_3x3_pad1(x)                                   # (N, H, W, 9)
    p = patches.reshape(N, Ho, 2, Wo, 2, 9).transpose(0, 1, 3, 2, 4, 5)
    p = p.reshape(N * Ho * Wo, 4 * 9)                               # pool packed into K

    M = p.shape[0]
    TM = min(tm, _round_up(M, ROW_ALIGN))
    M_pad = _round_up(M, TM)
    if M_pad != M:
        p = jnp.pad(p, ((0, M_pad - M), (0, 0)))

    cost = pl.CostEstimate(
        flops=2 * M_pad * 36 * 4 * cout,
        transcendentals=0,
        bytes_accessed=p.size * 2 + w_big.size * 2 + b.size * 4 + M_pad * cout * 2)

    out = pl.pallas_call(
        conv1_pool_kernel,
        out_shape=jax.ShapeDtypeStruct((M_pad, cout), jnp.bfloat16),
        grid=(M_pad // TM,),
        in_specs=[
            pl.BlockSpec((TM, 36), lambda i: (i, 0)),
            pl.BlockSpec((36, 4 * cout), lambda i: (0, 0)),          # resident
            pl.BlockSpec((1, cout), lambda i: (0, 0)),               # resident
        ],
        out_specs=pl.BlockSpec((TM, cout), lambda i: (i, 0)),
        compiler_params=pltpu.CompilerParams(dimension_semantics=("parallel",)),
        cost_estimate=cost,
    )(p, w_big, b)
    return out[:M].reshape(N, Ho, Wo, cout)


def conv2_relu_pool(x, w_mat, b, *, tm=512):
    # x: (N, 14, 14, 32) bf16; w_mat: (288, 64) bf16; b: (1, 64) f32
    N, H, W, C = x.shape
    Ho, Wo = H // 2, W // 2
    K, Cout = w_mat.shape

    patches = _im2col_3x3_pad1(x)                                   # (N, H, W, 9C)
    p = patches.reshape(N, Ho, 2, Wo, 2, K).transpose(2, 4, 0, 1, 3, 5)
    p = p.reshape(4, N * Ho * Wo, K)                                # (4, M, K)

    M = p.shape[1]
    TM = min(tm, _round_up(M, ROW_ALIGN))
    M_pad = _round_up(M, TM)
    if M_pad != M:
        p = jnp.pad(p, ((0, 0), (0, M_pad - M), (0, 0)))

    cost = pl.CostEstimate(
        flops=2 * 4 * M_pad * K * Cout,
        transcendentals=0,
        bytes_accessed=p.size * 2 + w_mat.size * 2 + b.size * 4 + M_pad * Cout * 2)

    out = pl.pallas_call(
        conv2_pool_kernel,
        out_shape=jax.ShapeDtypeStruct((M_pad, Cout), jnp.bfloat16),
        grid=(M_pad // TM,),
        in_specs=[
            pl.BlockSpec((4, TM, K), lambda i: (0, i, 0)),
            pl.BlockSpec((K, Cout), lambda i: (0, 0)),               # resident
            pl.BlockSpec((1, Cout), lambda i: (0, 0)),               # resident
        ],
        out_specs=pl.BlockSpec((TM, Cout), lambda i: (i, 0)),
        compiler_params=pltpu.CompilerParams(dimension_semantics=("parallel",)),
        cost_estimate=cost,
    )(p, w_mat, b)
    return out[:M].reshape(N, Ho, Wo, Cout)


def mlp_head(feat, w3, b3, w4, b4, *, tb=256):
    # feat: (N, 3136) bf16 (NHWC flatten); w3 rows pre-permuted to match.
    N, F = feat.shape
    TB = min(tb, _round_up(N, ROW_ALIGN))
    N_pad = _round_up(N, TB)
    if N_pad != N:
        feat = jnp.pad(feat, ((0, N_pad - N), (0, 0)))

    cost = pl.CostEstimate(
        flops=2 * N_pad * (F * 128 + 128 * 10),
        transcendentals=N_pad * 11,
        bytes_accessed=(feat.size * 2 + w3.size * 2 + w4.size * 2
                        + b3.size * 4 + b4.size * 4 + N_pad * 10 * 4))

    out = pl.pallas_call(
        mlp_logsoftmax_kernel,
        out_shape=jax.ShapeDtypeStruct((N_pad, 10), jnp.float32),
        grid=(N_pad // TB,),
        in_specs=[
            pl.BlockSpec((TB, F), lambda i: (i, 0)),
            pl.BlockSpec((F, 128), lambda i: (0, 0)),                # resident
            pl.BlockSpec((1, 128), lambda i: (0, 0)),
            pl.BlockSpec((128, 10), lambda i: (0, 0)),
            pl.BlockSpec((1, 10), lambda i: (0, 0)),
        ],
        out_specs=pl.BlockSpec((TB, 10), lambda i: (i, 0)),
        compiler_params=pltpu.CompilerParams(dimension_semantics=("parallel",)),
        cost_estimate=cost,
    )(feat, w3, b3, w4, b4)
    return out[:N]


def cnn_forward(x_nchw, params):
    # x_nchw: (N, 1, 28, 28) float32 (PyTorch NCHW convention)
    x = jnp.transpose(x_nchw, (0, 2, 3, 1)).astype(jnp.bfloat16)     # -> NHWC bf16
    h1 = conv1_relu_pool(x, params["w1_big"], params["b1"])          # (N, 14, 14, 32)
    h2 = conv2_relu_pool(h1, params["w2"], params["b2"])             # (N, 7, 7, 64)
    N = h2.shape[0]
    # NHWC flatten; w3 rows were permuted at init so this matches PyTorch's
    # NCHW x.view(-1, 64*7*7) without any runtime transpose.
    feat = h2.reshape(N, 7 * 7 * 64)
    return mlp_head(feat, params["w3"], params["b3"], params["w4"], params["b4"])


def init_params(key):
    # Deterministic synthetic parameters with PyTorch-equivalent shapes,
    # converted once (host-side) to the kernel-friendly layouts.
    ks = jax.random.split(key, 8)
    w1_t = jax.random.normal(ks[0], (32, 1, 3, 3), jnp.float32) * 0.10   # (Cout,Cin,kh,kw)
    b1 = jax.random.normal(ks[1], (32,), jnp.float32) * 0.10
    w2_t = jax.random.normal(ks[2], (64, 32, 3, 3), jnp.float32) * 0.05
    b2 = jax.random.normal(ks[3], (64,), jnp.float32) * 0.05
    w3_pt = jax.random.normal(ks[4], (64 * 7 * 7, 128), jnp.float32) * 0.02  # rows in (c,h,w) order
    b3 = jax.random.normal(ks[5], (128,), jnp.float32) * 0.02
    w4 = jax.random.normal(ks[6], (128, 10), jnp.float32) * 0.05
    b4 = jax.random.normal(ks[7], (10,), jnp.float32) * 0.05

    # conv1: im2col weight (9, 32) (row index dh*3+dw), then block-diagonal
    # (36, 4*32) so the 4 pool-window patches contract in a single lane-dense dot.
    w1_mat = w1_t.transpose(2, 3, 1, 0).reshape(9, 32)
    w1_big = jnp.kron(jnp.eye(4, dtype=jnp.float32), w1_mat)             # (36, 128)

    # conv2: im2col weight (288, 64), row index (dh*3 + dw)*32 + ci.
    w2_mat = w2_t.transpose(2, 3, 1, 0).reshape(9 * 32, 64)

    # fc3: permute rows so an NHWC flatten (h, w, c) of conv2's output is
    # equivalent to PyTorch's NCHW flatten (c, h, w) against the original w3.
    c = jnp.arange(64)
    h = jnp.arange(7)
    w = jnp.arange(7)
    perm = (c[None, None, :] * 49 + h[:, None, None] * 7 + w[None, :, None]).reshape(-1)
    w3_nhwc = w3_pt[perm]

    bf = jnp.bfloat16
    return {
        "w1_big": w1_big.astype(bf),
        "b1": b1.reshape(1, 32),
        "w2": w2_mat.astype(bf),
        "b2": b2.reshape(1, 64),
        "w3": w3_nhwc.astype(bf),
        "b3": b3.reshape(1, 128),
        "w4": w4.astype(bf),
        "b4": b4.reshape(1, 10),
    }


if __name__ == "__main__":
    key = jax.random.PRNGKey(0)
    k_param, k_x = jax.random.split(key)
    params = init_params(k_param)
    # Input must be 28x28 so the flatten to 64*7*7 matches the module.
    x = jax.random.normal(k_x, (2, 1, 28, 28), jnp.float32)

    fwd = jax.jit(cnn_forward)
    logp = fwd(x, params)
    jax.block_until_ready(logp)

    assert logp.shape == (2, 10) and logp.dtype == jnp.float32
    # log_softmax rows should sum (in prob space) to ~1
    assert bool(jnp.all(jnp.abs(jnp.sum(jnp.exp(logp), axis=1) - 1.0) < 1e-4))
    print("KERNEL_OK")
</pallas_src>

<mosaic_0001>
module attributes {stable_mosaic.version = 11 : i64} {
  func.func @conv1_pool_kernel(%arg0: i32, %arg1: memref<400x36xbf16, #tpu.memory_space<vmem>>, %arg2: memref<36x128xbf16, #tpu.memory_space<vmem>>, %arg3: memref<1x32xf32, #tpu.memory_space<vmem>>, %arg4: memref<400x32xbf16, #tpu.memory_space<vmem>>) attributes {dimension_semantics = [#tpu.dimension_semantics<parallel>], iteration_bounds = array<i64: 1>, scalar_prefetch = 0 : i64, scratch_operands = 0 : i64, tpu.core_type = #tpu.core_type<tc>, window_params = [{transform_indices = @transform_0, window_bounds = array<i64: 400, 36>}, {pipeline_mode = #tpu.pipeline_mode<synchronous>, transform_indices = @transform_1, window_bounds = array<i64: 36, 128>}, {pipeline_mode = #tpu.pipeline_mode<synchronous>, transform_indices = @transform_2, window_bounds = array<i64: 1, 32>}, {transform_indices = @transform_3, window_bounds = array<i64: 400, 32>}]} {
    %c0 = arith.constant 0 : index
    %c0_0 = arith.constant 0 : index
    %0 = vector.load %arg1[%c0, %c0_0] : memref<400x36xbf16, #tpu.memory_space<vmem>>, vector<400x36xbf16>
    %c0_1 = arith.constant 0 : index
    %c0_2 = arith.constant 0 : index
    %1 = vector.load %arg2[%c0_1, %c0_2] : memref<36x128xbf16, #tpu.memory_space<vmem>>, vector<36x128xbf16>
    %cst = arith.constant dense<0.000000e+00> : vector<400x128xf32>
    %2 = tpu.matmul %0, %1, %cst {dimension_numbers = #tpu.dot_dimension_numbers<[1], [0], [0], [1], [0, 0, 1, 1], [], []>} : vector<400x36xbf16>, vector<36x128xbf16>, vector<400x128xf32> -> vector<400x128xf32>
    %3 = vector.extract_strided_slice %2 {offsets = [0, 0], sizes = [400, 32], strides = [1, 1]} : vector<400x128xf32> to vector<400x32xf32>
    %4 = vector.extract_strided_slice %2 {offsets = [0, 32], sizes = [400, 32], strides = [1, 1]} : vector<400x128xf32> to vector<400x32xf32>
    %5 = arith.maximumf %3, %4 : vector<400x32xf32>
    %6 = vector.extract_strided_slice %2 {offsets = [0, 64], sizes = [400, 32], strides = [1, 1]} : vector<400x128xf32> to vector<400x32xf32>
    %7 = arith.maximumf %5, %6 : vector<400x32xf32>
    %8 = vector.extract_strided_slice %2 {offsets = [0, 96], sizes = [400, 32], strides = [1, 1]} : vector<400x128xf32> to vector<400x32xf32>
    %9 = arith.maximumf %7, %8 : vector<400x32xf32>
    %c0_3 = arith.constant 0 : index
    %c0_4 = arith.constant 0 : index
    %10 = vector.load %arg3[%c0_3, %c0_4] : memref<1x32xf32, #tpu.memory_space<vmem>>, vector<1x32xf32>
    %11 = vector.broadcast %10 : vector<1x32xf32> to vector<400x32xf32>
    %12 = arith.addf %9, %11 : vector<400x32xf32>
    %cst_5 = arith.constant 0.000000e+00 : f32
    %13 = vector.broadcast %cst_5 : f32 to vector<400x32xf32>
    %14 = arith.maximumf %12, %13 : vector<400x32xf32>
    %15 = arith.truncf %14 : vector<400x32xf32> to vector<400x32xbf16>
    %c0_6 = arith.constant 0 : index
    %c0_7 = arith.constant 0 : index
    %16 = vector.load %arg4[%c0_6, %c0_7] : memref<400x32xbf16, #tpu.memory_space<vmem>>, vector<400x32xbf16>
    tpu.vector_store %arg4[%c0_6, %c0_7], %15 {strides = array<i32>} : memref<400x32xbf16, #tpu.memory_space<vmem>>, vector<400x32xbf16>,
    return
  }
  func.func @transform_0(%arg0: i32) -> (i32, i32) {
    %c0_i32 = arith.constant 0 : i32
    %c0_i32_0 = arith.constant 0 : i32
    return %arg0, %c0_i32 : i32, i32
  }
  func.func @transform_1(%arg0: i32) -> (i32, i32) {
    %c0_i32 = arith.constant 0 : i32
    %c0_i32_0 = arith.constant 0 : i32
    %c0_i32_1 = arith.constant 0 : i32
    return %c0_i32, %c0_i32_0 : i32, i32
  }
  func.func @transform_2(%arg0: i32) -> (i32, i32) {
    %c0_i32 = arith.constant 0 : i32
    %c0_i32_0 = arith.constant 0 : i32
    %c0_i32_1 = arith.constant 0 : i32
    return %c0_i32, %c0_i32_0 : i32, i32
  }
  func.func @transform_3(%arg0: i32) -> (i32, i32) {
    %c0_i32 = arith.constant 0 : i32
    %c0_i32_0 = arith.constant 0 : i32
    return %arg0, %c0_i32 : i32, i32
  }
}

module attributes {stable_mosaic.version = 11 : i64} {
  func.func @conv2_pool_kernel(%arg0: i32, %arg1: memref<4x112x288xbf16, #tpu.memory_space<vmem>>, %arg2: memref<288x64xbf16, #tpu.memory_space<vmem>>, %arg3: memref<1x64xf32, #tpu.memory_space<vmem>>, %arg4: memref<112x64xbf16, #tpu.memory_space<vmem>>) attributes {dimension_semantics = [#tpu.dimension_semantics<parallel>], iteration_bounds = array<i64: 1>, scalar_prefetch = 0 : i64, scratch_operands = 0 : i64, tpu.core_type = #tpu.core_type<tc>, window_params = [{transform_indices = @transform_0, window_bounds = array<i64: 4, 112, 288>}, {pipeline_mode = #tpu.pipeline_mode<synchronous>, transform_indices = @transform_1, window_bounds = array<i64: 288, 64>}, {pipeline_mode = #tpu.pipeline_mode<synchronous>, transform_indices = @transform_2, window_bounds = array<i64: 1, 64>}, {transform_indices = @transform_3, window_bounds = array<i64: 112, 64>}]} {
    %c0 = arith.constant 0 : index
    %c0_0 = arith.constant 0 : index
    %c0_1 = arith.constant 0 : index
    %0 = vector.load %arg1[%c0, %c0_0, %c0_1] : memref<4x112x288xbf16, #tpu.memory_space<vmem>>, vector<4x112x288xbf16>
    %1 = vector.shape_cast %0 : vector<4x112x288xbf16> to vector<448x288xbf16>
    %c0_2 = arith.constant 0 : index
    %c0_3 = arith.constant 0 : index
    %2 = vector.load %arg2[%c0_2, %c0_3] : memref<288x64xbf16, #tpu.memory_space<vmem>>, vector<288x64xbf16>
    %cst = arith.constant dense<0.000000e+00> : vector<448x64xf32>
    %3 = tpu.matmul %1, %2, %cst {dimension_numbers = #tpu.dot_dimension_numbers<[1], [0], [0], [1], [0, 0, 1, 1], [], []>} : vector<448x288xbf16>, vector<288x64xbf16>, vector<448x64xf32> -> vector<448x64xf32>
    %4 = vector.shape_cast %3 : vector<448x64xf32> to vector<4x112x64xf32>
    %cst_4 = arith.constant dense<0xFF800000> : vector<112x64xf32>
    %5 = vector.multi_reduction <maximumf>, %4, %cst_4 [0] : vector<4x112x64xf32> to vector<112x64xf32>
    %c0_5 = arith.constant 0 : index
    %c0_6 = arith.constant 0 : index
    %6 = vector.load %arg3[%c0_5, %c0_6] : memref<1x64xf32, #tpu.memory_space<vmem>>, vector<1x64xf32>
    %7 = vector.broadcast %6 : vector<1x64xf32> to vector<112x64xf32>
    %8 = arith.addf %5, %7 : vector<112x64xf32>
    %cst_7 = arith.constant 0.000000e+00 : f32
    %9 = vector.broadcast %cst_7 : f32 to vector<112x64xf32>
    %10 = arith.maximumf %8, %9 : vector<112x64xf32>
    %11 = arith.truncf %10 : vector<112x64xf32> to vector<112x64xbf16>
    %c0_8 = arith.constant 0 : index
    %c0_9 = arith.constant 0 : index
    %12 = vector.load %arg4[%c0_8, %c0_9] : memref<112x64xbf16, #tpu.memory_space<vmem>>, vector<112x64xbf16>
    tpu.vector_store %arg4[%c0_8, %c0_9], %11 {strides = array<i32>} : memref<112x64xbf16, #tpu.memory_space<vmem>>, vector<112x64xbf16>,
    return
  }
  func.func @transform_0(%arg0: i32) -> (i32, i32, i32) {
    %c0_i32 = arith.constant 0 : i32
    %c0_i32_0 = arith.constant 0 : i32
    %c0_i32_1 = arith.constant 0 : i32
    return %c0_i32, %arg0, %c0_i32_0 : i32, i32, i32
  }
  func.func @transform_1(%arg0: i32) -> (i32, i32) {
    %c0_i32 = arith.constant 0 : i32
    %c0_i32_0 = arith.constant 0 : i32
    %c0_i32_1 = arith.constant 0 : i32
    return %c0_i32, %c0_i32_0 : i32, i32
  }
  func.func @transform_2(%arg0: i32) -> (i32, i32) {
    %c0_i32 = arith.constant 0 : i32
    %c0_i32_0 = arith.constant 0 : i32
    %c0_i32_1 = arith.constant 0 : i32
    return %c0_i32, %c0_i32_0 : i32, i32
  }
  func.func @transform_3(%arg0: i32) -> (i32, i32) {
    %c0_i32 = arith.constant 0 : i32
    %c0_i32_0 = arith.constant 0 : i32
    return %arg0, %c0_i32 : i32, i32
  }
}

module attributes {stable_mosaic.version = 11 : i64} {
  func.func @mlp_logsoftmax_kernel(%arg0: i32, %arg1: memref<16x3136xbf16, #tpu.memory_space<vmem>>, %arg2: memref<3136x128xbf16, #tpu.memory_space<vmem>>, %arg3: memref<1x128xf32, #tpu.memory_space<vmem>>, %arg4: memref<128x10xbf16, #tpu.memory_space<vmem>>, %arg5: memref<1x10xf32, #tpu.memory_space<vmem>>, %arg6: memref<16x10xf32, #tpu.memory_space<vmem>>) attributes {dimension_semantics = [#tpu.dimension_semantics<parallel>], iteration_bounds = array<i64: 1>, scalar_prefetch = 0 : i64, scratch_operands = 0 : i64, tpu.core_type = #tpu.core_type<tc>, window_params = [{transform_indices = @transform_0, window_bounds = array<i64: 16, 3136>}, {pipeline_mode = #tpu.pipeline_mode<synchronous>, transform_indices = @transform_1, window_bounds = array<i64: 3136, 128>}, {pipeline_mode = #tpu.pipeline_mode<synchronous>, transform_indices = @transform_2, window_bounds = array<i64: 1, 128>}, {pipeline_mode = #tpu.pipeline_mode<synchronous>, transform_indices = @transform_3, window_bounds = array<i64: 128, 10>}, {pipeline_mode = #tpu.pipeline_mode<synchronous>, transform_indices = @transform_4, window_bounds = array<i64: 1, 10>}, {transform_indices = @transform_5, window_bounds = array<i64: 16, 10>}]} {
    %c0 = arith.constant 0 : index
    %c0_0 = arith.constant 0 : index
    %0 = vector.load %arg1[%c0, %c0_0] : memref<16x3136xbf16, #tpu.memory_space<vmem>>, vector<16x3136xbf16>
    %c0_1 = arith.constant 0 : index
    %c0_2 = arith.constant 0 : index
    %1 = vector.load %arg2[%c0_1, %c0_2] : memref<3136x128xbf16, #tpu.memory_space<vmem>>, vector<3136x128xbf16>
    %cst = arith.constant dense<0.000000e+00> : vector<16x128xf32>
    %2 = tpu.matmul %0, %1, %cst {dimension_numbers = #tpu.dot_dimension_numbers<[1], [0], [0], [1], [0, 0, 1, 1], [], []>} : vector<16x3136xbf16>, vector<3136x128xbf16>, vector<16x128xf32> -> vector<16x128xf32>
    %c0_3 = arith.constant 0 : index
    %c0_4 = arith.constant 0 : index
    %3 = vector.load %arg3[%c0_3, %c0_4] : memref<1x128xf32, #tpu.memory_space<vmem>>, vector<1x128xf32>
    %4 = vector.broadcast %3 : vector<1x128xf32> to vector<16x128xf32>
    %5 = arith.addf %2, %4 : vector<16x128xf32>
    %cst_5 = arith.constant 0.000000e+00 : f32
    %6 = vector.broadcast %cst_5 : f32 to vector<16x128xf32>
    %7 = arith.maximumf %5, %6 : vector<16x128xf32>
    %8 = arith.truncf %7 : vector<16x128xf32> to vector<16x128xbf16>
    %c0_6 = arith.constant 0 : index
    %c0_7 = arith.constant 0 : index
    %9 = vector.load %arg4[%c0_6, %c0_7] : memref<128x10xbf16, #tpu.memory_space<vmem>>, vector<128x10xbf16>
    %cst_8 = arith.constant dense<0.000000e+00> : vector<16x10xf32>
    %10 = tpu.matmul %8, %9, %cst_8 {dimension_numbers = #tpu.dot_dimension_numbers<[1], [0], [0], [1], [0, 0, 1, 1], [], []>} : vector<16x128xbf16>, vector<128x10xbf16>, vector<16x10xf32> -> vector<16x10xf32>
    %c0_9 = arith.constant 0 : index
    %c0_10 = arith.constant 0 : index
    %11 = vector.load %arg5[%c0_9, %c0_10] : memref<1x10xf32, #tpu.memory_space<vmem>>, vector<1x10xf32>
    %12 = vector.broadcast %11 : vector<1x10xf32> to vector<16x10xf32>
    %13 = arith.addf %10, %12 : vector<16x10xf32>
    %cst_11 = arith.constant dense<0xFF800000> : vector<16xf32>
    %14 = vector.multi_reduction <maximumf>, %13, %cst_11 [1] : vector<16x10xf32> to vector<16xf32>
    %15 = vector.shape_cast %14 : vector<16xf32> to vector<16x1xf32>
    %16 = vector.broadcast %15 : vector<16x1xf32> to vector<16x10xf32>
    %17 = arith.subf %13, %16 : vector<16x10xf32>
    %18 = math.exp %17 : vector<16x10xf32>
    %cst_12 = arith.constant dense<0.000000e+00> : vector<16xf32>
    %19 = vector.multi_reduction <add>, %18, %cst_12 [1] : vector<16x10xf32> to vector<16xf32>
    %20 = vector.shape_cast %19 : vector<16xf32> to vector<16x1xf32>
    %21 = math.log %20 : vector<16x1xf32>
    %22 = vector.broadcast %21 : vector<16x1xf32> to vector<16x10xf32>
    %23 = arith.subf %17, %22 : vector<16x10xf32>
    %c0_13 = arith.constant 0 : index
    %c0_14 = arith.constant 0 : index
    %24 = vector.load %arg6[%c0_13, %c0_14] : memref<16x10xf32, #tpu.memory_space<vmem>>, vector<16x10xf32>
    tpu.vector_store %arg6[%c0_13, %c0_14], %23 {strides = array<i32>} : memref<16x10xf32, #tpu.memory_space<vmem>>, vector<16x10xf32>,
    return
  }
  func.func @transform_0(%arg0: i32) -> (i32, i32) {
    %c0_i32 = arith.constant 0 : i32
    %c0_i32_0 = arith.constant 0 : i32
    return %arg0, %c0_i32 : i32, i32
  }
  func.func @transform_1(%arg0: i32) -> (i32, i32) {
    %c0_i32 = arith.constant 0 : i32
    %c0_i32_0 = arith.constant 0 : i32
    %c0_i32_1 = arith.constant 0 : i32
    return %c0_i32, %c0_i32_0 : i32, i32
  }
  func.func @transform_2(%arg0: i32) -> (i32, i32) {
    %c0_i32 = arith.constant 0 : i32
    %c0_i32_0 = arith.constant 0 : i32
    %c0_i32_1 = arith.constant 0 : i32
    return %c0_i32, %c0_i32_0 : i32, i32
  }
  func.func @transform_3(%arg0: i32) -> (i32, i32) {
    %c0_i32 = arith.constant 0 : i32
    %c0_i32_0 = arith.constant 0 : i32
    %c0_i32_1 = arith.constant 0 : i32
    return %c0_i32, %c0_i32_0 : i32, i32
  }
  func.func @transform_4(%arg0: i32) -> (i32, i32) {
    %c0_i32 = arith.constant 0 : i32
    %c0_i32_0 = arith.constant 0 : i32
    %c0_i32_1 = arith.constant 0 : i32
    return %c0_i32, %c0_i32_0 : i32, i32
  }
  func.func @transform_5(%arg0: i32) -> (i32, i32) {
    %c0_i32 = arith.constant 0 : i32
    %c0_i32_0 = arith.constant 0 : i32
    return %arg0, %c0_i32 : i32, i32
  }
}

</mosaic_0001>

<bundles_post_ra>
// kernel: cnn_forward.3
= control target key start
LH: loop header
LB: loop body
LE: loop exit
PB: predicated region body
PF: predicated region fallthrough
CT: control target
= control target key end

     0   :  { %vm286_vm0 = vcmask 1041408   ;;  %vm210_vm1 = vcmask 293888   ;;  %s1456_s24 = smov 64   ;;  %s1457_s25 = smov 96   ;;  %vm1228_vm2 = vcmask 257024   ;;  %s2467_s1 = inlined_call_operand.vmem [shape: bf16[36,128], index: 1, kind: input, shape index: {}]   ;;  %s2468_s0 = inlined_call_operand.vmem [shape: bf16[400,36], index: 0, kind: input, shape index: {}]   ;;  %s2469_s2 = inlined_call_operand.vmem [shape: f32[1,32], index: 2, kind: input, shape index: {}]   ;;  %s2470_s3 = inlined_call_operand.vmem [shape: bf16[400,32], index: 3, kind: output, shape index: {}]  }
   0x1   :  { %v69_v0 = vld [vmem:[%s2467_s1 + $0x10] sm:$0x3]  ;;  %v1442_v4 = vld [vmem:[%s2467_s1 + $0x8] sm:$0xff]  ;;  %v1441_v5 = vld [vmem:[%s2467_s1] sm:$0xff] }
   0x2   :  { %v204_v1 = vunpack.c.l.b16 %v69_v0  ;;  %v1416_v6 = vld [vmem:[%s2468_s0] sm:$0xff]  ;;  %v1429_v7 = vld [vmem:[%s2468_s0 + $0x68] sm:$0xff]  ;;  %v1422_v9 = vld [vmem:[%s2468_s0 + $0x30] sm:$0xff] }
   0x3   :  { %v1436_v8 = vld [vmem:[%s2468_s0 + $0xa0] sm:$0xff]  ;;  %v1417_v10 = vld [vmem:[%s2468_s0 + $0x8] sm:$0xff]  ;;  %v1430_v11 = vld [vmem:[%s2468_s0 + $0x70] sm:$0xff] }
   0x4   :  { %v207_v2 = vpack.c.b16 %v204_v1, %v204_v1  ;;  %v1423_v12 = vld [vmem:[%s2468_s0 + $0x38] sm:$0xff]  ;;  %v1437_v13 = vld [vmem:[%s2468_s0 + $0xa8] sm:$0xff]  ;;  %v1418_v14 = vld [vmem:[%s2468_s0 + $0x10] sm:$0xff] }
   0x5   :  { %v1431_v15 = vld [vmem:[%s2468_s0 + $0x78] sm:$0xff]  ;;  %v1438_v16 = vld [vmem:[%s2468_s0 + $0xb0] sm:$0xff]  ;;  %v1424_v17 = vld [vmem:[%s2468_s0 + $0x40] sm:$0xff] }
   0x6   :  { %v288_v3 = vsel %vm286_vm0, %v207_v2, 0  ;;  %v1439_v18 = vld [vmem:[%s2468_s0 + $0xb8] sm:$0xff]  ;;  %v1432_v20 = vld [vmem:[%s2468_s0 + $0x80] sm:$0xff]  ;;  %v1425_v21 = vld [vmem:[%s2468_s0 + $0x48] sm:$0xff] }
   0x7   :  { %295 = vmatpush.bf16.msra.mxu0 %v288_v3  ;;  %1444 = vmatpush.bf16.msra.mxu2 %v288_v3  ;;  %v1419_v19 = vld [vmem:[%s2468_s0 + $0x18] sm:$0xff]  ;;  %v1420_v23 = vld [vmem:[%s2468_s0 + $0x20] sm:$0xff]  ;;  %v1426_v27 = vld [vmem:[%s2468_s0 + $0x50] sm:$0xff] }
   0x8   :  { %1445 = vmatpush.bf16.msra.mxu3 %v288_v3  ;;  %1443 = vmatpush.bf16.msra.mxu1 %v288_v3  ;;  %v1440_v24 = vld [vmem:[%s2468_s0 + $0xc0] sm:$0xff]  ;;  %v1433_v28 = vld [vmem:[%s2468_s0 + $0x88] sm:$0xff]  ;;  %v1434_v37 = vld [vmem:[%s2468_s0 + $0x90] sm:$0xff] }
   0x9   :  { %v1421_v36 = vld [vmem:[%s2468_s0 + $0x28] sm:$0xff]  ;;  %v1427_v39 = vld [vmem:[%s2468_s0 + $0x58] sm:$0xff]  ;;  %v1428_v44 = vld [vmem:[%s2468_s0 + $0x60] sm:$0xff] }
   0xa   :  { %v1435_v45 = vld [vmem:[%s2468_s0 + $0x98] sm:$0xff]  ;;  %s1458_s0 = smov 32  }
   0xb   :  { %296 = vmatpush.bf16.msra.mxu0 %v1442_v4  ;;  %1447 = vmatpush.bf16.msra.mxu2 %v1442_v4 }
   0xc   :  { %1448 = vmatpush.bf16.msra.mxu3 %v1442_v4  ;;  %1446 = vmatpush.bf16.msra.mxu1 %v1442_v4 }
   0xf   :  { %297 = vmatpush.bf16.msra.mxu0 %v1441_v5  ;;  %1450 = vmatpush.bf16.msra.mxu2 %v1441_v5 }
  0x10   :  { %1451 = vmatpush.bf16.msra.mxu3 %v1441_v5  ;;  %1449 = vmatpush.bf16.msra.mxu1 %v1441_v5 }
  0x12   :  { %1391 = vmatmul.msk.bf16.vlgmr.msra.gmra.mxu0 %vm210_vm1, %v1416_v6  ;;  %1404 = vmatmul.msk.bf16.vlgmr.msra.gmra.mxu2 %vm210_vm1, %v1429_v7 }
  0x13   :  { %1411 = vmatmul.msk.bf16.vlgmr.msra.gmra.mxu3 %vm210_vm1, %v1436_v8  ;;  %1397 = vmatmul.msk.bf16.vlgmr.msra.gmra.mxu1 %vm210_vm1, %v1422_v9 }
  0x22   :  { %1392 = vmatmul.msk.bf16.gmra.mxu0 %vm210_vm1, %v1417_v10  ;;  %1405 = vmatmul.msk.bf16.gmra.mxu2 %vm210_vm1, %v1430_v11 }
  0x23   :  { %1398 = vmatmul.msk.bf16.gmra.mxu1 %vm210_vm1, %v1423_v12  ;;  %1412 = vmatmul.msk.bf16.gmra.mxu3 %vm210_vm1, %v1437_v13 }
  0x32   :  { %1393 = vmatmul.msk.bf16.gmra.mxu0 %vm210_vm1, %v1418_v14  ;;  %1406 = vmatmul.msk.bf16.gmra.mxu2 %vm210_vm1, %v1431_v15 }
  0x33   :  { %1413 = vmatmul.msk.bf16.gmra.mxu3 %vm210_vm1, %v1438_v16  ;;  %1399 = vmatmul.msk.bf16.gmra.mxu1 %vm210_vm1, %v1424_v17 }
  0x42   :  { %1394 = vmatmul.msk.bf16.gmra.mxu0 %vm210_vm1, %v1419_v19  ;;  %1407 = vmatmul.msk.bf16.gmra.mxu2 %vm210_vm1, %v1432_v20 }
  0x43   :  { %1414 = vmatmul.msk.bf16.gmra.mxu3 %vm210_vm1, %v1439_v18  ;;  %1400 = vmatmul.msk.bf16.gmra.mxu1 %vm210_vm1, %v1425_v21 }
  0x52   :  { %1395 = vmatmul.msk.bf16.gmra.mxu0 %vm210_vm1, %v1420_v23  ;;  %1408 = vmatmul.msk.bf16.gmra.mxu2 %vm210_vm1, %v1433_v28 }
  0x53   :  { %1415 = vmatmul.msk.bf16.gmra.mxu3 %vm210_vm1, %v1440_v24  ;;  %1401 = vmatmul.msk.bf16.gmra.mxu1 %vm210_vm1, %v1426_v27 }
  0x62   :  { %1396 = vmatmul.msk.bf16.gmra.mxu0 %vm210_vm1, %v1421_v36  ;;  %1409 = vmatmul.msk.bf16.gmra.mxu2 %vm210_vm1, %v1434_v37 }
  0x63   :  { %1402 = vmatmul.msk.bf16.gmra.mxu1 %vm210_vm1, %v1427_v39 }
  0x72   :  { %1410 = vmatmul.msk.bf16.gmra.mxu2 %vm210_vm1, %v1435_v45 }
  0x73   :  { %1403 = vmatmul.msk.bf16.gmra.mxu1 %vm210_vm1, %v1428_v44 }
  0x8f   :  { %v1552_v22 = vpop.f32.mrf.mxu0 }
  0x90   :  { %674 = vrot.lane.b32.xlu2 %v1552_v22, %s1456_s24  ;;  %474 = vrot.lane.b32.xlu0 %v1552_v22, %s1457_s25  ;;  %v1568_v26 = vpop.f32.mrf.mxu1 }
  0x95   :  { %v1584_v29 = vpop.f32.mrf.mxu2 }
  0x96   :  { %v1566_v25 = vpop.f32.mrf.mxu3 }
  0x97   :  { %554 = vrot.lane.b32.xlu1 %v1566_v25, %s1457_s25  ;;  %v1594_v31 = vpop.f32.mrf.mxu0 }
  0x98   :  { %698 = vrot.lane.b32.xlu2 %v1568_v26, %s1456_s24  ;;  %498 = vrot.lane.b32.xlu0 %v1568_v26, %s1457_s25  ;;  %v1592_v30 = vpop.f32.mrf.mxu1 }
  0x9d   :  { %v1604_v33 = vpop.f32.mrf.mxu2 }
  0x9e   :  { %v1596_v32 = vpop.f32.mrf.mxu3 }
  0x9f   :  { %726 = vrot.lane.b32.xlu1 %v1584_v29, %s1456_s24  ;;  %v1614_v35 = vpop.f32.mrf.mxu0 }
  0xa0   :  { %526 = vrot.lane.b32.xlu2 %v1584_v29, %s1457_s25  ;;  %754 = vrot.lane.b32.xlu0 %v1566_v25, %s1456_s24  ;;  %v1612_v34 = vpop.f32.mrf.mxu1 }
  0xa5   :  { %v1650_v41 = vpop.f32.mrf.mxu2 }
  0xa6   :  { %v1630_v38 = vpop.f32.mrf.mxu3 }
  0xa7   :  { %500 = vrot.lane.b32.xlu1 %v1592_v30, %s1457_s25  ;;  %2474 = vst [vmem:[#allocation2_spill] sm:$0xff] %v1630_v38  ;;  %v1642_v40 = vpop.f32.mrf.mxu0 }
  0xa8   :  { %556 = vrot.lane.b32.xlu2 %v1596_v32, %s1457_s25  ;;  %476 = vrot.lane.b32.xlu0 %v1594_v31, %s1457_s25  ;;  %v1652_v42 = vpop.f32.mrf.mxu1 }
  0xad   :  { %v1660_v43 = vpop.f32.mrf.mxu2 }
  0xae   :  { %v1676_v46 = vpop.f32.mrf.mxu3 }
  0xaf   :  { %756 = vrot.lane.b32.xlu1 %v1596_v32, %s1456_s24  ;;  %v1678_v47 = vpop.f32.mrf.mxu0 }
  0xb0   :  { %728 = vrot.lane.b32.xlu2 %v1604_v33, %s1456_s24  ;;  %676 = vrot.lane.b32.xlu0 %v1594_v31, %s1456_s24  ;;  %v1698_v51 = vpop.f32.mrf.mxu1 }
  0xb5   :  { %v1696_v50 = vpop.f32.mrf.mxu2 }
  0xb6   :  { %v1686_v48 = vpop.f32.mrf.mxu3 }
  0xb7   :  { %478 = vrot.lane.b32.xlu1 %v1614_v35, %s1457_s25  ;;  %2475 = vst [vmem:[#allocation3_spill] sm:$0xff] %v1686_v48  ;;  %v1706_v53 = vpop.f32.mrf.mxu0 }
  0xb8   :  { %502 = vrot.lane.b32.xlu2 %v1612_v34, %s1457_s25  ;;  %700 = vrot.lane.b32.xlu0 %v1592_v30, %s1456_s24  ;;  %v1714_v55 = vpop.f32.mrf.mxu1 }
  0xbd   :  { %v1726_v59 = vpop.f32.mrf.mxu2 }
  0xbe   :  { %v1716_v56 = vpop.f32.mrf.mxu3 }
  0xbf   :  { %678 = vrot.lane.b32.xlu1 %v1614_v35, %s1456_s24  ;;  %2477 = vst [vmem:[#allocation5_spill] sm:$0xff] %v1716_v56  ;;  %v1739_v1 = vpop.f32.mrf.mxu0 }
  0xc0   :  { %758 = vrot.lane.b32.xlu2 %v1630_v38, %s1456_s24  ;;  %528 = vrot.lane.b32.xlu0 %v1604_v33, %s1457_s25  ;;  %v1754_v8 = vpop.f32.mrf.mxu1 }
  0xc5   :  { %v1762_v12 = vpop.f32.mrf.mxu2 }
  0xc6   :  { %v1752_v7 = vpop.f32.mrf.mxu3 }
  0xc7   :  { %702 = vrot.lane.b32.xlu1 %v1612_v34, %s1456_s24  ;;  %v1764_v13 = vpop.f32.mrf.mxu0 }
  0xc8   :  { %558 = vrot.lane.b32.xlu0 %v1630_v38, %s1457_s25  ;;  %680 = vrot.lane.b32.xlu2 %v1642_v40, %s1456_s24  ;;  %v1780_v23 = vpop.f32.mrf.mxu1 }
  0xcd   :  { %v1791_v39 = vpop.f32.mrf.mxu2 }
  0xce   :  { %v1778_v21 = vpop.f32.mrf.mxu3 }
  0xcf   :  { %530 = vrot.lane.b32.xlu1 %v1650_v41, %s1457_s25 }
  0xd0   :  { %730 = vrot.lane.b32.xlu0 %v1650_v41, %s1456_s24  ;;  %704 = vrot.lane.b32.xlu2 %v1652_v42, %s1456_s24 }
  0xd7   :  { %480 = vrot.lane.b32.xlu1 %v1642_v40, %s1457_s25 }
  0xd8   :  { %504 = vrot.lane.b32.xlu0 %v1652_v42, %s1457_s25  ;;  %532 = vrot.lane.b32.xlu2 %v1660_v43, %s1457_s25 }
  0xdf   :  { %560 = vrot.lane.b32.xlu1 %v1676_v46, %s1457_s25 }
  0xe0   :  { %760 = vrot.lane.b32.xlu0 %v1676_v46, %s1456_s24  ;;  %482 = vrot.lane.b32.xlu2 %v1678_v47, %s1457_s25 }
  0xe7   :  { %732 = vrot.lane.b32.xlu1 %v1660_v43, %s1456_s24 }
  0xe8   :  { %682 = vrot.lane.b32.xlu0 %v1678_v47, %s1456_s24  ;;  %562 = vrot.lane.b32.xlu2 %v1686_v48, %s1457_s25 }
  0xea   :  { %v1694_v49 = vpop.permute.xlu2 %674 }
  0xeb   :  { %2476 = vst [vmem:[#allocation4_spill] sm:$0xff] %v1694_v49 }
  0xef   :  { %506 = vrot.lane.b32.xlu1 %v1698_v51, %s1457_s25 }
  0xf0   :  { %706 = vrot.lane.b32.xlu0 %v1698_v51, %s1456_s24  ;;  %734 = vrot.lane.b32.xlu2 %v1696_v50, %s1456_s24 }
  0xf2   :  { %v699_v52 = vpop.permute.xlu2 %698 }
  0xf7   :  { %762 = vrot.lane.b32.xlu1 %v1686_v48, %s1456_s24 }
  0xf8   :  { %534 = vrot.lane.b32.xlu0 %v1696_v50, %s1457_s25  ;;  %484 = vrot.lane.b32.xlu2 %v1706_v53, %s1457_s25 }
  0xfa   :  { %v527_v54 = vpop.permute.xlu2 %526 }
  0xfb   :  { %v650_v2 = vmax.f32 %v1584_v29, %v527_v54 }
  0xff   :  { %684 = vrot.lane.b32.xlu1 %v1706_v53, %s1456_s24 }
 0x100   :  { %564 = vrot.lane.b32.xlu0 %v1716_v56, %s1457_s25  ;;  %508 = vrot.lane.b32.xlu2 %v1714_v55, %s1457_s25 }
 0x102   :  { %v557_v57 = vpop.permute.xlu2 %556  ;;  %v1724_v58 = vpop.permute.xlu0 %474 }
 0x103   :  { %v665_v14 = vmax.f32 %v1596_v32, %v557_v57 }
 0x107   :  { %708 = vrot.lane.b32.xlu1 %v1714_v55, %s1456_s24 }
 0x108   :  { %736 = vrot.lane.b32.xlu0 %v1726_v59, %s1456_s24  ;;  %764 = vrot.lane.b32.xlu2 %v1716_v56, %s1456_s24 }
 0x109   :  { %v1734_v60 = vpop.permute.xlu1 %554 }
 0x10a   :  { %2478 = vst [vmem:[#allocation6_spill] sm:$0xff] %v1734_v60  ;;  %v729_v61 = vpop.permute.xlu2 %728  ;;  %v499_v62 = vpop.permute.xlu0 %498 }
 0x10b   :  { %v636_v63 = vmax.f32 %v1568_v26, %v499_v62 }
 0x10d   :  { %v1737_v0 = vmax.f32 %v636_v63, %v699_v52 }
 0x10f   :  { %2479 = vst [vmem:[#allocation7_spill] sm:$0xff] %v1737_v0  ;;  %536 = vrot.lane.b32.xlu1 %v1726_v59, %s1457_s25 }
 0x110   :  { %686 = vrot.lane.b32.xlu2 %v1739_v1, %s1456_s24  ;;  %486 = vrot.lane.b32.xlu0 %v1739_v1, %s1457_s25 }
 0x111   :  { %v727_v3 = vpop.permute.xlu1 %726 }
 0x112   :  { %v1748_v4 = vmax.f32 %v650_v2, %v727_v3  ;;  %v503_v5 = vpop.permute.xlu2 %502  ;;  %v1750_v6 = vpop.permute.xlu0 %754 }
 0x113   :  { %2481 = vst [vmem:[#allocation9_spill] sm:$0xff] %v1750_v6  ;;  %v1805_v2 = vpop.f32.mrf.mxu0  ;;  %v1807_v3 = vpop.f32.mrf.mxu3 }
 0x114   :  { %2480 = vst [vmem:[#allocation8_spill] sm:$0xff] %v1748_v4 }
 0x117   :  { %566 = vrot.lane.b32.xlu1 %v1752_v7, %s1457_s25 }
 0x118   :  { %710 = vrot.lane.b32.xlu2 %v1754_v8, %s1456_s24  ;;  %510 = vrot.lane.b32.xlu0 %v1754_v8, %s1457_s25 }
 0x119   :  { %v501_v9 = vpop.permute.xlu1 %500 }
 0x11a   :  { %v759_v10 = vpop.permute.xlu2 %758  ;;  %v477_v11 = vpop.permute.xlu0 %476  ;;  %v637_v24 = vmax.f32 %v1592_v30, %v501_v9  ;;  %v638_v9 = vmax.f32 %v1612_v34, %v503_v5 }
 0x11b   :  { %v625_v15 = vmax.f32 %v1594_v31, %v477_v11 }
 0x11f   :  { %738 = vrot.lane.b32.xlu1 %v1762_v12, %s1456_s24 }
 0x120   :  { %538 = vrot.lane.b32.xlu2 %v1762_v12, %s1457_s25  ;;  %688 = vrot.lane.b32.xlu0 %v1764_v13, %s1456_s24 }
 0x121   :  { %v757_v16 = vpop.permute.xlu1 %756 }
 0x122   :  { %v1774_v17 = vmax.f32 %v665_v14, %v757_v16  ;;  %v677_v18 = vpop.permute.xlu0 %676  ;;  %v681_v19 = vpop.permute.xlu2 %680 }
 0x123   :  { %v1776_v20 = vmax.f32 %v625_v15, %v677_v18 }
 0x124   :  { %2482 = vst [vmem:[#allocation10_spill] sm:$0xff] %v1774_v17 }
 0x127   :  { %488 = vrot.lane.b32.xlu1 %v1764_v13, %s1457_s25 }
 0x128   :  { %568 = vrot.lane.b32.xlu2 %v1778_v21, %s1457_s25  ;;  %712 = vrot.lane.b32.xlu0 %v1780_v23, %s1456_s24 }
 0x129   :  { %v479_v27 = vpop.permute.xlu1 %478 }
 0x12a   :  { %v701_v28 = vpop.permute.xlu0 %700  ;;  %v705_v36 = vpop.permute.xlu2 %704  ;;  %v626_v44 = vmax.f32 %v1614_v35, %v479_v27 }
 0x12b   :  { %v1789_v37 = vmax.f32 %v637_v24, %v701_v28  ;;  %v1821_v24 = vpop.f32.mrf.mxu1  ;;  %v1823_v27 = vpop.f32.mrf.mxu2 }
 0x12d   :  { %2483 = vst [vmem:[#allocation11_spill] sm:$0xff] %v1789_v37 }
 0x12f   :  { %512 = vrot.lane.b32.xlu1 %v1780_v23, %s1457_s25 }
 0x130   :  { %740 = vrot.lane.b32.xlu2 %v1791_v39, %s1456_s24  ;;  %540 = vrot.lane.b32.xlu0 %v1791_v39, %s1457_s25 }
 0x131   :  { %v679_v45 = vpop.permute.xlu1 %678 }
 0x132   :  { %v1800_v52 = vmax.f32 %v626_v44, %v679_v45  ;;  %v529_v54 = vpop.permute.xlu0 %528  ;;  %v533_v57 = vpop.permute.xlu2 %532 }
 0x133   :  { %v651_v62 = vmax.f32 %v1604_v33, %v529_v54  ;;  %v1834_v54 = vpop.f32.mrf.mxu0 }
 0x134   :  { %2484 = vst [vmem:[#allocation12_spill] sm:$0xff] %v1800_v52 }
 0x135   :  { %v1803_v63 = vmax.f32 %v651_v62, %v729_v61 }
 0x137   :  { %2485 = vst [vmem:[#allocation13_spill] sm:$0xff] %v1803_v63  ;;  %690 = vrot.lane.b32.xlu1 %v1805_v2, %s1456_s24  ;;  %v653_v63 = vmax.f32 %v1660_v43, %v533_v57 }
 0x138   :  { %570 = vrot.lane.b32.xlu0 %v1807_v3, %s1457_s25  ;;  %490 = vrot.lane.b32.xlu2 %v1805_v2, %s1457_s25 }
 0x139   :  { %v703_v11 = vpop.permute.xlu1 %702 }
 0x13a   :  { %v1816_v14 = vmax.f32 %v638_v9, %v703_v11  ;;  %v559_v61 = vpop.permute.xlu0 %558  ;;  %v483_v15 = vpop.permute.xlu2 %482 }
 0x13b   :  { %v666_v16 = vmax.f32 %v1630_v38, %v559_v61  ;;  %v1863_v17 = vpop.f32.mrf.mxu0 }
 0x13c   :  { %2486 = vst [vmem:[#allocation14_spill] sm:$0xff] %v1816_v14 }
 0x13d   :  { %v1819_v18 = vmax.f32 %v666_v16, %v759_v10 }
 0x13f   :  { %2487 = vst [vmem:[#allocation15_spill] sm:$0xff] %v1819_v18  ;;  %714 = vrot.lane.b32.xlu1 %v1821_v24, %s1456_s24  ;;  %v1850_v18 = vpop.f32.mrf.mxu1 }
 0x140   :  { %742 = vrot.lane.b32.xlu0 %v1823_v27, %s1456_s24  ;;  %514 = vrot.lane.b32.xlu2 %v1821_v24, %s1457_s25 }
 0x141   :  { %v531_v5 = vpop.permute.xlu1 %530 }
 0x142   :  { %v652_v28 = vmax.f32 %v1650_v41, %v531_v5  ;;  %v731_v44 = vpop.permute.xlu0 %730  ;;  %v563_v45 = vpop.permute.xlu2 %562 }
 0x144   :  { %v1832_v10 = vmax.f32 %v652_v28, %v731_v44  ;;  %v1848_v44 = vpop.f32.mrf.mxu3 }
 0x146   :  { %2488 = vst [vmem:[#allocation16_spill] sm:$0xff] %v1832_v10 }
 0x147   :  { %542 = vrot.lane.b32.xlu1 %v1823_v27, %s1457_s25  ;;  %v1879_v10 = vpop.f32.mrf.mxu1 }
 0x148   :  { %692 = vrot.lane.b32.xlu2 %v1834_v54, %s1456_s24  ;;  %492 = vrot.lane.b32.xlu0 %v1834_v54, %s1457_s25 }
 0x149   :  { %v481_v62 = vpop.permute.xlu1 %480 }
 0x14a   :  { %v627_v9 = vmax.f32 %v1642_v40, %v481_v62  ;;  %v505_v11 = vpop.permute.xlu0 %504  ;;  %v735_v61 = vpop.permute.xlu2 %734 }
 0x14b   :  { %v639_v16 = vmax.f32 %v1652_v42, %v505_v11 }
 0x14c   :  { %v1844_v5 = vmax.f32 %v627_v9, %v681_v19 }
 0x14d   :  { %v1846_v28 = vmax.f32 %v639_v16, %v705_v36  ;;  %v1861_v16 = vpop.f32.mrf.mxu2 }
 0x14e   :  { %2489 = vst [vmem:[#allocation17_spill] sm:$0xff] %v1844_v5 }
 0x14f   :  { %2490 = vst [vmem:[#allocation18_spill] sm:$0xff] %v1846_v28  ;;  %572 = vrot.lane.b32.xlu1 %v1848_v44, %s1457_s25 }
 0x150   :  { %716 = vrot.lane.b32.xlu2 %v1850_v18, %s1456_s24  ;;  %516 = vrot.lane.b32.xlu0 %v1850_v18, %s1457_s25 }
 0x151   :  { %v561_v62 = vpop.permute.xlu1 %560 }
 0x152   :  { %v667_v11 = vmax.f32 %v1676_v46, %v561_v62  ;;  %v761_v19 = vpop.permute.xlu0 %760  ;;  %v485_v9 = vpop.permute.xlu2 %484  ;;  %v628_v62 = vmax.f32 %v1678_v47, %v483_v15 }
 0x154   :  { %v1859_v36 = vmax.f32 %v667_v11, %v761_v19 }
 0x155   :  { %v1877_v4 = vpop.f32.mrf.mxu2 }
 0x156   :  { %2491 = vst [vmem:[#allocation19_spill] sm:$0xff] %v1859_v36 }
 0x157   :  { %744 = vrot.lane.b32.xlu1 %v1861_v16, %s1456_s24 }
 0x158   :  { %544 = vrot.lane.b32.xlu2 %v1861_v16, %s1457_s25  ;;  %694 = vrot.lane.b32.xlu0 %v1863_v17, %s1456_s24 }
 0x159   :  { %v733_v6 = vpop.permute.xlu1 %732 }
 0x15a   :  { %v1873_v11 = vmax.f32 %v653_v63, %v733_v6  ;;  %v683_v19 = vpop.permute.xlu0 %682  ;;  %v509_v36 = vpop.permute.xlu2 %508 }
 0x15b   :  { %v1875_v60 = vmax.f32 %v628_v62, %v683_v19  ;;  %v1890_v19 = vpop.f32.mrf.mxu0 }
 0x15c   :  { %2492 = vst [vmem:[#allocation20_spill] sm:$0xff] %v1873_v11  ;;  %v668_v11 = vmax.f32 %v1686_v48, %v563_v45  ;;  %v629_v45 = vmax.f32 %v1706_v53, %v485_v9  ;;  %v641_v9 = vmax.f32 %v1714_v55, %v509_v36 }
 0x15d   :  { %v1906_v5 = vpop.f32.mrf.mxu2 }
 0x15f   :  { %494 = vrot.lane.b32.xlu1 %v1863_v17, %s1457_s25 }
 0x160   :  { %746 = vrot.lane.b32.xlu2 %v1877_v4, %s1456_s24  ;;  %718 = vrot.lane.b32.xlu0 %v1879_v10, %s1456_s24 }
 0x161   :  { %v507_v57 = vpop.permute.xlu1 %506 }
 0x162   :  { %v640_v6 = vmax.f32 %v1698_v51, %v507_v57  ;;  %v707_v63 = vpop.permute.xlu0 %706  ;;  %v765_v15 = vpop.permute.xlu2 %764 }
 0x164   :  { %v1888_v62 = vmax.f32 %v640_v6, %v707_v63  ;;  %v1902_v63 = vpop.f32.mrf.mxu1 }
 0x166   :  { %2493 = vst [vmem:[#allocation21_spill] sm:$0xff] %v1888_v62 }
 0x167   :  { %518 = vrot.lane.b32.xlu1 %v1879_v10, %s1457_s25 }
 0x168   :  { %546 = vrot.lane.b32.xlu0 %v1877_v4, %s1457_s25  ;;  %496 = vrot.lane.b32.xlu2 %v1890_v19, %s1457_s25 }
 0x169   :  { %v763_v28 = vpop.permute.xlu1 %762 }
 0x16a   :  { %v1899_v14 = vmax.f32 %v668_v11, %v763_v28  ;;  %v535_v57 = vpop.permute.xlu0 %534  ;;  %v687_v0 = vpop.permute.xlu2 %686 }
 0x16b   :  { %v654_v6 = vmax.f32 %v1696_v50, %v535_v57 }
 0x16c   :  { %2494 = vst [vmem:[#allocation22_spill] sm:$0xff] %v1899_v14 }
 0x16d   :  { %v1904_v62 = vmax.f32 %v654_v6, %v735_v61  ;;  %v1918_v6 = vpop.f32.mrf.mxu1 }
 0x16f   :  { %2495 = vst [vmem:[#allocation23_spill] sm:$0xff] %v1904_v62  ;;  %696 = vrot.lane.b32.xlu1 %v1890_v19, %s1456_s24 }
 0x170   :  { %748 = vrot.lane.b32.xlu0 %v1906_v5, %s1456_s24  ;;  %520 = vrot.lane.b32.xlu2 %v1902_v63, %s1457_s25 }
 0x171   :  { %v685_v28 = vpop.permute.xlu1 %684 }
 0x172   :  { %v1915_v11 = vmax.f32 %v629_v45, %v685_v28  ;;  %v565_v57 = vpop.permute.xlu0 %564  ;;  %v711_v14 = vpop.permute.xlu2 %710 }
 0x173   :  { %v669_v61 = vmax.f32 %v1716_v56, %v565_v57  ;;  %v1931_v56 = vpop.f32.mrf.mxu2 }
 0x174   :  { %2496 = vst [vmem:[#allocation24_spill] sm:$0xff] %v1915_v11 }
 0x175   :  { %v1920_v62 = vmax.f32 %v669_v61, %v765_v15  ;;  %v1933_v15 = vpop.f32.mrf.mxu1 }
 0x177   :  { %2497 = vst [vmem:[#allocation25_spill] sm:$0xff] %v1920_v62  ;;  %720 = vrot.lane.b32.xlu1 %v1902_v63, %s1456_s24 }
 0x178   :  { %522 = vrot.lane.b32.xlu0 %v1918_v6, %s1457_s25  ;;  %722 = vrot.lane.b32.xlu2 %v1918_v6, %s1456_s24 }
 0x179   :  { %v709_v45 = vpop.permute.xlu1 %708 }
 0x17a   :  { %v1929_v28 = vmax.f32 %v641_v9, %v709_v45  ;;  %v737_v11 = vpop.permute.xlu0 %736  ;;  %v539_v57 = vpop.permute.xlu2 %538 }
 0x17b   :  { %v1949_v52 = vpop.f32.mrf.mxu2 }
 0x17c   :  { %2498 = vst [vmem:[#allocation26_spill] sm:$0xff] %v1929_v28 }
 0x17f   :  { %548 = vrot.lane.b32.xlu1 %v1906_v5, %s1457_s25 }
 0x180   :  { %724 = vrot.lane.b32.xlu0 %v1933_v15, %s1456_s24  ;;  %550 = vrot.lane.b32.xlu2 %v1931_v56, %s1457_s25 }
 0x181   :  { %v537_v36 = vpop.permute.xlu1 %536 }
 0x182   :  { %v655_v61 = vmax.f32 %v1726_v59, %v537_v36  ;;  %v1942_v9 = vpop.permute.xlu2 %568  ;;  %v487_v45 = vpop.permute.xlu0 %486 }
 0x183   :  { %v630_v62 = vmax.f32 %v1739_v1, %v487_v45 }
 0x184   :  { %v1945_v28 = vmax.f32 %v655_v61, %v737_v11 }
 0x185   :  { %v1947_v37 = vmax.f32 %v630_v62, %v687_v0  ;;  %v656_v0 = vmax.f32 %v1762_v12, %v539_v57 }
 0x186   :  { %2499 = vst [vmem:[#allocation27_spill] sm:$0xff] %v1945_v28 }
 0x187   :  { %2500 = vst [vmem:[#allocation28_spill] sm:$0xff] %v1947_v37  ;;  %750 = vrot.lane.b32.xlu1 %v1931_v56, %s1456_s24 }
 0x188   :  { %552 = vrot.lane.b32.xlu0 %v1949_v52, %s1457_s25  ;;  %752 = vrot.lane.b32.xlu2 %v1949_v52, %s1456_s24 }
 0x189   :  { %v1957_v36 = vpop.permute.xlu1 %566 }
 0x18a   :  { %v741_v49 = vpop.permute.xlu2 %740  ;;  %v511_v48 = vpop.permute.xlu0 %510 }
 0x18b   :  { %v642_v11 = vmax.f32 %v1754_v8, %v511_v48 }
 0x18d   :  { %v1960_v61 = vmax.f32 %v642_v11, %v711_v14 }
 0x18f   :  { %2501 = vst [vmem:[#allocation29_spill] sm:$0xff] %v1960_v61  ;;  %524 = vrot.lane.b32.xlu1 %v1933_v15, %s1457_s25 }
 0x190   :  { %766 = vrot.lane.b32.xlu0 %v1752_v7, %s1456_s24  ;;  %770 = vrot.lane.b32.xlu2 %v1807_v3, %s1456_s24 }
 0x191   :  { %v739_v62 = vpop.permute.xlu1 %738 }
 0x192   :  { %v1969_v45 = vmax.f32 %v656_v0, %v739_v62  ;;  %v689_v28 = vpop.permute.xlu0 %688  ;;  %v491_v37 = vpop.permute.xlu2 %490 }
 0x194   :  { %2502 = vst [vmem:[#allocation30_spill] sm:$0xff] %v1969_v45 }
 0x197   :  { %768 = vrot.lane.b32.xlu1 %v1778_v21, %s1456_s24 }
 0x198   :  { %772 = vrot.lane.b32.xlu0 %v1848_v44, %s1456_s24  ;;  %876 = vrot.lane.b32.xlu2 %v1594_v31, %s1458_s0 }
 0x199   :  { %v489_v48 = vpop.permute.xlu1 %488 }
 0x19a   :  { %v631_v14 = vmax.f32 %v1764_v13, %v489_v48  ;;  %v713_v57 = vpop.permute.xlu0 %712  ;;  %v515_v11 = vpop.permute.xlu2 %514 }
 0x19c   :  { %v1978_v61 = vmax.f32 %v631_v14, %v689_v28  ;;  %v632_v14 = vmax.f32 %v1805_v2, %v491_v37 }
 0x19f   :  { %874 = vrot.lane.b32.xlu1 %v1552_v22, %s1458_s0 }
 0x1a0   :  { %878 = vrot.lane.b32.xlu0 %v1614_v35, %s1458_s0  ;;  %882 = vrot.lane.b32.xlu2 %v1678_v47, %s1458_s0 }
 0x1a1   :  { %v513_v0 = vpop.permute.xlu1 %512 }
 0x1a2   :  { %v643_v62 = vmax.f32 %v1780_v23, %v513_v0  ;;  %v541_v31 = vpop.permute.xlu0 %540  ;;  %v693_v45 = vpop.permute.xlu2 %692 }
 0x1a3   :  { %v657_v48 = vmax.f32 %v1791_v39, %v541_v31 }
 0x1a4   :  { %v1988_v38 = vmax.f32 %v643_v62, %v713_v57 }
 0x1a5   :  { %v1990_v28 = vmax.f32 %v657_v48, %v741_v49  ;;  %v644_v49 = vmax.f32 %v1821_v24, %v515_v11 }
 0x1a7   :  { %880 = vrot.lane.b32.xlu1 %v1642_v40, %s1458_s0 }
 0x1a8   :  { %884 = vrot.lane.b32.xlu0 %v1706_v53, %s1458_s0  ;;  %888 = vrot.lane.b32.xlu2 %v1764_v13, %s1458_s0 }
 0x1a9   :  { %v691_v35 = vpop.permute.xlu1 %690 }
 0x1aa   :  { %v1999_v47 = vmax.f32 %v632_v14, %v691_v35  ;;  %v2001_v0 = vpop.permute.xlu0 %570  ;;  %v717_v57 = vpop.permute.xlu2 %716 }
 0x1af   :  { %886 = vrot.lane.b32.xlu1 %v1739_v1, %s1458_s0 }
 0x1b0   :  { %890 = vrot.lane.b32.xlu0 %v1805_v2, %s1458_s0  ;;  %894 = vrot.lane.b32.xlu2 %v1863_v17, %s1458_s0 }
 0x1b1   :  { %v715_v40 = vpop.permute.xlu1 %714 }
 0x1b2   :  { %v2010_v53 = vmax.f32 %v644_v49, %v715_v40  ;;  %v743_v13 = vpop.permute.xlu0 %742  ;;  %v545_v37 = vpop.permute.xlu2 %544 }
 0x1b7   :  { %892 = vrot.lane.b32.xlu1 %v1834_v54, %s1458_s0 }
 0x1b8   :  { %896 = vrot.lane.b32.xlu0 %v1890_v19, %s1458_s0  ;;  %900 = vrot.lane.b32.xlu2 %v1592_v30, %s1458_s0 }
 0x1b9   :  { %v543_v1 = vpop.permute.xlu1 %542 }
 0x1ba   :  { %v658_v2 = vmax.f32 %v1823_v27, %v543_v1  ;;  %v747_v11 = vpop.permute.xlu2 %746  ;;  %v493_v62 = vpop.permute.xlu0 %492 }
 0x1bb   :  { %v633_v31 = vmax.f32 %v1834_v54, %v493_v62 }
 0x1bc   :  { %v2020_v48 = vmax.f32 %v658_v2, %v743_v13 }
 0x1bd   :  { %v2022_v14 = vmax.f32 %v633_v31, %v693_v45  ;;  %v659_v45 = vmax.f32 %v1861_v16, %v545_v37 }
 0x1bf   :  { %898 = vrot.lane.b32.xlu1 %v1568_v26, %s1458_s0 }
 0x1c0   :  { %902 = vrot.lane.b32.xlu0 %v1612_v34, %s1458_s0  ;;  %906 = vrot.lane.b32.xlu2 %v1698_v51, %s1458_s0 }
 0x1c1   :  { %v2030_v30 = vpop.permute.xlu1 %572 }
 0x1c2   :  { %v517_v35 = vpop.permute.xlu0 %516  ;;  %v497_v49 = vpop.permute.xlu2 %496 }
 0x1c3   :  { %v645_v40 = vmax.f32 %v1850_v18, %v517_v35 }
 0x1c5   :  { %v2033_v54 = vmax.f32 %v645_v40, %v717_v57 }
 0x1c7   :  { %904 = vrot.lane.b32.xlu1 %v1652_v42, %s1458_s0 }
 0x1c8   :  { %908 = vrot.lane.b32.xlu0 %v1714_v55, %s1458_s0  ;;  %912 = vrot.lane.b32.xlu2 %v1780_v23, %s1458_s0 }
 0x1c9   :  { %v745_v26 = vpop.permute.xlu1 %744 }
 0x1ca   :  { %v2042_v34 = vmax.f32 %v659_v45, %v745_v26  ;;  %v2044_v51 = vpop.permute.xlu0 %694  ;;  %v521_v13 = vpop.permute.xlu2 %520 }
 0x1cf   :  { %910 = vrot.lane.b32.xlu1 %v1754_v8, %s1458_s0 }
 0x1d0   :  { %914 = vrot.lane.b32.xlu0 %v1821_v24, %s1458_s0  ;;  %918 = vrot.lane.b32.xlu2 %v1879_v10, %s1458_s0 }
 0x1d1   :  { %v2052_v42 = vpop.permute.xlu1 %494 }
 0x1d2   :  { %v719_v55 = vpop.permute.xlu0 %718  ;;  %v723_v57 = vpop.permute.xlu2 %722 }
 0x1d7   :  { %916 = vrot.lane.b32.xlu1 %v1850_v18, %s1458_s0  ;;  %v635_v18 = vmax.f32 %v1890_v19, %v497_v49 }
 0x1d8   :  { %920 = vrot.lane.b32.xlu0 %v1902_v63, %s1458_s0  ;;  %924 = vrot.lane.b32.xlu2 %v1933_v15, %s1458_s0 }
 0x1d9   :  { %v519_v8 = vpop.permute.xlu1 %518 }
 0x1da   :  { %v646_v23 = vmax.f32 %v1879_v10, %v519_v8  ;;  %v547_v24 = vpop.permute.xlu0 %546  ;;  %v551_v37 = vpop.permute.xlu2 %550 }
 0x1db   :  { %v660_v1 = vmax.f32 %v1877_v4, %v547_v24 }
 0x1dc   :  { %v2062_v2 = vmax.f32 %v646_v23, %v719_v55 }
 0x1dd   :  { %v2064_v62 = vmax.f32 %v660_v1, %v747_v11  ;;  %v647_v11 = vmax.f32 %v1902_v63, %v521_v13 }
 0x1df   :  { %922 = vrot.lane.b32.xlu1 %v1918_v6, %s1458_s0 }
 0x1e0   :  { %926 = vrot.lane.b32.xlu0 %v1584_v29, %s1458_s0  ;;  %930 = vrot.lane.b32.xlu2 %v1650_v41, %s1458_s0  ;;  %v672_v29 = vmax.f32 %v1807_v3, %v2001_v0 }
 0x1e1   :  { %v697_v10 = vpop.permute.xlu1 %696 }
 0x1e2   :  { %v2073_v31 = vmax.f32 %v635_v18, %v697_v10  ;;  %v749_v35 = vpop.permute.xlu0 %748  ;;  %v753_v40 = vpop.permute.xlu2 %752  ;;  %v670_v10 = vmax.f32 %v1752_v7, %v1957_v36 }
 0x1e7   :  { %928 = vrot.lane.b32.xlu1 %v1604_v33, %s1458_s0 }
 0x1e8   :  { %932 = vrot.lane.b32.xlu0 %v1660_v43, %s1458_s0  ;;  %936 = vrot.lane.b32.xlu2 %v1726_v59, %s1458_s0  ;;  %v2100_v59 = vld [vmem:[%s2469_s2] ss:$0 sm:$0xff] }
 0x1e9   :  { %v721_v41 = vpop.permute.xlu1 %720 }
 0x1ea   :  { %v2084_v19 = vmax.f32 %v647_v11, %v721_v41  ;;  %v523_v49 = vpop.permute.xlu0 %522  ;;  %v771_v45 = vpop.permute.xlu2 %770 }
 0x1eb   :  { %v648_v26 = vmax.f32 %v1918_v6, %v523_v49  ;;  %v2087_v55 = vmax.f32 %v672_v29, %v771_v45  ;;  %v671_v49 = vmax.f32 %v1778_v21, %v1942_v9 }
 0x1ed   :  { %v2089_v33 = vmax.f32 %v648_v26, %v723_v57 }
 0x1ef   :  { %934 = vrot.lane.b32.xlu1 %v1696_v50, %s1458_s0 }
 0x1f0   :  { %938 = vrot.lane.b32.xlu0 %v1762_v12, %s1458_s0  ;;  %942 = vrot.lane.b32.xlu2 %v1823_v27, %s1458_s0  ;;  %v662_v27 = vmax.f32 %v1931_v56, %v551_v37 }
 0x1f1   :  { %v549_v43 = vpop.permute.xlu1 %548 }
 0x1f2   :  { %v661_v63 = vmax.f32 %v1906_v5, %v549_v43  ;;  %v2103_v6 = vpop.permute.xlu0 %724  ;;  %v877_v0 = vpop.permute.xlu2 %876 }
 0x1f3   :  { %v1025_v13 = vmax.f32 %v1776_v20, %v877_v0  ;;  %v2504_v0 = vld [vmem:[#allocation3_spill] sm:$0xff] }
 0x1f4   :  { %v2106_v50 = vmax.f32 %v661_v63, %v749_v35 }
 0x1f5   :  { %v1079_v12 = vadd.f32 %v2100_v59, %v1025_v13  ;;  %v2505_v13 = vld [vmem:[#allocation4_spill] sm:$0xff] }
 0x1f7   :  { %v1129_v57 = vmax.f32 %v1079_v12, 0.0  ;;  %940 = vrot.lane.b32.xlu1 %v1791_v39, %s1458_s0 }
 0x1f8   :  { %944 = vrot.lane.b32.xlu0 %v1861_v16, %s1458_s0  ;;  %948 = vrot.lane.b32.xlu2 %v1906_v5, %s1458_s0 }
 0x1f9   :  { %v1179_v8 = vpack.c.bf16 %v1129_v57, %v1129_v57  ;;  %v751_v23 = vpop.permute.xlu1 %750 }
 0x1fa   :  { %v2116_v20 = vmax.f32 %v662_v27, %v751_v23  ;;  %v553_v24 = vpop.permute.xlu0 %552  ;;  %v883_v1 = vpop.permute.xlu2 %882 }
 0x1fb   :  { %1230 = vst.msk [vmem:[%s2470_s3 + $0x4] sm:$0xf] %vm1228_vm2, %v1179_v8  ;;  %v663_v39 = vmax.f32 %v1949_v52, %v553_v24  ;;  %v1028_v37 = vmax.f32 %v1875_v60, %v883_v1  ;;  %v2507_v1 = vld [vmem:[#allocation11_spill] sm:$0xff] }
 0x1fd   :  { %v1082_v16 = vadd.f32 %v2100_v59, %v1028_v37  ;;  %v2125_v18 = vmax.f32 %v663_v39, %v753_v40  ;;  %v634_v40 = vmax.f32 %v1863_v17, %v2052_v42 }
 0x1ff   :  { %v1132_v5 = vmax.f32 %v1082_v16, 0.0  ;;  %946 = vrot.lane.b32.xlu1 %v1877_v4, %s1458_s0  ;;  %v834_v42 = vmax.f32 %v634_v40, %v2044_v51  ;;  %v2503_v51 = vld [vmem:[#allocation2_spill] sm:$0xff] }
 0x200   :  { %950 = vrot.lane.b32.xlu0 %v1931_v56, %s1458_s0  ;;  %954 = vrot.lane.b32.xlu2 %v1566_v25, %s1458_s0 }
 0x201   :  { %v1182_v35 = vpack.c.bf16 %v1132_v5, %v1132_v5  ;;  %v2135_v11 = vpop.permute.xlu1 %524 }
 0x202   :  { %v767_v60 = vpop.permute.xlu0 %766  ;;  %v889_v29 = vpop.permute.xlu2 %888 }
 0x203   :  { %1233 = vst.msk [vmem:[%s2470_s3 + $0x10] sm:$0xf] %vm1228_vm2, %v1182_v35  ;;  %v2141_v4 = vmax.f32 %v670_v10, %v767_v60  ;;  %v1031_v56 = vmax.f32 %v1978_v61, %v889_v29  ;;  %v673_v61 = vmax.f32 %v1848_v44, %v2030_v30  ;;  %v2508_v60 = vld [vmem:[#allocation5_spill] sm:$0xff] }
 0x205   :  { %v1085_v41 = vadd.f32 %v2100_v59, %v1031_v56 }
 0x207   :  { %v1135_v36 = vmax.f32 %v1085_v41, 0.0  ;;  %952 = vrot.lane.b32.xlu1 %v1949_v52, %s1458_s0 }
 0x208   :  { %956 = vrot.lane.b32.xlu0 %v1596_v32, %s1458_s0  ;;  %960 = vrot.lane.b32.xlu2 %v1676_v46, %s1458_s0  ;;  %v624_v46 = vmax.f32 %v1552_v22, %v1724_v58  ;;  %v2506_v22 = vld [vmem:[#allocation12_spill] sm:$0xff] }
 0x209   :  { %v1185_v45 = vpack.c.bf16 %v1135_v36, %v1135_v36  ;;  %v769_v17 = vpop.permute.xlu1 %768  ;;  %v2509_v36 = vld [vmem:[#allocation17_spill] sm:$0xff] }
 0x20a   :  { %v2158_v26 = vmax.f32 %v671_v49, %v769_v17  ;;  %v773_v43 = vpop.permute.xlu0 %772  ;;  %v895_v52 = vpop.permute.xlu2 %894  ;;  %v824_v12 = vmax.f32 %v624_v46, %v2505_v13 }
 0x20b   :  { %1236 = vst.msk [vmem:[%s2470_s3 + $0x1c] sm:$0xf] %vm1228_vm2, %v1185_v45  ;;  %v2164_v32 = vmax.f32 %v673_v61, %v773_v43  ;;  %v1034_v9 = vmax.f32 %v834_v42, %v895_v52 }
 0x20d   :  { %v1088_v30 = vadd.f32 %v2100_v59, %v1034_v9 }
 0x20f   :  { %v1138_v63 = vmax.f32 %v1088_v30, 0.0  ;;  %958 = vrot.lane.b32.xlu1 %v2503_v51, %s1458_s0 }
 0x210   :  { %962 = vrot.lane.b32.xlu0 %v2504_v0, %s1458_s0  ;;  %966 = vrot.lane.b32.xlu2 %v1752_v7, %s1458_s0 }
 0x211   :  { %v1188_v57 = vpack.c.bf16 %v1138_v63, %v1138_v63  ;;  %v875_v27 = vpop.permute.xlu1 %874 }
 0x212   :  { %v1024_v8 = vmax.f32 %v824_v12, %v875_v27  ;;  %v879_v23 = vpop.permute.xlu0 %878  ;;  %v901_v24 = vpop.permute.xlu2 %900 }
 0x213   :  { %1239 = vst.msk [vmem:[%s2470_s3 + $0x28] sm:$0xf] %vm1228_vm2, %v1188_v57  ;;  %v1026_v58 = vmax.f32 %v2506_v22, %v879_v23  ;;  %v1037_v39 = vmax.f32 %v2507_v1, %v901_v24  ;;  %v2512_v57 = vld [vmem:[#allocation28_spill] sm:$0xff] }
 0x214   :  { %v1078_v37 = vadd.f32 %v2100_v59, %v1024_v8 }
 0x215   :  { %v1080_v16 = vadd.f32 %v2100_v59, %v1026_v58  ;;  %v1091_v7 = vadd.f32 %v2100_v59, %v1037_v39 }
 0x216   :  { %v1128_v5 = vmax.f32 %v1078_v37, 0.0 }
 0x217   :  { %v1130_v10 = vmax.f32 %v1080_v16, 0.0  ;;  %v1141_v35 = vmax.f32 %v1091_v7, 0.0  ;;  %964 = vrot.lane.b32.xlu1 %v2508_v60, %s1458_s0 }
 0x218   :  { %v1178_v29 = vpack.c.bf16 %v1128_v5, %v1128_v5  ;;  %968 = vrot.lane.b32.xlu0 %v1778_v21, %s1458_s0  ;;  %972 = vrot.lane.b32.xlu2 %v1848_v44, %s1458_s0  ;;  %v2510_v21 = vld [vmem:[#allocation24_spill] sm:$0xff]  ;;  %v2511_v44 = vld [vmem:[#allocation21_spill] sm:$0xff] }
 0x219   :  { %v1180_v56 = vpack.c.bf16 %v1130_v10, %v1130_v10  ;;  %v1191_v40 = vpack.c.bf16 %v1141_v35, %v1141_v35  ;;  %v881_v41 = vpop.permute.xlu1 %880 }
 0x21a   :  { %1229 = vst.msk [vmem:[%s2470_s3] sm:$0xf] %vm1228_vm2, %v1178_v29  ;;  %v1027_v49 = vmax.f32 %v2509_v36, %v881_v41  ;;  %v885_v61 = vpop.permute.xlu0 %884  ;;  %v907_v45 = vpop.permute.xlu2 %906 }
 0x21b   :  { %1231 = vst.msk [vmem:[%s2470_s3 + $0x8] sm:$0xf] %vm1228_vm2, %v1180_v56  ;;  %v1029_v17 = vmax.f32 %v2510_v21, %v885_v61  ;;  %v1040_v42 = vmax.f32 %v2511_v44, %v907_v45 }
 0x21c   :  { %1242 = vst.msk [vmem:[%s2470_s3 + $0x34] sm:$0xf] %vm1228_vm2, %v1191_v40  ;;  %v1081_v43 = vadd.f32 %v2100_v59, %v1027_v49 }
 0x21d   :  { %v1083_v52 = vadd.f32 %v2100_v59, %v1029_v17  ;;  %v1094_v9 = vadd.f32 %v2100_v59, %v1040_v42  ;;  %v2513_v42 = vld [vmem:[#allocation7_spill] sm:$0xff] }
 0x21e   :  { %v1131_v46 = vmax.f32 %v1081_v43, 0.0 }
 0x21f   :  { %v1133_v30 = vmax.f32 %v1083_v52, 0.0  ;;  %v1144_v63 = vmax.f32 %v1094_v9, 0.0  ;;  %970 = vrot.lane.b32.xlu1 %v1807_v3, %s1458_s0  ;;  %v2514_v52 = vld [vmem:[#allocation14_spill] sm:$0xff] }
 0x220   :  { %v1181_v51 = vpack.c.bf16 %v1131_v46, %v1131_v46 }
 0x221   :  { %v1183_v0 = vpack.c.bf16 %v1133_v30, %v1133_v30  ;;  %v1194_v13 = vpack.c.bf16 %v1144_v63, %v1144_v63  ;;  %v887_v12 = vpop.permute.xlu1 %886 }
 0x222   :  { %1232 = vst.msk [vmem:[%s2470_s3 + $0xc] sm:$0xf] %vm1228_vm2, %v1181_v51  ;;  %v1030_v27 = vmax.f32 %v2512_v57, %v887_v12  ;;  %v891_v8 = vpop.permute.xlu0 %890  ;;  %v913_v23 = vpop.permute.xlu2 %912 }
 0x223   :  { %1234 = vst.msk [vmem:[%s2470_s3 + $0x14] sm:$0xf] %vm1228_vm2, %v1183_v0  ;;  %v1032_v3 = vmax.f32 %v1999_v47, %v891_v8  ;;  %v1043_v24 = vmax.f32 %v1988_v38, %v913_v23  ;;  %v2515_v23 = vld [vmem:[#allocation18_spill] sm:$0xff] }
 0x224   :  { %1245 = vst.msk [vmem:[%s2470_s3 + $0x40] sm:$0xf] %vm1228_vm2, %v1194_v13  ;;  %v1084_v22 = vadd.f32 %v2100_v59, %v1030_v27 }
 0x225   :  { %v1086_v58 = vadd.f32 %v2100_v59, %v1032_v3  ;;  %v1097_v1 = vadd.f32 %v2100_v59, %v1043_v24 }
 0x226   :  { %v1134_v39 = vmax.f32 %v1084_v22, 0.0 }
 0x227   :  { %v1136_v37 = vmax.f32 %v1086_v58, 0.0  ;;  %v1147_v16 = vmax.f32 %v1097_v1, 0.0  ;;  %v2516_v58 = vld [vmem:[#allocation26_spill] sm:$0xff] }
 0x228   :  { %v1184_v7 = vpack.c.bf16 %v1134_v39, %v1134_v39  ;;  %v2517_v39 = vld [vmem:[#allocation16_spill] sm:$0xff] }
 0x229   :  { %v1186_v5 = vpack.c.bf16 %v1136_v37, %v1136_v37  ;;  %v1197_v10 = vpack.c.bf16 %v1147_v16, %v1147_v16  ;;  %v893_v47 = vpop.permute.xlu1 %892 }
 0x22a   :  { %1235 = vst.msk [vmem:[%s2470_s3 + $0x18] sm:$0xf] %vm1228_vm2, %v1184_v7  ;;  %v1033_v38 = vmax.f32 %v2022_v14, %v893_v47  ;;  %v897_v35 = vpop.permute.xlu0 %896  ;;  %v919_v60 = vpop.permute.xlu2 %918  ;;  %v649_v14 = vmax.f32 %v1933_v15, %v2135_v11 }
 0x22b   :  { %1237 = vst.msk [vmem:[%s2470_s3 + $0x20] sm:$0xf] %vm1228_vm2, %v1186_v5  ;;  %v1035_v29 = vmax.f32 %v2073_v31, %v897_v35  ;;  %v1046_v56 = vmax.f32 %v2062_v2, %v919_v60 }
 0x22c   :  { %1248 = vst.msk [vmem:[%s2470_s3 + $0x4c] sm:$0xf] %vm1228_vm2, %v1197_v10  ;;  %v1087_v40 = vadd.f32 %v2100_v59, %v1033_v38  ;;  %v849_v44 = vmax.f32 %v649_v14, %v2103_v6 }
 0x22d   :  { %v1089_v41 = vadd.f32 %v2100_v59, %v1035_v29  ;;  %v1100_v36 = vadd.f32 %v2100_v59, %v1046_v56 }
 0x22e   :  { %v1137_v49 = vmax.f32 %v1087_v40, 0.0  ;;  %v2518_v40 = vld [vmem:[#allocation29_spill] sm:$0xff] }
 0x22f   :  { %v1139_v61 = vmax.f32 %v1089_v41, 0.0  ;;  %v1150_v45 = vmax.f32 %v1100_v36, 0.0 }
 0x230   :  { %v1187_v31 = vpack.c.bf16 %v1137_v49, %v1137_v49 }
 0x231   :  { %v1189_v21 = vpack.c.bf16 %v1139_v61, %v1139_v61  ;;  %v1200_v2 = vpack.c.bf16 %v1150_v45, %v1150_v45  ;;  %v899_v17 = vpop.permute.xlu1 %898  ;;  %v2519_v61 = vld [vmem:[#allocation27_spill] sm:$0xff] }
 0x232   :  { %1238 = vst.msk [vmem:[%s2470_s3 + $0x24] sm:$0xf] %vm1228_vm2, %v1187_v31  ;;  %v1036_v15 = vmax.f32 %v2513_v42, %v899_v17  ;;  %v903_v11 = vpop.permute.xlu0 %902  ;;  %v925_v43 = vpop.permute.xlu2 %924 }
 0x233   :  { %1240 = vst.msk [vmem:[%s2470_s3 + $0x2c] sm:$0xf] %vm1228_vm2, %v1189_v21  ;;  %v1038_v9 = vmax.f32 %v2514_v52, %v903_v11  ;;  %v1049_v46 = vmax.f32 %v849_v44, %v925_v43 }
 0x234   :  { %1251 = vst.msk [vmem:[%s2470_s3 + $0x58] sm:$0xf] %vm1228_vm2, %v1200_v2  ;;  %v1090_v6 = vadd.f32 %v2100_v59, %v1036_v15 }
 0x235   :  { %v1092_v30 = vadd.f32 %v2100_v59, %v1038_v9  ;;  %v1103_v63 = vadd.f32 %v2100_v59, %v1049_v46 }
 0x236   :  { %v1140_v51 = vmax.f32 %v1090_v6, 0.0 }
 0x237   :  { %v1142_v0 = vmax.f32 %v1092_v30, 0.0  ;;  %v1153_v13 = vmax.f32 %v1103_v63, 0.0 }
 0x238   :  { %v1190_v12 = vpack.c.bf16 %v1140_v51, %v1140_v51 }
 0x239   :  { %v1192_v57 = vpack.c.bf16 %v1142_v0, %v1142_v0  ;;  %v1203_v27 = vpack.c.bf16 %v1153_v13, %v1153_v13  ;;  %v905_v8 = vpop.permute.xlu1 %904 }
 0x23a   :  { %1241 = vst.msk [vmem:[%s2470_s3 + $0x30] sm:$0xf] %vm1228_vm2, %v1190_v12  ;;  %v1039_v3 = vmax.f32 %v2515_v23, %v905_v8  ;;  %v909_v24 = vpop.permute.xlu0 %908  ;;  %v931_v22 = vpop.permute.xlu2 %930 }
 0x23b   :  { %1243 = vst.msk [vmem:[%s2470_s3 + $0x38] sm:$0xf] %vm1228_vm2, %v1192_v57  ;;  %v1041_v1 = vmax.f32 %v2516_v58, %v909_v24  ;;  %v1052_v37 = vmax.f32 %v2517_v39, %v931_v22  ;;  %v2520_v24 = vld [vmem:[#allocation8_spill] sm:$0xff] }
 0x23c   :  { %1254 = vst.msk [vmem:[%s2470_s3 + $0x64] sm:$0xf] %vm1228_vm2, %v1203_v27  ;;  %v1093_v16 = vadd.f32 %v2100_v59, %v1039_v3 }
 0x23d   :  { %v1095_v7 = vadd.f32 %v2100_v59, %v1041_v1  ;;  %v1106_v5 = vadd.f32 %v2100_v59, %v1052_v37 }
 0x23e   :  { %v1143_v10 = vmax.f32 %v1093_v16, 0.0  ;;  %v2521_v16 = vld [vmem:[#allocation6_spill] sm:$0xff] }
 0x23f   :  { %v1145_v47 = vmax.f32 %v1095_v7, 0.0  ;;  %v1156_v38 = vmax.f32 %v1106_v5, 0.0  ;;  %v664_v7 = vmax.f32 %v1566_v25, %v2521_v16  ;;  %v2524_v25 = vld [vmem:[#allocation20_spill] sm:$0xff] }
 0x240   :  { %v1193_v35 = vpack.c.bf16 %v1143_v10, %v1143_v10 }
 0x241   :  { %v1195_v60 = vpack.c.bf16 %v1145_v47, %v1145_v47  ;;  %v1206_v29 = vpack.c.bf16 %v1156_v38, %v1156_v38  ;;  %v911_v56 = vpop.permute.xlu1 %910  ;;  %v2522_v38 = vld [vmem:[#allocation9_spill] sm:$0xff] }
 0x242   :  { %1244 = vst.msk [vmem:[%s2470_s3 + $0x3c] sm:$0xf] %vm1228_vm2, %v1193_v35  ;;  %v1042_v14 = vmax.f32 %v2518_v40, %v911_v56  ;;  %v915_v41 = vpop.permute.xlu0 %914  ;;  %v937_v36 = vpop.permute.xlu2 %936  ;;  %v2523_v56 = vld [vmem:[#allocation13_spill] sm:$0xff] }
 0x243   :  { %1246 = vst.msk [vmem:[%s2470_s3 + $0x44] sm:$0xf] %vm1228_vm2, %v1195_v60  ;;  %v1044_v49 = vmax.f32 %v2010_v53, %v915_v41  ;;  %v1055_v45 = vmax.f32 %v2519_v61, %v937_v36 }
 0x244   :  { %1257 = vst.msk [vmem:[%s2470_s3 + $0x70] sm:$0xf] %vm1228_vm2, %v1206_v29  ;;  %v1096_v31 = vadd.f32 %v2100_v59, %v1042_v14 }
 0x245   :  { %v1098_v21 = vadd.f32 %v2100_v59, %v1044_v49  ;;  %v1109_v2 = vadd.f32 %v2100_v59, %v1055_v45 }
 0x246   :  { %v1146_v17 = vmax.f32 %v1096_v31, 0.0 }
 0x247   :  { %v1148_v44 = vmax.f32 %v1098_v21, 0.0  ;;  %v1159_v42 = vmax.f32 %v1109_v2, 0.0 }
 0x248   :  { %v1196_v15 = vpack.c.bf16 %v1146_v17, %v1146_v17 }
 0x249   :  { %v1198_v11 = vpack.c.bf16 %v1148_v44, %v1148_v44  ;;  %v1209_v43 = vpack.c.bf16 %v1159_v42, %v1159_v42  ;;  %v917_v53 = vpop.permute.xlu1 %916 }
 0x24a   :  { %1247 = vst.msk [vmem:[%s2470_s3 + $0x48] sm:$0xf] %vm1228_vm2, %v1196_v15  ;;  %v1045_v52 = vmax.f32 %v2033_v54, %v917_v53  ;;  %v921_v9 = vpop.permute.xlu0 %920  ;;  %v943_v46 = vpop.permute.xlu2 %942 }
 0x24b   :  { %1249 = vst.msk [vmem:[%s2470_s3 + $0x50] sm:$0xf] %vm1228_vm2, %v1198_v11  ;;  %v1047_v6 = vmax.f32 %v2084_v19, %v921_v9  ;;  %v1058_v30 = vmax.f32 %v2020_v48, %v943_v46  ;;  %v2526_v46 = vld [vmem:[#allocation30_spill] sm:$0xff] }
 0x24c   :  { %1260 = vst.msk [vmem:[%s2470_s3 + $0x7c] sm:$0xf] %vm1228_vm2, %v1209_v43  ;;  %v1099_v63 = vadd.f32 %v2100_v59, %v1045_v52  ;;  %v2525_v43 = vld [vmem:[#allocation23_spill] sm:$0xff] }
 0x24d   :  { %v1101_v54 = vadd.f32 %v2100_v59, %v1047_v6  ;;  %v1112_v51 = vadd.f32 %v2100_v59, %v1058_v30  ;;  %v2527_v30 = vld [vmem:[#allocation19_spill] sm:$0xff] }
 0x24e   :  { %v1149_v0 = vmax.f32 %v1099_v63, 0.0 }
 0x24f   :  { %v1151_v13 = vmax.f32 %v1101_v54, 0.0  ;;  %v1162_v12 = vmax.f32 %v1112_v51, 0.0 }
 0x250   :  { %v1199_v57 = vpack.c.bf16 %v1149_v0, %v1149_v0 }
 0x251   :  { %v1201_v27 = vpack.c.bf16 %v1151_v13, %v1151_v13  ;;  %v1212_v8 = vpack.c.bf16 %v1162_v12, %v1162_v12  ;;  %v923_v19 = vpop.permute.xlu1 %922 }
 0x252   :  { %1250 = vst.msk [vmem:[%s2470_s3 + $0x54] sm:$0xf] %vm1228_vm2, %v1199_v57  ;;  %v1048_v48 = vmax.f32 %v2089_v33, %v923_v19  ;;  %v927_v23 = vpop.permute.xlu0 %926  ;;  %v949_v3 = vpop.permute.xlu2 %948 }
 0x253   :  { %1252 = vst.msk [vmem:[%s2470_s3 + $0x5c] sm:$0xf] %vm1228_vm2, %v1201_v27  ;;  %v1050_v22 = vmax.f32 %v2520_v24, %v927_v23  ;;  %v1061_v58 = vmax.f32 %v2106_v50, %v949_v3  ;;  %v864_v50 = vmax.f32 %v664_v7, %v2522_v38 }
 0x254   :  { %1263 = vst.msk [vmem:[%s2470_s3 + $0x88] sm:$0xf] %vm1228_vm2, %v1212_v8  ;;  %v1102_v1 = vadd.f32 %v2100_v59, %v1048_v48 }
 0x255   :  { %v1104_v33 = vadd.f32 %v2100_v59, %v1050_v22  ;;  %v1115_v39 = vadd.f32 %v2100_v59, %v1061_v58 }
 0x256   :  { %v1152_v37 = vmax.f32 %v1102_v1, 0.0 }
 0x257   :  { %v1154_v5 = vmax.f32 %v1104_v33, 0.0  ;;  %v1165_v10 = vmax.f32 %v1115_v39, 0.0 }
 0x258   :  { %v1202_v47 = vpack.c.bf16 %v1152_v37, %v1152_v37 }
 0x259   :  { %v1204_v35 = vpack.c.bf16 %v1154_v5, %v1154_v5  ;;  %v1215_v60 = vpack.c.bf16 %v1165_v10, %v1165_v10  ;;  %v929_v29 = vpop.permute.xlu1 %928 }
 0x25a   :  { %1253 = vst.msk [vmem:[%s2470_s3 + $0x60] sm:$0xf] %vm1228_vm2, %v1202_v47  ;;  %v1051_v40 = vmax.f32 %v2523_v56, %v929_v29  ;;  %v933_v14 = vpop.permute.xlu0 %932  ;;  %v955_v41 = vpop.permute.xlu2 %954 }
 0x25b   :  { %1255 = vst.msk [vmem:[%s2470_s3 + $0x68] sm:$0xf] %vm1228_vm2, %v1204_v35  ;;  %v1053_v36 = vmax.f32 %v2524_v25, %v933_v14  ;;  %v1064_v49 = vmax.f32 %v864_v50, %v955_v41 }
 0x25c   :  { %1266 = vst.msk [vmem:[%s2470_s3 + $0x94] sm:$0xf] %vm1228_vm2, %v1215_v60  ;;  %v1105_v61 = vadd.f32 %v2100_v59, %v1051_v40 }
 0x25d   :  { %v1107_v45 = vadd.f32 %v2100_v59, %v1053_v36  ;;  %v1118_v31 = vadd.f32 %v2100_v59, %v1064_v49 }
 0x25e   :  { %v1155_v21 = vmax.f32 %v1105_v61, 0.0  ;;  %v2528_v61 = vld [vmem:[#allocation10_spill] sm:$0xff] }
 0x25f   :  { %v1157_v2 = vmax.f32 %v1107_v45, 0.0  ;;  %v1168_v17 = vmax.f32 %v1118_v31, 0.0 }
 0x260   :  { %v1205_v44 = vpack.c.bf16 %v1155_v21, %v1155_v21 }
 0x261   :  { %v1207_v42 = vpack.c.bf16 %v1157_v2, %v1157_v2  ;;  %v1218_v15 = vpack.c.bf16 %v1168_v17, %v1168_v17  ;;  %v935_v11 = vpop.permute.xlu1 %934 }
 0x262   :  { %1256 = vst.msk [vmem:[%s2470_s3 + $0x6c] sm:$0xf] %vm1228_vm2, %v1205_v44  ;;  %v1054_v53 = vmax.f32 %v2525_v43, %v935_v11  ;;  %v939_v52 = vpop.permute.xlu0 %938  ;;  %v961_v9 = vpop.permute.xlu2 %960 }
 0x263   :  { %1258 = vst.msk [vmem:[%s2470_s3 + $0x74] sm:$0xf] %vm1228_vm2, %v1207_v42  ;;  %v1056_v6 = vmax.f32 %v2526_v46, %v939_v52  ;;  %v1067_v63 = vmax.f32 %v2527_v30, %v961_v9 }
 0x264   :  { %1269 = vst.msk [vmem:[%s2470_s3 + $0xa0] sm:$0xf] %vm1228_vm2, %v1218_v15  ;;  %v1108_v54 = vadd.f32 %v2100_v59, %v1054_v53  ;;  %v2529_v15 = vld [vmem:[#allocation15_spill] sm:$0xff]  ;;  %v2530_v53 = vld [vmem:[#allocation22_spill] sm:$0xff] }
 0x265   :  { %v1110_v51 = vadd.f32 %v2100_v59, %v1056_v6  ;;  %v1121_v0 = vadd.f32 %v2100_v59, %v1067_v63 }
 0x266   :  { %v1158_v13 = vmax.f32 %v1108_v54, 0.0 }
 0x267   :  { %v1160_v12 = vmax.f32 %v1110_v51, 0.0  ;;  %v1171_v57 = vmax.f32 %v1121_v0, 0.0  ;;  %v2531_v0 = vld [vmem:[#allocation25_spill] sm:$0xff] }
 0x268   :  { %v1208_v27 = vpack.c.bf16 %v1158_v13, %v1158_v13 }
 0x269   :  { %v1210_v8 = vpack.c.bf16 %v1160_v12, %v1160_v12  ;;  %v1221_v19 = vpack.c.bf16 %v1171_v57, %v1171_v57  ;;  %v941_v48 = vpop.permute.xlu1 %940 }
 0x26a   :  { %1259 = vst.msk [vmem:[%s2470_s3 + $0x78] sm:$0xf] %vm1228_vm2, %v1208_v27  ;;  %v1057_v23 = vmax.f32 %v1990_v28, %v941_v48  ;;  %v945_v3 = vpop.permute.xlu0 %944  ;;  %v967_v24 = vpop.permute.xlu2 %966 }
 0x26b   :  { %1261 = vst.msk [vmem:[%s2470_s3 + $0x80] sm:$0xf] %vm1228_vm2, %v1210_v8  ;;  %v1059_v22 = vmax.f32 %v2042_v34, %v945_v3  ;;  %v1070_v58 = vmax.f32 %v2141_v4, %v967_v24 }
 0x26c   :  { %1272 = vst.msk [vmem:[%s2470_s3 + $0xac] sm:$0xf] %vm1228_vm2, %v1221_v19  ;;  %v1111_v1 = vadd.f32 %v2100_v59, %v1057_v23 }
 0x26d   :  { %v1113_v28 = vadd.f32 %v2100_v59, %v1059_v22  ;;  %v1124_v33 = vadd.f32 %v2100_v59, %v1070_v58 }
 0x26e   :  { %v1161_v39 = vmax.f32 %v1111_v1, 0.0 }
 0x26f   :  { %v1163_v37 = vmax.f32 %v1113_v28, 0.0  ;;  %v1174_v16 = vmax.f32 %v1124_v33, 0.0 }
 0x270   :  { %v1211_v7 = vpack.c.bf16 %v1161_v39, %v1161_v39 }
 0x271   :  { %v1213_v5 = vpack.c.bf16 %v1163_v37, %v1163_v37  ;;  %v1224_v10 = vpack.c.bf16 %v1174_v16, %v1174_v16  ;;  %v947_v34 = vpop.permute.xlu1 %946 }
 0x272   :  { %1262 = vst.msk [vmem:[%s2470_s3 + $0x84] sm:$0xf] %vm1228_vm2, %v1211_v7  ;;  %v1060_v4 = vmax.f32 %v2064_v62, %v947_v34  ;;  %v951_v47 = vpop.permute.xlu0 %950  ;;  %v973_v38 = vpop.permute.xlu2 %972 }
 0x273   :  { %1264 = vst.msk [vmem:[%s2470_s3 + $0x8c] sm:$0xf] %vm1228_vm2, %v1213_v5  ;;  %v1062_v50 = vmax.f32 %v2116_v20, %v951_v47  ;;  %v1073_v35 = vmax.f32 %v2164_v32, %v973_v38 }
 0x274   :  { %1275 = vst.msk [vmem:[%s2470_s3 + $0xb8] sm:$0xf] %vm1228_vm2, %v1224_v10  ;;  %v1114_v60 = vadd.f32 %v2100_v59, %v1060_v4 }
 0x275   :  { %v1116_v62 = vadd.f32 %v2100_v59, %v1062_v50  ;;  %v1127_v29 = vadd.f32 %v2100_v59, %v1073_v35 }
 0x276   :  { %v1164_v56 = vmax.f32 %v1114_v60, 0.0 }
 0x277   :  { %v1166_v40 = vmax.f32 %v1116_v62, 0.0  ;;  %v1177_v14 = vmax.f32 %v1127_v29, 0.0 }
 0x278   :  { %v1214_v41 = vpack.c.bf16 %v1164_v56, %v1164_v56 }
 0x279   :  { %v1216_v25 = vpack.c.bf16 %v1166_v40, %v1166_v40  ;;  %v1227_v36 = vpack.c.bf16 %v1177_v14, %v1177_v14  ;;  %v953_v20 = vpop.permute.xlu1 %952 }
 0x27a   :  { %1265 = vst.msk [vmem:[%s2470_s3 + $0x90] sm:$0xf] %vm1228_vm2, %v1214_v41  ;;  %v1063_v32 = vmax.f32 %v2125_v18, %v953_v20  ;;  %v957_v49 = vpop.permute.xlu0 %956 }
 0x27b   :  { %1267 = vst.msk [vmem:[%s2470_s3 + $0x98] sm:$0xf] %vm1228_vm2, %v1216_v25  ;;  %v1065_v45 = vmax.f32 %v2528_v61, %v957_v49 }
 0x27c   :  { %1278 = vst.msk [vmem:[%s2470_s3 + $0xc4] sm:$0xf] %vm1228_vm2, %v1227_v36  ;;  %v1117_v31 = vadd.f32 %v2100_v59, %v1063_v32 }
 0x27d   :  { %v1119_v21 = vadd.f32 %v2100_v59, %v1065_v45 }
 0x27e   :  { %v1167_v2 = vmax.f32 %v1117_v31, 0.0 }
 0x27f   :  { %v1169_v17 = vmax.f32 %v1119_v21, 0.0 }
 0x280   :  { %v1217_v18 = vpack.c.bf16 %v1167_v2, %v1167_v2 }
 0x281   :  { %v1219_v44 = vpack.c.bf16 %v1169_v17, %v1169_v17  ;;  %v959_v42 = vpop.permute.xlu1 %958 }
 0x282   :  { %1268 = vst.msk [vmem:[%s2470_s3 + $0x9c] sm:$0xf] %vm1228_vm2, %v1217_v18  ;;  %v1066_v11 = vmax.f32 %v2529_v15, %v959_v42  ;;  %v963_v43 = vpop.permute.xlu0 %962 }
 0x283   :  { %1270 = vst.msk [vmem:[%s2470_s3 + $0xa4] sm:$0xf] %vm1228_vm2, %v1219_v44  ;;  %v1068_v52 = vmax.f32 %v2530_v53, %v963_v43 }
 0x284   :  { %v1120_v9 = vadd.f32 %v2100_v59, %v1066_v11 }
 0x285   :  { %v1122_v46 = vadd.f32 %v2100_v59, %v1068_v52 }
 0x286   :  { %v1170_v6 = vmax.f32 %v1120_v9, 0.0 }
 0x287   :  { %v1172_v30 = vmax.f32 %v1122_v46, 0.0 }
 0x288   :  { %v1220_v63 = vpack.c.bf16 %v1170_v6, %v1170_v6 }
 0x289   :  { %v1222_v54 = vpack.c.bf16 %v1172_v30, %v1172_v30  ;;  %v965_v51 = vpop.permute.xlu1 %964 }
 0x28a   :  { %1271 = vst.msk [vmem:[%s2470_s3 + $0xa8] sm:$0xf] %vm1228_vm2, %v1220_v63  ;;  %v1069_v13 = vmax.f32 %v2531_v0, %v965_v51  ;;  %v969_v12 = vpop.permute.xlu0 %968 }
 0x28b   :  { %1273 = vst.msk [vmem:[%s2470_s3 + $0xb0] sm:$0xf] %vm1228_vm2, %v1222_v54  ;;  %v1071_v57 = vmax.f32 %v2158_v26, %v969_v12 }
 0x28c   :  { %v1123_v27 = vadd.f32 %v2100_v59, %v1069_v13 }
 0x28d   :  { %v1125_v8 = vadd.f32 %v2100_v59, %v1071_v57 }
 0x28e   :  { %v1173_v19 = vmax.f32 %v1123_v27, 0.0 }
 0x28f   :  { %v1175_v48 = vmax.f32 %v1125_v8, 0.0 }
 0x290   :  { %v1223_v23 = vpack.c.bf16 %v1173_v19, %v1173_v19 }
 0x291   :  { %v1225_v3 = vpack.c.bf16 %v1175_v48, %v1175_v48  ;;  %v971_v24 = vpop.permute.xlu1 %970 }
 0x292   :  { %1274 = vst.msk [vmem:[%s2470_s3 + $0xb4] sm:$0xf] %vm1228_vm2, %v1223_v23  ;;  %v1072_v22 = vmax.f32 %v2087_v55, %v971_v24 }
 0x293   :  { %1276 = vst.msk [vmem:[%s2470_s3 + $0xbc] sm:$0xf] %vm1228_vm2, %v1225_v3 }
 0x294   :  { %v1126_v26 = vadd.f32 %v2100_v59, %v1072_v22 }
 0x296   :  { %v1176_v58 = vmax.f32 %v1126_v26, 0.0 }
 0x298   :  { %v1226_v1 = vpack.c.bf16 %v1176_v58, %v1176_v58 }
 0x29a   :  { %1277 = vst.msk [vmem:[%s2470_s3 + $0xc0] sm:$0xf] %vm1228_vm2, %v1226_v1 }

// kernel: cnn_forward.4
= control target key start
LH: loop header
LB: loop body
LE: loop exit
PB: predicated region body
PF: predicated region fallthrough
CT: control target
= control target key end

     0   :  { %vm691_vm0 = vcmask 261120   ;;  %vm1223_vm1 = vcmask 523264   ;;  %vm1368_vm2 = vcmask 519168   ;;  %s2953_s1 = inlined_call_operand.vmem [shape: bf16[288,64], index: 1, kind: input, shape index: {}]   ;;  %s2954_s0 = inlined_call_operand.vmem [shape: bf16[4,112,288], index: 0, kind: input, shape index: {}]   ;;  %s2955_s2 = inlined_call_operand.vmem [shape: f32[1,64], index: 2, kind: input, shape index: {}]   ;;  %s2956_s3 = inlined_call_operand.vmem [shape: bf16[112,64], index: 3, kind: output, shape index: {}]  }
   0x1   :  { %v1914_v0 = vld [vmem:[%s2953_s1 + $0x38] sm:$0xff]  ;;  %v1973_v2 = vld [vmem:[%s2953_s1 + $0x88] sm:$0xff]  ;;  %v1913_v3 = vld [vmem:[%s2953_s1 + $0x30] sm:$0xff] }
   0x2   :  { %v1922_v1 = vld [vmem:[%s2953_s1 + $0x78] sm:$0xff]  ;;  %776 = vmatpush.bf16.msra.mxu0 %v1914_v0  ;;  %1925 = vmatpush.bf16.msra.mxu3 %v1914_v0  ;;  %v1921_v4 = vld [vmem:[%s2953_s1 + $0x70] sm:$0xff]  ;;  %v1985_v5 = vld [vmem:[%s2953_s1 + $0x80] sm:$0xff] }
   0x3   :  { %925 = vmatpush.bf16.msra.mxu1 %v1922_v1  ;;  %1080 = vmatpush.bf16.msra.mxu2 %v1973_v2  ;;  %v1397_v6 = vld [vmem:[%s2954_s0 + $0x8] sm:$0xf]  ;;  %v1825_v7 = vld [vmem:[%s2954_s0 + $0x10] sm:$0xf0]  ;;  %v1911_v11 = vld [vmem:[%s2953_s1 + $0x20] sm:$0xff] }
   0x4   :  { %v1398_v8 = vor.u32 %v1825_v7, %v1397_v6  ;;  %v1912_v9 = vld [vmem:[%s2953_s1 + $0x28] sm:$0xff]  ;;  %v1919_v12 = vld [vmem:[%s2953_s1 + $0x60] sm:$0xff]  ;;  %v1910_v13 = vld [vmem:[%s2953_s1 + $0x18] sm:$0xff] }
   0x5   :  { %v1920_v10 = vld [vmem:[%s2953_s1 + $0x68] sm:$0xff]  ;;  %v1918_v14 = vld [vmem:[%s2953_s1 + $0x58] sm:$0xff]  ;;  %v1909_v15 = vld [vmem:[%s2953_s1 + $0x10] sm:$0xff] }
   0x6   :  { %777 = vmatpush.bf16.msra.mxu0 %v1913_v3  ;;  %1926 = vmatpush.bf16.msra.mxu3 %v1913_v3  ;;  %v1917_v16 = vld [vmem:[%s2953_s1 + $0x50] sm:$0xff]  ;;  %v1409_v17 = vld [vmem:[%s2954_s0 + $0x20] sm:$0xf]  ;;  %v1828_v18 = vld [vmem:[%s2954_s0 + $0x28] sm:$0xf0] }
   0x7   :  { %926 = vmatpush.bf16.msra.mxu1 %v1921_v4  ;;  %1081 = vmatpush.bf16.msra.mxu2 %v1985_v5  ;;  %v1410_v19 = vor.u32 %v1828_v18, %v1409_v17  ;;  %v1908_v20 = vld [vmem:[%s2953_s1 + $0x8] sm:$0xff]  ;;  %v1907_v22 = vld [vmem:[%s2953_s1] sm:$0xff]  ;;  %v1641_v26 = vld [vmem:[%s2954_s0 + $0x1f8] sm:$0xf] }
   0x8   :  { %v1916_v21 = vld [vmem:[%s2953_s1 + $0x48] sm:$0xff]  ;;  %v1915_v23 = vld [vmem:[%s2953_s1 + $0x40] sm:$0xff]  ;;  %v1391_v29 = vld [vmem:[%s2954_s0 + $0xc] sm:$0xf0] }
   0x9   :  { %v1389_v24 = vld [vmem:[%s2954_s0] sm:$0xf]  ;;  %v1824_v25 = vld [vmem:[%s2954_s0 + $0x8] sm:$0xf0]  ;;  %v1887_v27 = vld [vmem:[%s2954_s0 + $0x200] sm:$0xf0] }
   0xa   :  { %1795 = vmatmul.msk.bf16.vlgmr.msra.gmra.mxu2 %vm691_vm0, %v1398_v8  ;;  %778 = vmatpush.bf16.msra.mxu0 %v1912_v9  ;;  %v1823_v28 = vld [vmem:[%s2954_s0 + $0x4] sm:$0xf]  ;;  %v1390_v30 = vor.u32 %v1824_v25, %v1389_v24  ;;  %v1642_v31 = vor.u32 %v1887_v27, %v1641_v26  ;;  %v1421_v33 = vld [vmem:[%s2954_s0 + $0x38] sm:$0xf]  ;;  %v1653_v38 = vld [vmem:[%s2954_s0 + $0x210] sm:$0xf] }
   0xb   :  { %1927 = vmatpush.bf16.msra.mxu3 %v1912_v9  ;;  %927 = vmatpush.bf16.msra.mxu1 %v1920_v10  ;;  %v1394_v32 = vor.u32 %v1823_v28, %v1391_v29  ;;  %v1831_v34 = vld [vmem:[%s2954_s0 + $0x40] sm:$0xf0]  ;;  %v1401_v36 = vld [vmem:[%s2954_s0 + $0x18] sm:$0xf]  ;;  %v1890_v39 = vld [vmem:[%s2954_s0 + $0x218] sm:$0xf0] }
   0xc   :  { %v1422_v35 = vor.u32 %v1831_v34, %v1421_v33  ;;  %v1827_v37 = vld [vmem:[%s2954_s0 + $0x20] sm:$0xf0]  ;;  %v1826_v40 = vld [vmem:[%s2954_s0 + $0x1c] sm:$0xf]  ;;  %v1403_v41 = vld [vmem:[%s2954_s0 + $0x24] sm:$0xf0]  ;;  %v1654_v43 = vor.u32 %v1890_v39, %v1653_v38 }
   0xd   :  { %v1402_v42 = vor.u32 %v1827_v37, %v1401_v36  ;;  %v1406_v44 = vor.u32 %v1826_v40, %v1403_v41  ;;  %v1433_v45 = vld [vmem:[%s2954_s0 + $0x50] sm:$0xf]  ;;  %v1834_v46 = vld [vmem:[%s2954_s0 + $0x58] sm:$0xf0]  ;;  %v1665_v50 = vld [vmem:[%s2954_s0 + $0x228] sm:$0xf] }
   0xe   :  { %779 = vmatpush.bf16.msra.mxu0 %v1911_v11  ;;  %v1434_v47 = vor.u32 %v1834_v46, %v1433_v45  ;;  %v1413_v48 = vld [vmem:[%s2954_s0 + $0x30] sm:$0xf]  ;;  %v1830_v49 = vld [vmem:[%s2954_s0 + $0x38] sm:$0xf0]  ;;  %v1893_v51 = vld [vmem:[%s2954_s0 + $0x230] sm:$0xf0] }
   0xf   :  { %1928 = vmatpush.bf16.msra.mxu3 %v1911_v11  ;;  %928 = vmatpush.bf16.msra.mxu1 %v1919_v12  ;;  %v1829_v52 = vld [vmem:[%s2954_s0 + $0x34] sm:$0xf]  ;;  %v1415_v53 = vld [vmem:[%s2954_s0 + $0x3c] sm:$0xf0]  ;;  %v1414_v54 = vor.u32 %v1830_v49, %v1413_v48  ;;  %v1666_v55 = vor.u32 %v1893_v51, %v1665_v50  ;;  %v1445_v57 = vld [vmem:[%s2954_s0 + $0x68] sm:$0xf] }
  0x10   :  { %v1418_v56 = vor.u32 %v1829_v52, %v1415_v53  ;;  %v1837_v58 = vld [vmem:[%s2954_s0 + $0x70] sm:$0xf0]  ;;  %v1425_v60 = vld [vmem:[%s2954_s0 + $0x48] sm:$0xf]  ;;  %v1677_v62 = vld [vmem:[%s2954_s0 + $0x240] sm:$0xf] }
  0x11   :  { %v1446_v59 = vor.u32 %v1837_v58, %v1445_v57  ;;  %v1833_v61 = vld [vmem:[%s2954_s0 + $0x50] sm:$0xf0]  ;;  %v1896_v63 = vld [vmem:[%s2954_s0 + $0x248] sm:$0xf0]  ;;  %v1437_v8 = vld [vmem:[%s2954_s0 + $0x60] sm:$0xf] }
  0x12   :  { %780 = vmatpush.bf16.msra.mxu0 %v1910_v13  ;;  %v1832_v0 = vld [vmem:[%s2954_s0 + $0x4c] sm:$0xf]  ;;  %v1678_v3 = vor.u32 %v1896_v63, %v1677_v62  ;;  %v1899_v11 = vld [vmem:[%s2954_s0 + $0x260] sm:$0xf0]  ;;  %v1469_v17 = vld [vmem:[%s2954_s0 + $0x98] sm:$0xf] }
  0x13   :  { %1929 = vmatpush.bf16.msra.mxu3 %v1910_v13  ;;  %929 = vmatpush.bf16.msra.mxu1 %v1918_v14  ;;  %v1840_v6 = vld [vmem:[%s2954_s0 + $0x88] sm:$0xf0]  ;;  %v1439_v13 = vld [vmem:[%s2954_s0 + $0x6c] sm:$0xf0]  ;;  %v1843_v18 = vld [vmem:[%s2954_s0 + $0xa0] sm:$0xf0] }
  0x14   :  { %v1836_v9 = vld [vmem:[%s2954_s0 + $0x68] sm:$0xf0]  ;;  %v1838_v24 = vld [vmem:[%s2954_s0 + $0x7c] sm:$0xf]  ;;  %v1451_v25 = vld [vmem:[%s2954_s0 + $0x84] sm:$0xf0] }
  0x15   :  { %v1454_v28 = vor.u32 %v1838_v24, %v1451_v25  ;;  %v1481_v29 = vld [vmem:[%s2954_s0 + $0xb0] sm:$0xf]  ;;  %v1842_v33 = vld [vmem:[%s2954_s0 + $0x98] sm:$0xf0]  ;;  %v1713_v34 = vld [vmem:[%s2954_s0 + $0x288] sm:$0xf] }
  0x16   :  { %781 = vmatpush.bf16.msra.mxu0 %v1909_v15  ;;  %v1841_v36 = vld [vmem:[%s2954_s0 + $0x94] sm:$0xf]  ;;  %v1463_v37 = vld [vmem:[%s2954_s0 + $0x9c] sm:$0xf0]  ;;  %v1493_v41 = vld [vmem:[%s2954_s0 + $0xc8] sm:$0xf] }
  0x17   :  { %1930 = vmatpush.bf16.msra.mxu3 %v1909_v15  ;;  %930 = vmatpush.bf16.msra.mxu1 %v1917_v16  ;;  %v1466_v40 = vor.u32 %v1841_v36, %v1463_v37  ;;  %v1845_v45 = vld [vmem:[%s2954_s0 + $0xb0] sm:$0xf0]  ;;  %v1844_v46 = vld [vmem:[%s2954_s0 + $0xac] sm:$0xf]  ;;  %v1886_v48 = vld [vmem:[%s2954_s0 + $0x1fc] sm:$0xf] }
  0x18   :  { %v1643_v49 = vld [vmem:[%s2954_s0 + $0x204] sm:$0xf0]  ;;  %v1485_v58 = vld [vmem:[%s2954_s0 + $0xc0] sm:$0xf]  ;;  %v1889_v62 = vld [vmem:[%s2954_s0 + $0x214] sm:$0xf] }
  0x19   :  { %v1646_v53 = vor.u32 %v1886_v48, %v1643_v49  ;;  %v1655_v63 = vld [vmem:[%s2954_s0 + $0x21c] sm:$0xf0] }
  0x1a   :  { %1796 = vmatmul.msk.bf16.gmra.mxu2 %vm691_vm0, %v1410_v19  ;;  %782 = vmatpush.bf16.msra.mxu0 %v1908_v20  ;;  %v1470_v19 = vor.u32 %v1843_v18, %v1469_v17  ;;  %v1497_v17 = vld [vmem:[%s2954_s0 + $0xd8] sm:$0xf]  ;;  %v1851_v18 = vld [vmem:[%s2954_s0 + $0xe0] sm:$0xf0] }
  0x1b   :  { %1931 = vmatpush.bf16.msra.mxu3 %v1908_v20  ;;  %931 = vmatpush.bf16.msra.mxu1 %v1916_v21  ;;  %v1449_v20 = vld [vmem:[%s2954_s0 + $0x78] sm:$0xf]  ;;  %v1498_v25 = vor.u32 %v1851_v18, %v1497_v17 }
  0x1e   :  { %783 = vmatpush.bf16.msra.mxu0 %v1907_v22 }
  0x1f   :  { %1932 = vmatpush.bf16.msra.mxu3 %v1907_v22  ;;  %932 = vmatpush.bf16.msra.mxu1 %v1915_v23  ;;  %v1701_v22 = vld [vmem:[%s2954_s0 + $0x270] sm:$0xf] }
  0x21   :  { %784 = vmatmul.bf16.vlgmr.msra.gmra.mxu0 %v1390_v30  ;;  %v1846_v30 = vld [vmem:[%s2954_s0 + $0xb8] sm:$0xf0] }
  0x22   :  { %889 = vmatmul.bf16.vlgmr.msra.gmra.mxu3 %v1642_v31  ;;  %933 = vmatmul.bf16.vlgmr.msra.gmra.mxu1 %v1394_v32  ;;  %v1482_v31 = vor.u32 %v1846_v30, %v1481_v29  ;;  %v1461_v32 = vld [vmem:[%s2954_s0 + $0x90] sm:$0xf] }
  0x23   :  { %1933 = vmatpush.bf16.msrb.mxu3 %v1922_v1  ;;  %v1427_v1 = vld [vmem:[%s2954_s0 + $0x54] sm:$0xf0]  ;;  %v1462_v38 = vor.u32 %v1842_v33, %v1461_v32  ;;  %v1529_v32 = vld [vmem:[%s2954_s0 + $0x110] sm:$0xf]  ;;  %v1858_v33 = vld [vmem:[%s2954_s0 + $0x118] sm:$0xf0] }
  0x24   :  { %v1530_v37 = vor.u32 %v1858_v33, %v1529_v32  ;;  %v1859_v32 = vld [vmem:[%s2954_s0 + $0x124] sm:$0xf]  ;;  %v1535_v33 = vld [vmem:[%s2954_s0 + $0x12c] sm:$0xf0] }
  0x27   :  { %1934 = vmatpush.bf16.msrb.mxu3 %v1921_v4  ;;  %v1430_v4 = vor.u32 %v1832_v0, %v1427_v1 }
  0x2a   :  { %1797 = vmatmul.msk.bf16.gmra.mxu2 %vm691_vm0, %v1422_v35  ;;  %v1905_v35 = vld [vmem:[%s2954_s0 + $0x290] sm:$0xf0] }
  0x2b   :  { %1935 = vmatpush.bf16.msrb.mxu3 %v1920_v10  ;;  %v1689_v10 = vld [vmem:[%s2954_s0 + $0x258] sm:$0xf]  ;;  %v1714_v39 = vor.u32 %v1905_v35, %v1713_v34 }
  0x2c   :  { %v1690_v15 = vor.u32 %v1899_v11, %v1689_v10 }
  0x2f   :  { %1936 = vmatpush.bf16.msrb.mxu3 %v1919_v12  ;;  %v1835_v12 = vld [vmem:[%s2954_s0 + $0x64] sm:$0xf] }
  0x31   :  { %789 = vmatmul.bf16.gmra.mxu0 %v1402_v42  ;;  %v1849_v42 = vld [vmem:[%s2954_s0 + $0xd0] sm:$0xf0] }
  0x32   :  { %894 = vmatmul.bf16.gmra.mxu3 %v1654_v43  ;;  %938 = vmatmul.bf16.gmra.mxu1 %v1406_v44  ;;  %v1494_v43 = vor.u32 %v1849_v42, %v1493_v41  ;;  %v1473_v44 = vld [vmem:[%s2954_s0 + $0xa8] sm:$0xf]  ;;  %v1509_v41 = vld [vmem:[%s2954_s0 + $0xf0] sm:$0xf]  ;;  %v1854_v42 = vld [vmem:[%s2954_s0 + $0xf8] sm:$0xf0] }
  0x33   :  { %1937 = vmatpush.bf16.msrb.mxu3 %v1918_v14  ;;  %v1438_v14 = vor.u32 %v1836_v9, %v1437_v8  ;;  %v1474_v51 = vor.u32 %v1845_v45, %v1473_v44  ;;  %v1517_v8 = vld [vmem:[%s2954_s0 + $0xf8] sm:$0xf]  ;;  %v1855_v9 = vld [vmem:[%s2954_s0 + $0x100] sm:$0xf0]  ;;  %v1511_v44 = vld [vmem:[%s2954_s0 + $0xfc] sm:$0xf0]  ;;  %v1510_v49 = vor.u32 %v1854_v42, %v1509_v41  ;;  %v1538_v42 = vor.u32 %v1859_v32, %v1535_v33 }
  0x34   :  { %v1895_v45 = vld [vmem:[%s2954_s0 + $0x244] sm:$0xf]  ;;  %v1559_v32 = vld [vmem:[%s2954_s0 + $0x15c] sm:$0xf0]  ;;  %v1673_v33 = vld [vmem:[%s2954_s0 + $0x230] sm:$0xf] }
  0x37   :  { %1938 = vmatpush.bf16.msrb.mxu3 %v1917_v16  ;;  %v1442_v16 = vor.u32 %v1835_v12, %v1439_v13  ;;  %v1518_v13 = vor.u32 %v1855_v9, %v1517_v8 }
  0x3a   :  { %1798 = vmatmul.msk.bf16.gmra.mxu2 %vm691_vm0, %v1434_v47  ;;  %v1475_v47 = vld [vmem:[%s2954_s0 + $0xb4] sm:$0xf0] }
  0x3b   :  { %1939 = vmatpush.bf16.msrb.mxu3 %v1916_v21  ;;  %v1839_v21 = vld [vmem:[%s2954_s0 + $0x80] sm:$0xf0]  ;;  %v1478_v52 = vor.u32 %v1844_v46, %v1475_v47  ;;  %v1679_v46 = vld [vmem:[%s2954_s0 + $0x24c] sm:$0xf0] }
  0x3c   :  { %v1450_v26 = vor.u32 %v1839_v21, %v1449_v20  ;;  %v1499_v20 = vld [vmem:[%s2954_s0 + $0xe4] sm:$0xf0]  ;;  %v1892_v21 = vld [vmem:[%s2954_s0 + $0x22c] sm:$0xf] }
  0x3f   :  { %1940 = vmatpush.bf16.msrb.mxu3 %v1915_v23  ;;  %v1902_v23 = vld [vmem:[%s2954_s0 + $0x278] sm:$0xf0] }
  0x40   :  { %v1702_v27 = vor.u32 %v1902_v23, %v1701_v22  ;;  %v1667_v22 = vld [vmem:[%s2954_s0 + $0x234] sm:$0xf0] }
  0x41   :  { %794 = vmatmul.bf16.gmra.mxu0 %v1414_v54  ;;  %v1505_v54 = vld [vmem:[%s2954_s0 + $0xe0] sm:$0xf] }
  0x42   :  { %899 = vmatmul.bf16.gmra.mxu3 %v1666_v55  ;;  %943 = vmatmul.bf16.gmra.mxu1 %v1418_v56  ;;  %v1852_v55 = vld [vmem:[%s2954_s0 + $0xe8] sm:$0xf0] }
  0x43   :  { %1941 = vmatpush.bf16.msra.mxu3 %v1973_v2  ;;  %v1426_v2 = vor.u32 %v1833_v61, %v1425_v60  ;;  %v1506_v57 = vor.u32 %v1852_v55, %v1505_v54  ;;  %v1847_v60 = vld [vmem:[%s2954_s0 + $0xc4] sm:$0xf]  ;;  %v1487_v61 = vld [vmem:[%s2954_s0 + $0xcc] sm:$0xf0] }
  0x47   :  { %1942 = vmatpush.bf16.msra.mxu3 %v1985_v5  ;;  %v1457_v5 = vld [vmem:[%s2954_s0 + $0x80] sm:$0xf] }
  0x48   :  { %v1458_v7 = vor.u32 %v1840_v6, %v1457_v5 }
  0x4a   :  { %1799 = vmatmul.msk.bf16.gmra.mxu2 %vm691_vm0, %v1446_v59  ;;  %v1848_v59 = vld [vmem:[%s2954_s0 + $0xc8] sm:$0xf0] }
  0x4b   :  { %v1486_v1 = vor.u32 %v1848_v59, %v1485_v58 }
  0x51   :  { %799 = vmatmul.bf16.gmra.mxu0 %v1426_v2 }
  0x52   :  { %904 = vmatmul.bf16.gmra.mxu3 %v1678_v3  ;;  %948 = vmatmul.bf16.gmra.mxu1 %v1430_v4  ;;  %v1490_v3 = vor.u32 %v1847_v60, %v1487_v61  ;;  %v1658_v4 = vor.u32 %v1889_v62, %v1655_v63 }
  0x5a   :  { %1800 = vmatmul.msk.bf16.gmra.mxu2 %vm691_vm0, %v1458_v7 }
  0x61   :  { %804 = vmatmul.bf16.gmra.mxu0 %v1438_v14 }
  0x62   :  { %909 = vmatmul.bf16.gmra.mxu3 %v1690_v15  ;;  %953 = vmatmul.bf16.gmra.mxu1 %v1442_v16 }
  0x6a   :  { %1801 = vmatmul.msk.bf16.gmra.mxu2 %vm691_vm0, %v1470_v19  ;;  %v1850_v19 = vld [vmem:[%s2954_s0 + $0xdc] sm:$0xf] }
  0x71   :  { %809 = vmatmul.bf16.gmra.mxu0 %v1450_v26 }
  0x72   :  { %914 = vmatmul.bf16.gmra.mxu3 %v1702_v27  ;;  %958 = vmatmul.bf16.gmra.mxu1 %v1454_v28  ;;  %v1502_v27 = vor.u32 %v1850_v19, %v1499_v20  ;;  %v1670_v28 = vor.u32 %v1892_v21, %v1667_v22  ;;  %v1553_v19 = vld [vmem:[%s2954_s0 + $0x140] sm:$0xf]  ;;  %v1864_v20 = vld [vmem:[%s2954_s0 + $0x148] sm:$0xf0] }
  0x7a   :  { %1802 = vmatmul.msk.bf16.gmra.mxu2 %vm691_vm0, %v1482_v31 }
  0x81   :  { %814 = vmatmul.bf16.gmra.mxu0 %v1462_v38 }
  0x82   :  { %919 = vmatmul.bf16.gmra.mxu3 %v1714_v39  ;;  %963 = vmatmul.bf16.gmra.mxu1 %v1466_v40 }
  0x8a   :  { %1803 = vmatmul.msk.bf16.gmra.mxu2 %vm691_vm0, %v1494_v43  ;;  %v1853_v43 = vld [vmem:[%s2954_s0 + $0xf4] sm:$0xf] }
  0x8d   :  { %v1083_v50 = vpop.f32.mrf.mxu2 }
  0x91   :  { %819 = vmatmul.bf16.gmra.mxu0 %v1474_v51  ;;  %v1514_v51 = vor.u32 %v1853_v43, %v1511_v44 }
  0x92   :  { %968 = vmatmul.bf16.gmra.mxu1 %v1478_v52  ;;  %1038 = vmatmul.bf16.vlgmr.msrb.gmra.mxu3 %v1646_v53  ;;  %v1682_v52 = vor.u32 %v1895_v45, %v1679_v46 }
  0x95   :  { %v1085_v56 = vpop.f32.mrf.mxu2 }
  0x9a   :  { %1804 = vmatmul.msk.bf16.gmra.mxu2 %vm691_vm0, %v1506_v57  ;;  %v1861_v57 = vld [vmem:[%s2954_s0 + $0x130] sm:$0xf0] }
  0x9d   :  { %v1088_v0 = vpop.f32.mrf.mxu2 }
  0x9e   :  { %v785_v2 = vpop.f32.mrf.mxu0 }
  0x9f   :  { %v934_v5 = vpop.f32.mrf.mxu1 }
  0xa0   :  { %v935_v6 = vadd.f32 %v934_v5, %v785_v2  ;;  %v1857_v2 = vld [vmem:[%s2954_s0 + $0x110] sm:$0xf0]  ;;  %v1898_v5 = vld [vmem:[%s2954_s0 + $0x25c] sm:$0xf] }
  0xa1   :  { %824 = vmatmul.bf16.gmra.mxu0 %v1486_v1  ;;  %v1521_v1 = vld [vmem:[%s2954_s0 + $0x108] sm:$0xf] }
  0xa2   :  { %v2258_v7 = vadd.f32 %v1083_v50, %v935_v6  ;;  %973 = vmatmul.bf16.gmra.mxu1 %v1490_v3  ;;  %1043 = vmatmul.bf16.gmra.mxu3 %v1658_v4  ;;  %v1856_v3 = vld [vmem:[%s2954_s0 + $0x10c] sm:$0xf]  ;;  %v1523_v4 = vld [vmem:[%s2954_s0 + $0x114] sm:$0xf0]  ;;  %v1691_v6 = vld [vmem:[%s2954_s0 + $0x264] sm:$0xf0] }
  0xa5   :  { %v2266_v10 = vpop.f32.mrf.mxu3  ;;  %v1090_v11 = vpop.f32.mrf.mxu2 }
  0xa6   :  { %v787_v12 = vpop.f32.mrf.mxu0 }
  0xa7   :  { %v936_v14 = vpop.f32.mrf.mxu1 }
  0xa8   :  { %v937_v15 = vadd.f32 %v936_v14, %v787_v12  ;;  %v1694_v14 = vor.u32 %v1898_v5, %v1691_v6 }
  0xaa   :  { %v2268_v16 = vadd.f32 %v1085_v56, %v937_v15  ;;  %1805 = vmatmul.msk.bf16.gmra.mxu2 %vm691_vm0, %v1518_v13  ;;  %v1541_v56 = vld [vmem:[%s2954_s0 + $0x128] sm:$0xf]  ;;  %v1526_v13 = vor.u32 %v1856_v3, %v1523_v4 }
  0xab   :  { %v1542_v61 = vor.u32 %v1861_v57, %v1541_v56 }
  0xad   :  { %v2289_v23 = vpop.f32.mrf.mxu3  ;;  %v1093_v24 = vpop.f32.mrf.mxu2 }
  0xae   :  { %v790_v26 = vpop.f32.mrf.mxu0 }
  0xaf   :  { %v939_v29 = vpop.f32.mrf.mxu1 }
  0xb0   :  { %v940_v30 = vadd.f32 %v939_v29, %v790_v26  ;;  %v1533_v29 = vld [vmem:[%s2954_s0 + $0x120] sm:$0xf] }
  0xb1   :  { %829 = vmatmul.bf16.gmra.mxu0 %v1498_v25  ;;  %v1554_v25 = vor.u32 %v1864_v20, %v1553_v19 }
  0xb2   :  { %v2291_v31 = vadd.f32 %v1088_v0, %v940_v30  ;;  %978 = vmatmul.bf16.gmra.mxu1 %v1502_v27  ;;  %1048 = vmatmul.bf16.gmra.mxu3 %v1670_v28  ;;  %v1860_v30 = vld [vmem:[%s2954_s0 + $0x128] sm:$0xf0] }
  0xb5   :  { %v2299_v34 = vpop.f32.mrf.mxu3  ;;  %v1095_v35 = vpop.f32.mrf.mxu2 }
  0xb6   :  { %2961 = vst [vmem:[#allocation2_spill] sm:$0xff] %v2299_v34  ;;  %v792_v36 = vpop.f32.mrf.mxu0 }
  0xb7   :  { %v941_v38 = vpop.f32.mrf.mxu1 }
  0xb8   :  { %v942_v39 = vadd.f32 %v941_v38, %v792_v36  ;;  %v1703_v36 = vld [vmem:[%s2954_s0 + $0x27c] sm:$0xf0] }
  0xba   :  { %v2301_v40 = vadd.f32 %v1090_v11, %v942_v39  ;;  %1806 = vmatmul.msk.bf16.gmra.mxu2 %vm691_vm0, %v1530_v37  ;;  %v1522_v11 = vor.u32 %v1857_v2, %v1521_v1  ;;  %v1534_v39 = vor.u32 %v1860_v30, %v1533_v29  ;;  %v1715_v1 = vld [vmem:[%s2954_s0 + $0x294] sm:$0xf0]  ;;  %v1866_v29 = vld [vmem:[%s2954_s0 + $0x158] sm:$0xf0]  ;;  %v1865_v30 = vld [vmem:[%s2954_s0 + $0x154] sm:$0xf] }
  0xbd   :  { %v2322_v47 = vpop.f32.mrf.mxu3  ;;  %v1098_v48 = vpop.f32.mrf.mxu2 }
  0xbe   :  { %2962 = vst [vmem:[#allocation3_spill] sm:$0xff] %v2322_v47  ;;  %v795_v50 = vpop.f32.mrf.mxu0 }
  0xbf   :  { %v944_v53 = vpop.f32.mrf.mxu1 }
  0xc0   :  { %v945_v54 = vadd.f32 %v944_v53, %v795_v50 }
  0xc1   :  { %834 = vmatmul.bf16.gmra.mxu0 %v1510_v49  ;;  %v1867_v49 = vld [vmem:[%s2954_s0 + $0x160] sm:$0xf0] }
  0xc2   :  { %v2324_v55 = vadd.f32 %v1093_v24, %v945_v54  ;;  %983 = vmatmul.bf16.gmra.mxu1 %v1514_v51  ;;  %1053 = vmatmul.bf16.gmra.mxu3 %v1682_v52 }
  0xc5   :  { %v2332_v58 = vpop.f32.mrf.mxu3  ;;  %v1100_v59 = vpop.f32.mrf.mxu2 }
  0xc6   :  { %v797_v60 = vpop.f32.mrf.mxu0 }
  0xc7   :  { %v946_v62 = vpop.f32.mrf.mxu1 }
  0xc8   :  { %v947_v63 = vadd.f32 %v946_v62, %v797_v60  ;;  %v1863_v60 = vld [vmem:[%s2954_s0 + $0x140] sm:$0xf0]  ;;  %v1547_v62 = vld [vmem:[%s2954_s0 + $0x144] sm:$0xf0] }
  0xca   :  { %v2334_v0 = vadd.f32 %v1095_v35, %v947_v63  ;;  %1807 = vmatmul.msk.bf16.gmra.mxu2 %vm691_vm0, %v1542_v61  ;;  %v1901_v35 = vld [vmem:[%s2954_s0 + $0x274] sm:$0xf]  ;;  %v1862_v61 = vld [vmem:[%s2954_s0 + $0x13c] sm:$0xf]  ;;  %v1904_v63 = vld [vmem:[%s2954_s0 + $0x28c] sm:$0xf] }
  0xcb   :  { %v1706_v43 = vor.u32 %v1901_v35, %v1703_v36  ;;  %v1550_v6 = vor.u32 %v1862_v61, %v1547_v62  ;;  %v1894_v35 = vld [vmem:[%s2954_s0 + $0x238] sm:$0xf0]  ;;  %v1569_v62 = vld [vmem:[%s2954_s0 + $0x168] sm:$0xf] }
  0xcd   :  { %v2355_v8 = vpop.f32.mrf.mxu3  ;;  %v1103_v9 = vpop.f32.mrf.mxu2 }
  0xce   :  { %v800_v12 = vpop.f32.mrf.mxu0 }
  0xcf   :  { %v949_v15 = vpop.f32.mrf.mxu1 }
  0xd0   :  { %v950_v17 = vadd.f32 %v949_v15, %v800_v12  ;;  %v1870_v15 = vld [vmem:[%s2954_s0 + $0x178] sm:$0xf0] }
  0xd1   :  { %839 = vmatmul.bf16.gmra.mxu0 %v1522_v11 }
  0xd2   :  { %v2357_v18 = vadd.f32 %v1098_v48, %v950_v17  ;;  %988 = vmatmul.bf16.gmra.mxu1 %v1526_v13  ;;  %1058 = vmatmul.bf16.gmra.mxu3 %v1694_v14  ;;  %v1565_v48 = vld [vmem:[%s2954_s0 + $0x158] sm:$0xf]  ;;  %v1577_v14 = vld [vmem:[%s2954_s0 + $0x170] sm:$0xf] }
  0xd3   :  { %v1566_v53 = vor.u32 %v1867_v49, %v1565_v48  ;;  %v1589_v49 = vld [vmem:[%s2954_s0 + $0x188] sm:$0xf] }
  0xd5   :  { %v2365_v21 = vpop.f32.mrf.mxu3  ;;  %v1105_v22 = vpop.f32.mrf.mxu2 }
  0xd6   :  { %v802_v24 = vpop.f32.mrf.mxu0 }
  0xd7   :  { %v951_v26 = vpop.f32.mrf.mxu1 }
  0xd8   :  { %v952_v27 = vadd.f32 %v951_v26, %v802_v24 }
  0xda   :  { %v2367_v28 = vadd.f32 %v1100_v59, %v952_v27  ;;  %1808 = vmatmul.msk.bf16.gmra.mxu2 %vm691_vm0, %v1554_v25  ;;  %v1545_v59 = vld [vmem:[%s2954_s0 + $0x138] sm:$0xf]  ;;  %v1557_v27 = vld [vmem:[%s2954_s0 + $0x150] sm:$0xf] }
  0xdb   :  { %v1546_v4 = vor.u32 %v1863_v60, %v1545_v59 }
  0xdd   :  { %v2388_v37 = vpop.f32.mrf.mxu3  ;;  %v1108_v38 = vpop.f32.mrf.mxu2 }
  0xde   :  { %v805_v41 = vpop.f32.mrf.mxu0 }
  0xdf   :  { %v954_v44 = vpop.f32.mrf.mxu1 }
  0xe0   :  { %v955_v45 = vadd.f32 %v954_v44, %v805_v41 }
  0xe1   :  { %844 = vmatmul.bf16.gmra.mxu0 %v1534_v39  ;;  %v1558_v39 = vor.u32 %v1866_v29, %v1557_v27  ;;  %v2499_v27 = vsel %vm1223_vm1, %v2258_v7, -inf  ;;  %v1581_v7 = vld [vmem:[%s2954_s0 + $0x180] sm:$0xf] }
  0xe2   :  { %v2390_v46 = vadd.f32 %v1103_v9, %v955_v45  ;;  %993 = vmatmul.bf16.gmra.mxu1 %v1538_v42  ;;  %1063 = vmatmul.bf16.gmra.mxu3 %v1706_v43  ;;  %v1718_v9 = vor.u32 %v1904_v63, %v1715_v1  ;;  %v1562_v42 = vor.u32 %v1865_v30, %v1559_v32  ;;  %v1869_v63 = vld [vmem:[%s2954_s0 + $0x170] sm:$0xf0]  ;;  %v1868_v1 = vld [vmem:[%s2954_s0 + $0x16c] sm:$0xf] }
  0xe3   :  { %v1674_v43 = vor.u32 %v1894_v35, %v1673_v33 }
  0xe5   :  { %v2398_v50 = vpop.f32.mrf.mxu3  ;;  %v1110_v51 = vpop.f32.mrf.mxu2 }
  0xe6   :  { %v807_v52 = vpop.f32.mrf.mxu0 }
  0xe7   :  { %v956_v54 = vpop.f32.mrf.mxu1 }
  0xe8   :  { %v957_v56 = vadd.f32 %v956_v54, %v807_v52 }
  0xea   :  { %v2400_v57 = vadd.f32 %v1105_v22, %v957_v56  ;;  %1809 = vmatmul.msk.bf16.gmra.mxu2 %vm691_vm0, %v1566_v53  ;;  %v1578_v22 = vor.u32 %v1870_v15, %v1577_v14 }
  0xed   :  { %v2421_v2 = vpop.f32.mrf.mxu3  ;;  %v1113_v3 = vpop.f32.mrf.mxu2 }
  0xee   :  { %v810_v5 = vpop.f32.mrf.mxu0 }
  0xef   :  { %v959_v11 = vpop.f32.mrf.mxu1 }
  0xf0   :  { %v960_v12 = vadd.f32 %v959_v11, %v810_v5  ;;  %v1897_v5 = vld [vmem:[%s2954_s0 + $0x250] sm:$0xf0]  ;;  %v1570_v11 = vor.u32 %v1869_v63, %v1569_v62 }
  0xf1   :  { %849 = vmatmul.bf16.gmra.mxu0 %v1546_v4  ;;  %v1685_v4 = vld [vmem:[%s2954_s0 + $0x248] sm:$0xf] }
  0xf2   :  { %v2423_v13 = vadd.f32 %v1108_v38, %v960_v12  ;;  %998 = vmatmul.bf16.gmra.mxu1 %v1550_v6  ;;  %1068 = vmatmul.bf16.gmra.mxu3 %v1718_v9  ;;  %v1686_v15 = vor.u32 %v1897_v5, %v1685_v4 }
  0xf5   :  { %v2431_v17 = vpop.f32.mrf.mxu3  ;;  %v1115_v19 = vpop.f32.mrf.mxu2 }
  0xf6   :  { %v812_v20 = vpop.f32.mrf.mxu0 }
  0xf7   :  { %v961_v24 = vpop.f32.mrf.mxu1 }
  0xf8   :  { %v962_v25 = vadd.f32 %v961_v24, %v812_v20  ;;  %v1601_v24 = vld [vmem:[%s2954_s0 + $0x1a0] sm:$0xf] }
  0xfa   :  { %v2433_v26 = vadd.f32 %v1110_v51, %v962_v25  ;;  %1810 = vmatmul.msk.bf16.gmra.mxu2 %vm691_vm0, %v1578_v22  ;;  %v1873_v51 = vld [vmem:[%s2954_s0 + $0x190] sm:$0xf0]  ;;  %v1876_v25 = vld [vmem:[%s2954_s0 + $0x1a8] sm:$0xf0] }
  0xfb   :  { %v1590_v56 = vor.u32 %v1873_v51, %v1589_v49  ;;  %v1697_v49 = vld [vmem:[%s2954_s0 + $0x260] sm:$0xf]  ;;  %v1900_v51 = vld [vmem:[%s2954_s0 + $0x268] sm:$0xf0] }
  0xfd   :  { %v2454_v36 = vpop.f32.mrf.mxu3  ;;  %v1118_v38 = vpop.f32.mrf.mxu2 }
  0xfe   :  { %v815_v41 = vpop.f32.mrf.mxu0 }
  0xff   :  { %v964_v44 = vpop.f32.mrf.mxu1 }
 0x100   :  { %v965_v45 = vadd.f32 %v964_v44, %v815_v41  ;;  %v1871_v44 = vld [vmem:[%s2954_s0 + $0x184] sm:$0xf] }
 0x101   :  { %854 = vmatmul.bf16.gmra.mxu0 %v1558_v39 }
 0x102   :  { %v2456_v48 = vadd.f32 %v1113_v3, %v965_v45  ;;  %1003 = vmatmul.bf16.gmra.mxu1 %v1562_v42  ;;  %1818 = vmatmul.msk.bf16.vlgmr.msra.gmra.mxu3 %vm691_vm0, %v1674_v43  ;;  %v1571_v3 = vld [vmem:[%s2954_s0 + $0x174] sm:$0xf0]  ;;  %v1872_v43 = vld [vmem:[%s2954_s0 + $0x188] sm:$0xf0]  ;;  %v1583_v45 = vld [vmem:[%s2954_s0 + $0x18c] sm:$0xf0] }
 0x103   :  { %v1574_v14 = vor.u32 %v1868_v1, %v1571_v3  ;;  %v1582_v62 = vor.u32 %v1872_v43, %v1581_v7  ;;  %v1586_v1 = vor.u32 %v1871_v44, %v1583_v45  ;;  %v1698_v3 = vor.u32 %v1900_v51, %v1697_v49  ;;  %v1903_v7 = vld [vmem:[%s2954_s0 + $0x280] sm:$0xf0] }
 0x104   :  { %v2577_v43 = vsel %vm1223_vm1, %v2301_v40, -inf  ;;  %v1625_v40 = vld [vmem:[%s2954_s0 + $0x1d0] sm:$0xf] }
 0x105   :  { %v2465_v52 = vpop.f32.mrf.mxu3  ;;  %v1120_v53 = vpop.f32.mrf.mxu2 }
 0x106   :  { %v817_v54 = vpop.f32.mrf.mxu0 }
 0x107   :  { %v966_v59 = vpop.f32.mrf.mxu1 }
 0x108   :  { %v967_v60 = vadd.f32 %v966_v59, %v817_v54 }
 0x10a   :  { %v2467_v61 = vadd.f32 %v1115_v19, %v967_v60  ;;  %1811 = vmatmul.msk.bf16.gmra.mxu2 %vm691_vm0, %v1590_v56 }
 0x10d   :  { %v2488_v6 = vpop.f32.mrf.mxu3  ;;  %v1123_v9 = vpop.f32.mrf.mxu2 }
 0x10e   :  { %2963 = vst [vmem:[#allocation4_spill] sm:$0xff] %v2488_v6  ;;  %v820_v12 = vpop.f32.mrf.mxu0 }
 0x10f   :  { %v969_v19 = vpop.f32.mrf.mxu1 }
 0x110   :  { %v970_v20 = vadd.f32 %v969_v19, %v820_v12  ;;  %v1879_v12 = vld [vmem:[%s2954_s0 + $0x1c0] sm:$0xf0] }
 0x111   :  { %859 = vmatmul.bf16.gmra.mxu0 %v1570_v11 }
 0x112   :  { %v1119_v22 = vadd.f32 %v1118_v38, %v970_v20  ;;  %1008 = vmatmul.bf16.gmra.mxu1 %v1574_v14  ;;  %1819 = vmatmul.msk.bf16.gmra.mxu3 %vm691_vm0, %v1686_v15  ;;  %v1602_v38 = vor.u32 %v1876_v25, %v1601_v24  ;;  %v2547_v14 = vsel %vm1223_vm1, %v2291_v31, -inf  ;;  %v1593_v31 = vld [vmem:[%s2954_s0 + $0x198] sm:$0xf] }
 0x114   :  { %v2502_v29 = vsel %vm1223_vm1, %v1119_v22, -inf }
 0x115   :  { %v2506_v32 = vpop.f32.mrf.mxu3  ;;  %v1125_v33 = vpop.f32.mrf.mxu2 }
 0x116   :  { %v822_v35 = vpop.f32.mrf.mxu0 }
 0x117   :  { %v971_v39 = vpop.f32.mrf.mxu1 }
 0x118   :  { %v972_v41 = vadd.f32 %v971_v39, %v822_v35  ;;  %v1875_v39 = vld [vmem:[%s2954_s0 + $0x1a0] sm:$0xf0] }
 0x11a   :  { %v1121_v42 = vadd.f32 %v1120_v53, %v972_v41  ;;  %1812 = vmatmul.msk.bf16.gmra.mxu2 %vm691_vm0, %v1602_v38  ;;  %v2529_v53 = vsel %vm1223_vm1, %v2268_v16, -inf  ;;  %v1613_v16 = vld [vmem:[%s2954_s0 + $0x1b8] sm:$0xf]  ;;  %v1874_v41 = vld [vmem:[%s2954_s0 + $0x19c] sm:$0xf] }
 0x11b   :  { %v1614_v24 = vor.u32 %v1879_v12, %v1613_v16  ;;  %v1882_v16 = vld [vmem:[%s2954_s0 + $0x1d8] sm:$0xf0]  ;;  %v2595_v12 = vsel %vm1223_vm1, %v2324_v55, -inf  ;;  %v1605_v55 = vld [vmem:[%s2954_s0 + $0x1b0] sm:$0xf] }
 0x11c   :  { %v2532_v54 = vsel %vm1223_vm1, %v1121_v42, -inf  ;;  %v1595_v42 = vld [vmem:[%s2954_s0 + $0x1a4] sm:$0xf0] }
 0x11d   :  { %v2536_v59 = vpop.f32.mrf.mxu3  ;;  %v1128_v60 = vpop.f32.mrf.mxu2 }
 0x11e   :  { %2964 = vst [vmem:[#allocation5_spill] sm:$0xff] %v2536_v59  ;;  %v825_v63 = vpop.f32.mrf.mxu0 }
 0x11f   :  { %v974_v4 = vpop.f32.mrf.mxu1 }
 0x120   :  { %v975_v5 = vadd.f32 %v974_v4, %v825_v63 }
 0x121   :  { %864 = vmatmul.bf16.gmra.mxu0 %v1582_v62  ;;  %v1594_v62 = vor.u32 %v1875_v39, %v1593_v31 }
 0x122   :  { %v1124_v11 = vadd.f32 %v1123_v9, %v975_v5  ;;  %1013 = vmatmul.bf16.gmra.mxu1 %v1586_v1  ;;  %1820 = vmatmul.msk.bf16.gmra.mxu3 %vm691_vm0, %v1698_v3  ;;  %v1598_v1 = vor.u32 %v1874_v41, %v1595_v42  ;;  %v1878_v42 = vld [vmem:[%s2954_s0 + $0x1b8] sm:$0xf0] }
 0x124   :  { %v2550_v15 = vsel %vm1223_vm1, %v1124_v11, -inf }
 0x125   :  { %v2554_v19 = vpop.f32.mrf.mxu3  ;;  %v1130_v20 = vpop.f32.mrf.mxu2 }
 0x126   :  { %2965 = vst [vmem:[#allocation6_spill] sm:$0xff] %v2554_v19  ;;  %v827_v22 = vpop.f32.mrf.mxu0 }
 0x127   :  { %v976_v25 = vpop.f32.mrf.mxu1 }
 0x128   :  { %v977_v35 = vadd.f32 %v976_v25, %v827_v22 }
 0x12a   :  { %v1126_v38 = vadd.f32 %v1125_v33, %v977_v35  ;;  %1813 = vmatmul.msk.bf16.gmra.mxu2 %vm691_vm0, %v1614_v24  ;;  %v1709_v33 = vld [vmem:[%s2954_s0 + $0x278] sm:$0xf] }
 0x12b   :  { %v1710_v3 = vor.u32 %v1903_v7, %v1709_v33  ;;  %v1877_v33 = vld [vmem:[%s2954_s0 + $0x1b4] sm:$0xf]  ;;  %v1607_v7 = vld [vmem:[%s2954_s0 + $0x1bc] sm:$0xf0] }
 0x12c   :  { %v2580_v44 = vsel %vm1223_vm1, %v1126_v38, -inf  ;;  %v1626_v38 = vor.u32 %v1882_v16, %v1625_v40  ;;  %v1610_v16 = vor.u32 %v1877_v33, %v1607_v7 }
 0x12d   :  { %v2584_v49 = vpop.f32.mrf.mxu3  ;;  %v1133_v51 = vpop.f32.mrf.mxu2 }
 0x12e   :  { %2966 = vst [vmem:[#allocation7_spill] sm:$0xff] %v2584_v49  ;;  %v830_v63 = vpop.f32.mrf.mxu0 }
 0x12f   :  { %v979_v4 = vpop.f32.mrf.mxu1 }
 0x130   :  { %v980_v5 = vadd.f32 %v979_v4, %v830_v63  ;;  %v2625_v63 = vsel %vm1223_vm1, %v2334_v0, -inf  ;;  %v1637_v0 = vld [vmem:[%s2954_s0 + $0x1e8] sm:$0xf] }
 0x131   :  { %869 = vmatmul.bf16.gmra.mxu0 %v1594_v62  ;;  %v1906_v62 = vld [vmem:[%s2954_s0 + $0x298] sm:$0xf0] }
 0x132   :  { %v1129_v11 = vadd.f32 %v1128_v60, %v980_v5  ;;  %1018 = vmatmul.bf16.gmra.mxu1 %v1598_v1  ;;  %1821 = vmatmul.msk.bf16.gmra.mxu3 %vm691_vm0, %v1710_v3 }
 0x134   :  { %v2598_v22 = vsel %vm1223_vm1, %v1129_v11, -inf  ;;  %v1606_v11 = vor.u32 %v1878_v42, %v1605_v55  ;;  %v2643_v55 = vsel %vm1223_vm1, %v2357_v18, -inf  ;;  %v1617_v18 = vld [vmem:[%s2954_s0 + $0x1c8] sm:$0xf] }
 0x135   :  { %v2602_v24 = vpop.f32.mrf.mxu3  ;;  %v1135_v25 = vpop.f32.mrf.mxu2 }
 0x136   :  { %v832_v35 = vpop.f32.mrf.mxu0 }
 0x137   :  { %v981_v31 = vpop.f32.mrf.mxu1 }
 0x138   :  { %v982_v39 = vadd.f32 %v981_v31, %v832_v35 }
 0x13a   :  { %v1131_v41 = vadd.f32 %v1130_v20, %v982_v39  ;;  %1814 = vmatmul.msk.bf16.gmra.mxu2 %vm691_vm0, %v1626_v38  ;;  %v1721_v20 = vld [vmem:[%s2954_s0 + $0x290] sm:$0xf] }
 0x13b   :  { %v1722_v35 = vor.u32 %v1906_v62, %v1721_v20 }
 0x13c   :  { %v2628_v1 = vsel %vm1223_vm1, %v1131_v41, -inf  ;;  %v1885_v41 = vld [vmem:[%s2954_s0 + $0x1f0] sm:$0xf0] }
 0x13d   :  { %v2632_v4 = vpop.f32.mrf.mxu3  ;;  %v1138_v5 = vpop.f32.mrf.mxu2  ;;  %v1638_v62 = vor.u32 %v1885_v41, %v1637_v0  ;;  %v2684_v0 = vsel %vm1223_vm1, %v2390_v46, -inf  ;;  %v1629_v46 = vld [vmem:[%s2954_s0 + $0x1e0] sm:$0xf] }
 0x13e   :  { %v835_v40 = vpop.f32.mrf.mxu0 }
 0x13f   :  { %v984_v38 = vpop.f32.mrf.mxu1 }
 0x140   :  { %v985_v31 = vadd.f32 %v984_v38, %v835_v40  ;;  %v1880_v38 = vld [vmem:[%s2954_s0 + $0x1cc] sm:$0xf] }
 0x141   :  { %874 = vmatmul.bf16.gmra.mxu0 %v1606_v11 }
 0x142   :  { %v1134_v39 = vadd.f32 %v1133_v51, %v985_v31  ;;  %1023 = vmatmul.bf16.gmra.mxu1 %v1610_v16  ;;  %1822 = vmatmul.msk.bf16.gmra.mxu3 %vm691_vm0, %v1722_v35  ;;  %v1881_v35 = vld [vmem:[%s2954_s0 + $0x1d0] sm:$0xf0]  ;;  %v1619_v31 = vld [vmem:[%s2954_s0 + $0x1d4] sm:$0xf0] }
 0x144   :  { %v2646_v42 = vsel %vm1223_vm1, %v1134_v39, -inf }
 0x145   :  { %v2650_v33 = vpop.f32.mrf.mxu3  ;;  %v1140_v7 = vpop.f32.mrf.mxu2 }
 0x146   :  { %v837_v20 = vpop.f32.mrf.mxu0 }
 0x147   :  { %v986_v11 = vpop.f32.mrf.mxu1 }
 0x148   :  { %v987_v40 = vadd.f32 %v986_v11, %v837_v20 }
 0x14a   :  { %v1136_v16 = vadd.f32 %v1135_v25, %v987_v40  ;;  %1815 = vmatmul.msk.bf16.gmra.mxu2 %vm691_vm0, %v1638_v62  ;;  %v2667_v25 = vsel %vm1223_vm1, %v2367_v28, -inf  ;;  %v1618_v62 = vor.u32 %v1881_v35, %v1617_v18  ;;  %v1622_v40 = vor.u32 %v1880_v38, %v1619_v31  ;;  %v1649_v28 = vld [vmem:[%s2954_s0 + $0x200] sm:$0xf] }
 0x14c   :  { %v2670_v39 = vsel %vm1223_vm1, %v1136_v16, -inf  ;;  %v1888_v16 = vld [vmem:[%s2954_s0 + $0x208] sm:$0xf0] }
 0x14d   :  { %v2674_v41 = vpop.f32.mrf.mxu3  ;;  %v1143_v20 = vpop.f32.mrf.mxu2  ;;  %v1650_v38 = vor.u32 %v1888_v16, %v1649_v28  ;;  %v1631_v28 = vld [vmem:[%s2954_s0 + $0x1ec] sm:$0xf0] }
 0x14e   :  { %v840_v11 = vpop.f32.mrf.mxu0 }
 0x14f   :  { %v989_v51 = vpop.f32.mrf.mxu1 }
 0x150   :  { %v990_v3 = vadd.f32 %v989_v51, %v840_v11 }
 0x151   :  { %879 = vmatmul.bf16.gmra.mxu0 %v1618_v62 }
 0x152   :  { %v1139_v60 = vadd.f32 %v1138_v5, %v990_v3  ;;  %1028 = vmatmul.bf16.gmra.mxu1 %v1622_v40  ;;  %v1883_v40 = vld [vmem:[%s2954_s0 + $0x1e4] sm:$0xf] }
 0x153   :  { %v1634_v45 = vor.u32 %v1883_v40, %v1631_v28 }
 0x154   :  { %v2687_v18 = vsel %vm1223_vm1, %v1139_v60, -inf  ;;  %v1884_v60 = vld [vmem:[%s2954_s0 + $0x1e8] sm:$0xf0] }
 0x155   :  { %v2691_v3 = vpop.f32.mrf.mxu3  ;;  %v1145_v5 = vpop.f32.mrf.mxu2 }
 0x156   :  { %v842_v35 = vpop.f32.mrf.mxu0 }
 0x157   :  { %v991_v31 = vpop.f32.mrf.mxu1 }
 0x158   :  { %v992_v62 = vadd.f32 %v991_v31, %v842_v35  ;;  %v2725_v35 = vsel %vm1223_vm1, %v2423_v13, -inf  ;;  %v2737_v13 = vsel %vm1223_vm1, %v2433_v26, -inf }
 0x15a   :  { %v1141_v11 = vadd.f32 %v1140_v7, %v992_v62  ;;  %1816 = vmatmul.msk.bf16.gmra.mxu2 %vm691_vm0, %v1650_v38  ;;  %v2708_v7 = vsel %vm1223_vm1, %v2400_v57, -inf  ;;  %v1630_v62 = vor.u32 %v1884_v60, %v1629_v46  ;;  %v1661_v57 = vld [vmem:[%s2954_s0 + $0x218] sm:$0xf] }
 0x15c   :  { %v2711_v16 = vsel %vm1223_vm1, %v1141_v11, -inf  ;;  %v1891_v11 = vld [vmem:[%s2954_s0 + $0x220] sm:$0xf0] }
 0x15d   :  { %v2715_v38 = vpop.f32.mrf.mxu3  ;;  %v1148_v31 = vpop.f32.mrf.mxu2 }
 0x15e   :  { %v845_v51 = vpop.f32.mrf.mxu0 }
 0x15f   :  { %v994_v9 = vpop.f32.mrf.mxu1 }
 0x160   :  { %v995_v56 = vadd.f32 %v994_v9, %v845_v51  ;;  %v1662_v51 = vor.u32 %v1891_v11, %v1661_v57 }
 0x161   :  { %884 = vmatmul.bf16.gmra.mxu0 %v1630_v62 }
 0x162   :  { %v1144_v30 = vadd.f32 %v1143_v20, %v995_v56  ;;  %1033 = vmatmul.bf16.gmra.mxu1 %v1634_v45 }
 0x164   :  { %v2728_v46 = vsel %vm1223_vm1, %v1144_v30, -inf }
 0x165   :  { %v2732_v56 = vpop.f32.mrf.mxu3  ;;  %v1150_v45 = vpop.f32.mrf.mxu2 }
 0x166   :  { %v847_v20 = vpop.f32.mrf.mxu0 }
 0x167   :  { %v996_v60 = vpop.f32.mrf.mxu1 }
 0x168   :  { %v997_v40 = vadd.f32 %v996_v60, %v847_v20 }
 0x16a   :  { %v1146_v28 = vadd.f32 %v1145_v5, %v997_v40  ;;  %1817 = vmatmul.msk.bf16.gmra.mxu2 %vm691_vm0, %v1662_v51  ;;  %v2748_v5 = vsel %vm1223_vm1, %v2456_v48, -inf }
 0x16b   :  { %2967 = vst [vmem:[#allocation8_spill] sm:$0xff] %v2748_v5 }
 0x16c   :  { %v2740_v30 = vsel %vm1223_vm1, %v1146_v28, -inf }
 0x16d   :  { %v1153_v9 = vpop.f32.mrf.mxu2  ;;  %v2744_v47 = vpop.f32.mrf.mxu3 }
 0x16e   :  { %v850_v49 = vpop.f32.mrf.mxu0 }
 0x16f   :  { %v999_v57 = vpop.f32.mrf.mxu1 }
 0x170   :  { %v1000_v11 = vadd.f32 %v999_v57, %v850_v49  ;;  %v2759_v49 = vsel %vm1223_vm1, %v2467_v61, -inf  ;;  %v2972_v61 = vmax.f32 %v2499_v27, %v2502_v29 }
 0x171   :  { %2969 = vst [vmem:[#allocation10_spill] sm:$0xff] %v2759_v49 }
 0x172   :  { %v1149_v20 = vadd.f32 %v1148_v31, %v1000_v11 }
 0x174   :  { %v2751_v26 = vsel %vm1223_vm1, %v1149_v20, -inf }
 0x175   :  { %2968 = vst [vmem:[#allocation9_spill] sm:$0xff] %v2751_v26  ;;  %v1155_v60 = vpop.f32.mrf.mxu2  ;;  %v2755_v19 = vpop.f32.mrf.mxu3 }
 0x176   :  { %v852_v40 = vpop.f32.mrf.mxu0 }
 0x177   :  { %v1001_v28 = vpop.f32.mrf.mxu1 }
 0x178   :  { %v1002_v62 = vadd.f32 %v1001_v28, %v852_v40 }
 0x17a   :  { %v1151_v34 = vadd.f32 %v1150_v45, %v1002_v62 }
 0x17c   :  { %v2762_v48 = vsel %vm1223_vm1, %v1151_v34, -inf }
 0x17d   :  { %2970 = vst [vmem:[#allocation11_spill] sm:$0xff] %v2762_v48  ;;  %v1158_v57 = vpop.f32.mrf.mxu2  ;;  %v2766_v26 = vpop.f32.mrf.mxu3 }
 0x17e   :  { %v855_v11 = vpop.f32.mrf.mxu0  ;;  %2971 = vst [vmem:[#allocation12_spill] sm:$0xff] %v2766_v26 }
 0x17f   :  { %v1004_v20 = vpop.f32.mrf.mxu1 }
 0x180   :  { %v1005_v51 = vadd.f32 %v1004_v20, %v855_v11 }
 0x182   :  { %v1154_v6 = vadd.f32 %v1153_v9, %v1005_v51  ;;  %v2973_v9 = vmax.f32 %v2529_v53, %v2532_v54 }
 0x184   :  { %v1227_v40 = vsel %vm1223_vm1, %v1154_v6, -inf }
 0x185   :  { %v1160_v45 = vpop.f32.mrf.mxu2  ;;  %v2772_v62 = vmax.f32 %v2972_v61, %v1227_v40  ;;  %v1198_v48 = vpop.f32.mrf.mxu3  ;;  %v2974_v40 = vmax.f32 %v2547_v14, %v2550_v15  ;;  %v1050_v14 = vadd.f32 %v2602_v24, %v2332_v58 }
 0x186   :  { %v857_v34 = vpop.f32.mrf.mxu0 }
 0x187   :  { %v1006_v28 = vpop.f32.mrf.mxu1 }
 0x188   :  { %v1007_v5 = vadd.f32 %v1006_v28, %v857_v34 }
 0x18a   :  { %v1156_v59 = vadd.f32 %v1155_v60, %v1007_v5 }
 0x18c   :  { %v1234_v31 = vsel %vm1223_vm1, %v1156_v59, -inf }
 0x18d   :  { %v1163_v49 = vpop.f32.mrf.mxu2  ;;  %v2778_v51 = vmax.f32 %v2973_v9, %v1234_v31  ;;  %v1200_v60 = vpop.f32.mrf.mxu3  ;;  %v2975_v31 = vmax.f32 %v2577_v43, %v2580_v44  ;;  %v2801_v43 = vld [vmem:[%s2955_s2] ss:$0 sm:$0xff] }
 0x18e   :  { %v860_v6 = vpop.f32.mrf.mxu0 }
 0x18f   :  { %v1009_v11 = vpop.f32.mrf.mxu1 }
 0x190   :  { %v1010_v20 = vadd.f32 %v1009_v11, %v860_v6  ;;  %v1199_v11 = vadd.f32 %v1198_v48, %v1050_v14 }
 0x192   :  { %v1159_v26 = vadd.f32 %v1158_v57, %v1010_v20 }
 0x194   :  { %v1241_v27 = vsel %vm1223_vm1, %v1159_v26, -inf }
 0x195   :  { %v1165_v29 = vpop.f32.mrf.mxu2  ;;  %v2784_v5 = vmax.f32 %v2974_v40, %v1241_v27  ;;  %v1203_v6 = vpop.f32.mrf.mxu3 }
 0x196   :  { %v862_v59 = vpop.f32.mrf.mxu0 }
 0x197   :  { %v1011_v61 = vpop.f32.mrf.mxu1 }
 0x198   :  { %v1012_v34 = vadd.f32 %v1011_v61, %v862_v59  ;;  %v1257_v59 = vsel %vm1223_vm1, %v1199_v11, -inf }
 0x19a   :  { %v1161_v28 = vadd.f32 %v1160_v45, %v1012_v34  ;;  %v2976_v45 = vmax.f32 %v2595_v12, %v2598_v22 }
 0x19c   :  { %v1248_v53 = vsel %vm1223_vm1, %v1161_v28, -inf }
 0x19d   :  { %v1168_v54 = vpop.f32.mrf.mxu2  ;;  %v2790_v57 = vmax.f32 %v2975_v31, %v1248_v53  ;;  %v1205_v22 = vpop.f32.mrf.mxu3 }
 0x19e   :  { %v865_v26 = vpop.f32.mrf.mxu0 }
 0x19f   :  { %v1014_v9 = vpop.f32.mrf.mxu1 }
 0x1a0   :  { %v1015_v15 = vadd.f32 %v1014_v9, %v865_v26  ;;  %v2977_v9 = vmax.f32 %v2625_v63, %v2628_v1 }
 0x1a2   :  { %v1164_v20 = vadd.f32 %v1163_v49, %v1015_v15  ;;  %v1052_v49 = vadd.f32 %v2632_v4, %v2355_v8 }
 0x1a4   :  { %v1255_v27 = vsel %vm1223_vm1, %v1164_v20, -inf  ;;  %v1201_v28 = vadd.f32 %v1200_v60, %v1052_v49 }
 0x1a5   :  { %v1256_v40 = vmax.f32 %v2976_v45, %v1255_v27  ;;  %v1170_v44 = vpop.f32.mrf.mxu2 }
 0x1a6   :  { %v867_v61 = vpop.f32.mrf.mxu0  ;;  %v1264_v11 = vsel %vm1223_vm1, %v1201_v28, -inf }
 0x1a7   :  { %v1258_v58 = vmax.f32 %v1256_v40, %v1257_v59  ;;  %v1016_v24 = vpop.f32.mrf.mxu1  ;;  %v1208_v59 = vpop.f32.mrf.mxu3 }
 0x1a8   :  { %v1017_v48 = vadd.f32 %v1016_v24, %v867_v61 }
 0x1a9   :  { %v1330_v34 = vadd.f32 %v2801_v43, %v1258_v58  ;;  %v2978_v58 = vmax.f32 %v2643_v55, %v2646_v42 }
 0x1aa   :  { %v1166_v12 = vadd.f32 %v1165_v29, %v1017_v48  ;;  %v1055_v29 = vadd.f32 %v2650_v33, %v2365_v21 }
 0x1ab   :  { %v1344_v53 = vmax.f32 %v1330_v34, 0.0 }
 0x1ac   :  { %v1262_v31 = vsel %vm1223_vm1, %v1166_v12, -inf  ;;  %v1204_v45 = vadd.f32 %v1203_v6, %v1055_v29 }
 0x1ad   :  { %v1358_v26 = vpack.c.bf16 %v1344_v53, %v1344_v53  ;;  %v1263_v14 = vmax.f32 %v2977_v9, %v1262_v31  ;;  %v1173_v15 = vpop.f32.mrf.mxu2 }
 0x1ae   :  { %v870_v20 = vpop.f32.mrf.mxu0  ;;  %v1271_v48 = vsel %vm1223_vm1, %v1204_v45, -inf  ;;  %v2980_v45 = vmax.f32 %v2684_v0, %v2687_v18 }
 0x1af   :  { %1373 = vst.msk [vmem:[%s2956_s3 + $0x10] sm:$0xf] %vm1368_vm2, %v1358_v26  ;;  %v1265_v8 = vmax.f32 %v1263_v14, %v1264_v11  ;;  %v1019_v4 = vpop.f32.mrf.mxu1  ;;  %v2979_v26 = vmax.f32 %v2667_v25, %v2670_v39 }
 0x1b0   :  { %v1020_v60 = vadd.f32 %v1019_v4, %v870_v20 }
 0x1b1   :  { %v1331_v27 = vadd.f32 %v2801_v43, %v1265_v8  ;;  %v1210_v8 = vpop.f32.mrf.mxu3 }
 0x1b2   :  { %v1169_v63 = vadd.f32 %v1168_v54, %v1020_v60  ;;  %v1057_v54 = vadd.f32 %v2674_v41, %v2388_v37 }
 0x1b3   :  { %v1345_v1 = vmax.f32 %v1331_v27, 0.0 }
 0x1b4   :  { %v1269_v40 = vsel %vm1223_vm1, %v1169_v63, -inf  ;;  %v1206_v12 = vadd.f32 %v1205_v22, %v1057_v54 }
 0x1b5   :  { %v1359_v61 = vpack.c.bf16 %v1345_v1, %v1345_v1  ;;  %v1270_v24 = vmax.f32 %v2978_v58, %v1269_v40  ;;  %v1175_v49 = vpop.f32.mrf.mxu2 }
 0x1b6   :  { %v872_v34 = vpop.f32.mrf.mxu0  ;;  %v1278_v11 = vsel %vm1223_vm1, %v1206_v12, -inf }
 0x1b7   :  { %1374 = vst.msk [vmem:[%s2956_s3 + $0x14] sm:$0xf] %vm1368_vm2, %v1359_v61  ;;  %v1272_v21 = vmax.f32 %v1270_v24, %v1271_v48  ;;  %v1021_v33 = vpop.f32.mrf.mxu1 }
 0x1b8   :  { %v1022_v6 = vadd.f32 %v1021_v33, %v872_v34  ;;  %v2981_v33 = vmax.f32 %v2708_v7, %v2711_v16 }
 0x1b9   :  { %v1332_v28 = vadd.f32 %v2801_v43, %v1272_v21  ;;  %v1213_v58 = vpop.f32.mrf.mxu3 }
 0x1ba   :  { %v1171_v55 = vadd.f32 %v1170_v44, %v1022_v6  ;;  %v1060_v44 = vadd.f32 %v2691_v3, %v2398_v50 }
 0x1bb   :  { %v1346_v42 = vmax.f32 %v1332_v28, 0.0 }
 0x1bc   :  { %v1276_v53 = vsel %vm1223_vm1, %v1171_v55, -inf  ;;  %v1209_v25 = vadd.f32 %v1208_v59, %v1060_v44 }
 0x1bd   :  { %v1360_v31 = vpack.c.bf16 %v1346_v42, %v1346_v42  ;;  %v1277_v9 = vmax.f32 %v2979_v26, %v1276_v53  ;;  %v1178_v14 = vpop.f32.mrf.mxu2 }
 0x1be   :  { %v875_v20 = vpop.f32.mrf.mxu0  ;;  %v1285_v40 = vsel %vm1223_vm1, %v1209_v25, -inf  ;;  %v1040_v25 = vadd.f32 %v2506_v32, %v2266_v10  ;;  %v1070_v32 = vadd.f32 %v2755_v19, %v2465_v52  ;;  %v2985_v52 = vld [vmem:[#allocation8_spill] sm:$0xff]  ;;  %v2986_v19 = vld [vmem:[#allocation9_spill] sm:$0xff] }
 0x1bf   :  { %1375 = vst.msk [vmem:[%s2956_s3 + $0x18] sm:$0xf] %vm1368_vm2, %v1360_v31  ;;  %v1279_v37 = vmax.f32 %v1277_v9, %v1278_v11  ;;  %v1024_v41 = vpop.f32.mrf.mxu1  ;;  %v2982_v11 = vmax.f32 %v2725_v35, %v2728_v46 }
 0x1c0   :  { %v1025_v22 = vadd.f32 %v1024_v41, %v875_v20 }
 0x1c1   :  { %v1333_v4 = vadd.f32 %v2801_v43, %v1279_v37  ;;  %v1215_v16 = vpop.f32.mrf.mxu3 }
 0x1c2   :  { %v1174_v39 = vadd.f32 %v1173_v15, %v1025_v22  ;;  %v1062_v15 = vadd.f32 %v2715_v38, %v2421_v2 }
 0x1c3   :  { %v1347_v29 = vmax.f32 %v1333_v4, 0.0 }
 0x1c4   :  { %v1283_v60 = vsel %vm1223_vm1, %v1174_v39, -inf  ;;  %v1211_v0 = vadd.f32 %v1210_v8, %v1062_v15 }
 0x1c5   :  { %v1361_v27 = vpack.c.bf16 %v1347_v29, %v1347_v29  ;;  %v1284_v63 = vmax.f32 %v2980_v45, %v1283_v60  ;;  %v1180_v1 = vpop.f32.mrf.mxu2 }
 0x1c6   :  { %v877_v61 = vpop.f32.mrf.mxu0  ;;  %v1292_v28 = vsel %vm1223_vm1, %v1211_v0, -inf }
 0x1c7   :  { %1376 = vst.msk [vmem:[%s2956_s3 + $0x1c] sm:$0xf] %vm1368_vm2, %v1361_v27  ;;  %v1286_v50 = vmax.f32 %v1284_v63, %v1285_v40  ;;  %v1026_v3 = vpop.f32.mrf.mxu1  ;;  %v2983_v27 = vmax.f32 %v2737_v13, %v2740_v30 }
 0x1c8   :  { %v1027_v59 = vadd.f32 %v1026_v3, %v877_v61 }
 0x1c9   :  { %v1334_v24 = vadd.f32 %v2801_v43, %v1286_v50  ;;  %v1218_v29 = vpop.f32.mrf.mxu3 }
 0x1ca   :  { %v1176_v18 = vadd.f32 %v1175_v49, %v1027_v59  ;;  %v1065_v49 = vadd.f32 %v2732_v56, %v2431_v17  ;;  %v1219_v3 = vadd.f32 %v1218_v29, %v1070_v32 }
 0x1cb   :  { %v1348_v48 = vmax.f32 %v1334_v24, 0.0  ;;  %v2984_v24 = vld [vmem:[#allocation5_spill] sm:$0xff] }
 0x1cc   :  { %v1290_v34 = vsel %vm1223_vm1, %v1176_v18, -inf  ;;  %v1214_v53 = vadd.f32 %v1213_v58, %v1065_v49  ;;  %v1042_v0 = vadd.f32 %v2984_v24, %v2289_v23  ;;  %v2988_v49 = vld [vmem:[#allocation4_spill] sm:$0xff] }
 0x1cd   :  { %v1362_v21 = vpack.c.bf16 %v1348_v48, %v1348_v48  ;;  %v1291_v54 = vmax.f32 %v2981_v33, %v1290_v34  ;;  %v1183_v6 = vpop.f32.mrf.mxu2 }
 0x1ce   :  { %v880_v12 = vpop.f32.mrf.mxu0  ;;  %v1299_v37 = vsel %vm1223_vm1, %v1214_v53, -inf }
 0x1cf   :  { %1377 = vst.msk [vmem:[%s2956_s3 + $0x20] sm:$0xf] %vm1368_vm2, %v1362_v21  ;;  %v1293_v2 = vmax.f32 %v1291_v54, %v1292_v28  ;;  %v1029_v38 = vpop.f32.mrf.mxu1  ;;  %v2987_v21 = vmax.f32 %v2985_v52, %v2986_v19  ;;  %v1313_v28 = vsel %vm1223_vm1, %v1219_v3, -inf }
 0x1d0   :  { %v1030_v55 = vadd.f32 %v1029_v38, %v880_v12 }
 0x1d1   :  { %v1335_v42 = vadd.f32 %v2801_v43, %v1293_v2 }
 0x1d2   :  { %v1179_v7 = vadd.f32 %v1178_v14, %v1030_v55  ;;  %v1067_v14 = vadd.f32 %v2744_v47, %v2454_v36  ;;  %v2989_v55 = vld [vmem:[#allocation12_spill] sm:$0xff] }
 0x1d3   :  { %v1349_v31 = vmax.f32 %v1335_v42, 0.0  ;;  %v1072_v42 = vadd.f32 %v2989_v55, %v2988_v49 }
 0x1d4   :  { %v1297_v26 = vsel %vm1223_vm1, %v1179_v7, -inf  ;;  %v1216_v4 = vadd.f32 %v1215_v16, %v1067_v14 }
 0x1d5   :  { %v1363_v9 = vpack.c.bf16 %v1349_v31, %v1349_v31  ;;  %v1298_v20 = vmax.f32 %v2982_v11, %v1297_v26  ;;  %v1185_v8 = vpop.f32.mrf.mxu2 }
 0x1d6   :  { %v882_v41 = vpop.f32.mrf.mxu0  ;;  %v1306_v47 = vsel %vm1223_vm1, %v1216_v4, -inf  ;;  %v2993_v4 = vld [vmem:[#allocation11_spill] sm:$0xff] }
 0x1d7   :  { %1378 = vst.msk [vmem:[%s2956_s3 + $0x24] sm:$0xf] %vm1368_vm2, %v1363_v9  ;;  %v1300_v17 = vmax.f32 %v1298_v20, %v1299_v37  ;;  %v1031_v56 = vpop.f32.mrf.mxu1  ;;  %v2990_v37 = vld [vmem:[#allocation2_spill] sm:$0xff] }
 0x1d8   :  { %v1032_v44 = vadd.f32 %v1031_v56, %v882_v41  ;;  %v2991_v41 = vld [vmem:[#allocation6_spill] sm:$0xff] }
 0x1d9   :  { %v1336_v22 = vadd.f32 %v2801_v43, %v1300_v17  ;;  %v1045_v17 = vadd.f32 %v2991_v41, %v2990_v37 }
 0x1da   :  { %v1181_v35 = vadd.f32 %v1180_v1, %v1032_v44 }
 0x1db   :  { %v1350_v46 = vmax.f32 %v1336_v22, 0.0  ;;  %v2992_v22 = vld [vmem:[#allocation10_spill] sm:$0xff] }
 0x1dc   :  { %v1304_v39 = vsel %vm1223_vm1, %v1181_v35, -inf  ;;  %v2994_v35 = vmax.f32 %v2992_v22, %v2993_v4 }
 0x1dd   :  { %v1364_v60 = vpack.c.bf16 %v1350_v46, %v1350_v46  ;;  %v1305_v45 = vmax.f32 %v2983_v27, %v1304_v39  ;;  %v1188_v63 = vpop.f32.mrf.mxu2 }
 0x1de   :  { %v1189_v36 = vadd.f32 %v1188_v63, %v1040_v25  ;;  %v885_v40 = vpop.f32.mrf.mxu0 }
 0x1df   :  { %1379 = vst.msk [vmem:[%s2956_s3 + $0x28] sm:$0xf] %vm1368_vm2, %v1364_v60  ;;  %v1307_v1 = vmax.f32 %v1305_v45, %v1306_v47  ;;  %v1034_v10 = vpop.f32.mrf.mxu1 }
 0x1e0   :  { %v1229_v61 = vsel %vm1223_vm1, %v1189_v36, -inf  ;;  %v1035_v50 = vadd.f32 %v1034_v10, %v885_v40  ;;  %v2995_v36 = vld [vmem:[#allocation3_spill] sm:$0xff] }
 0x1e1   :  { %v1337_v13 = vadd.f32 %v2801_v43, %v1307_v1  ;;  %v1230_v30 = vmax.f32 %v2772_v62, %v1229_v61  ;;  %v2996_v40 = vld [vmem:[#allocation7_spill] sm:$0xff] }
 0x1e2   :  { %v1184_v15 = vadd.f32 %v1183_v6, %v1035_v50  ;;  %v1220_v6 = vpop.f32.mrf.mxu3  ;;  %v1047_v1 = vadd.f32 %v2996_v40, %v2995_v36 }
 0x1e3   :  { %v1351_v59 = vmax.f32 %v1337_v13, 0.0  ;;  %v1326_v58 = vadd.f32 %v2801_v43, %v1230_v30  ;;  %v1221_v26 = vadd.f32 %v1220_v6, %v1072_v42 }
 0x1e4   :  { %v1311_v18 = vsel %vm1223_vm1, %v1184_v15, -inf }
 0x1e5   :  { %v1365_v48 = vpack.c.bf16 %v1351_v59, %v1351_v59  ;;  %v1340_v34 = vmax.f32 %v1326_v58, 0.0  ;;  %v1312_v33 = vmax.f32 %v2987_v21, %v1311_v18  ;;  %v1190_v54 = vpop.f32.mrf.mxu2  ;;  %v1320_v39 = vsel %vm1223_vm1, %v1221_v26, -inf }
 0x1e6   :  { %v1191_v62 = vadd.f32 %v1190_v54, %v1042_v0  ;;  %v887_v12 = vpop.f32.mrf.mxu0 }
 0x1e7   :  { %1380 = vst.msk [vmem:[%s2956_s3 + $0x2c] sm:$0xf] %vm1368_vm2, %v1365_v48  ;;  %v1354_v23 = vpack.c.bf16 %v1340_v34, %v1340_v34  ;;  %v1314_v2 = vmax.f32 %v1312_v33, %v1313_v28  ;;  %v1036_v38 = vpop.f32.mrf.mxu1 }
 0x1e8   :  { %v1236_v53 = vsel %vm1223_vm1, %v1191_v62, -inf  ;;  %v1037_v7 = vadd.f32 %v1036_v38, %v887_v12 }
 0x1e9   :  { %1369 = vst.msk [vmem:[%s2956_s3] sm:$0xf] %vm1368_vm2, %v1354_v23  ;;  %v1338_v16 = vadd.f32 %v2801_v43, %v1314_v2  ;;  %v1237_v31 = vmax.f32 %v2778_v51, %v1236_v53 }
 0x1ea   :  { %v1186_v9 = vadd.f32 %v1185_v8, %v1037_v7 }
 0x1eb   :  { %v1352_v11 = vmax.f32 %v1338_v16, 0.0  ;;  %v1327_v20 = vadd.f32 %v2801_v43, %v1237_v31 }
 0x1ec   :  { %v1318_v56 = vsel %vm1223_vm1, %v1186_v9, -inf }
 0x1ed   :  { %v1366_v14 = vpack.c.bf16 %v1352_v11, %v1352_v11  ;;  %v1341_v44 = vmax.f32 %v1327_v20, 0.0  ;;  %v1319_v46 = vmax.f32 %v2994_v35, %v1318_v56  ;;  %v1193_v25 = vpop.f32.mrf.mxu2 }
 0x1ee   :  { %v1194_v51 = vadd.f32 %v1193_v25, %v1045_v17 }
 0x1ef   :  { %1381 = vst.msk [vmem:[%s2956_s3 + $0x30] sm:$0xf] %vm1368_vm2, %v1366_v14  ;;  %v1355_v8 = vpack.c.bf16 %v1341_v44, %v1341_v44  ;;  %v1321_v29 = vmax.f32 %v1319_v46, %v1320_v39 }
 0x1f0   :  { %v1243_v60 = vsel %vm1223_vm1, %v1194_v51, -inf }
 0x1f1   :  { %1370 = vst.msk [vmem:[%s2956_s3 + $0x4] sm:$0xf] %vm1368_vm2, %v1355_v8  ;;  %v1339_v27 = vadd.f32 %v2801_v43, %v1321_v29  ;;  %v1244_v45 = vmax.f32 %v2784_v5, %v1243_v60 }
 0x1f3   :  { %v1353_v63 = vmax.f32 %v1339_v27, 0.0  ;;  %v1328_v47 = vadd.f32 %v2801_v43, %v1244_v45 }
 0x1f5   :  { %v1367_v10 = vpack.c.bf16 %v1353_v63, %v1353_v63  ;;  %v1342_v32 = vmax.f32 %v1328_v47, 0.0  ;;  %v1195_v61 = vpop.f32.mrf.mxu2 }
 0x1f6   :  { %v1196_v50 = vadd.f32 %v1195_v61, %v1047_v1 }
 0x1f7   :  { %1382 = vst.msk [vmem:[%s2956_s3 + $0x34] sm:$0xf] %vm1368_vm2, %v1367_v10  ;;  %v1356_v13 = vpack.c.bf16 %v1342_v32, %v1342_v32 }
 0x1f8   :  { %v1250_v30 = vsel %vm1223_vm1, %v1196_v50, -inf }
 0x1f9   :  { %1371 = vst.msk [vmem:[%s2956_s3 + $0x8] sm:$0xf] %vm1368_vm2, %v1356_v13  ;;  %v1251_v5 = vmax.f32 %v2790_v57, %v1250_v30 }
 0x1fb   :  { %v1329_v3 = vadd.f32 %v2801_v43, %v1251_v5 }
 0x1fd   :  { %v1343_v15 = vmax.f32 %v1329_v3, 0.0 }
 0x1ff   :  { %v1357_v59 = vpack.c.bf16 %v1343_v15, %v1343_v15 }
 0x201   :  { %1372 = vst.msk [vmem:[%s2956_s3 + $0xc] sm:$0xf] %vm1368_vm2, %v1357_v59 }

// kernel: cnn_forward.5
= control target key start
LH: loop header
LB: loop body
LE: loop exit
PB: predicated region body
PF: predicated region fallthrough
CT: control target
= control target key end

     0   :  { %vm1744_vm0 = vcmask 523264   ;;  %vm2183_vm1 = vcmask 80896   ;;  %s4180_s1 = inlined_call_operand.vmem [shape: bf16[3136,128], index: 1, kind: input, shape index: {}]   ;;  %s4181_s0 = inlined_call_operand.vmem [shape: bf16[16,3136], index: 0, kind: input, shape index: {}]   ;;  %s4182_s2 = inlined_call_operand.vmem [shape: f32[1,128], index: 2, kind: input, shape index: {}]   ;;  %s4183_s4 = inlined_call_operand.vmem [shape: f32[1,10], index: 4, kind: input, shape index: {}]   ;;  %s4184_s3 = inlined_call_operand.vmem [shape: bf16[128,10], index: 3, kind: input, shape index: {}]   ;;  %s4185_s5 = inlined_call_operand.vmem [shape: f32[16,10], index: 5, kind: output, shape index: {}]  }
   0x1   :  { %v3163_v0 = vld [vmem:[%s4180_s1 + $0x38] sm:$0xff]  ;;  %v3162_v4 = vld [vmem:[%s4180_s1 + $0x30] sm:$0xff]  ;;  %v3161_v8 = vld [vmem:[%s4180_s1 + $0x28] sm:$0xff] }
   0x2   :  { %v3179_v1 = vld [vmem:[%s4180_s1 + $0xb8] sm:$0xff]  ;;  %1748 = vmatpush.bf16.msra.mxu0 %v3163_v0  ;;  %v3178_v5 = vld [vmem:[%s4180_s1 + $0xb0] sm:$0xff]  ;;  %v3177_v9 = vld [vmem:[%s4180_s1 + $0xa8] sm:$0xff] }
   0x3   :  { %v3187_v2 = vld [vmem:[%s4180_s1 + $0xf8] sm:$0xff]  ;;  %1776 = vmatpush.bf16.msra.mxu2 %v3179_v1  ;;  %v3186_v6 = vld [vmem:[%s4180_s1 + $0xf0] sm:$0xff]  ;;  %v3185_v10 = vld [vmem:[%s4180_s1 + $0xe8] sm:$0xff] }
   0x4   :  { %v3171_v3 = vld [vmem:[%s4180_s1 + $0x78] sm:$0xff]  ;;  %1790 = vmatpush.bf16.msra.mxu3 %v3187_v2  ;;  %v3170_v7 = vld [vmem:[%s4180_s1 + $0x70] sm:$0xff]  ;;  %v3169_v11 = vld [vmem:[%s4180_s1 + $0x68] sm:$0xff] }
   0x5   :  { %1762 = vmatpush.bf16.msra.mxu1 %v3171_v3  ;;  %v3160_v12 = vld [vmem:[%s4180_s1 + $0x20] sm:$0xff]  ;;  %v3159_v16 = vld [vmem:[%s4180_s1 + $0x18] sm:$0xff]  ;;  %v3158_v20 = vld [vmem:[%s4180_s1 + $0x10] sm:$0xff] }
   0x6   :  { %1749 = vmatpush.bf16.msra.mxu0 %v3162_v4  ;;  %v3176_v13 = vld [vmem:[%s4180_s1 + $0xa0] sm:$0xff]  ;;  %v3175_v17 = vld [vmem:[%s4180_s1 + $0x98] sm:$0xff]  ;;  %v3174_v21 = vld [vmem:[%s4180_s1 + $0x90] sm:$0xff] }
   0x7   :  { %1777 = vmatpush.bf16.msra.mxu2 %v3178_v5  ;;  %v3184_v14 = vld [vmem:[%s4180_s1 + $0xe0] sm:$0xff]  ;;  %v3183_v18 = vld [vmem:[%s4180_s1 + $0xd8] sm:$0xff]  ;;  %v3182_v22 = vld [vmem:[%s4180_s1 + $0xd0] sm:$0xff] }
   0x8   :  { %1791 = vmatpush.bf16.msra.mxu3 %v3186_v6  ;;  %v3168_v15 = vld [vmem:[%s4180_s1 + $0x60] sm:$0xff]  ;;  %v3167_v19 = vld [vmem:[%s4180_s1 + $0x58] sm:$0xff]  ;;  %v3166_v23 = vld [vmem:[%s4180_s1 + $0x50] sm:$0xff] }
   0x9   :  { %1763 = vmatpush.bf16.msra.mxu1 %v3170_v7  ;;  %v3157_v24 = vld [vmem:[%s4180_s1 + $0x8] sm:$0xff]  ;;  %v3156_v28 = vld [vmem:[%s4180_s1] sm:$0xff]  ;;  %v3195_v31 = vld [vmem:[%s4180_s1 + $0x138] sm:$0xff] }
   0xa   :  { %1750 = vmatpush.bf16.msra.mxu0 %v3161_v8  ;;  %v3173_v25 = vld [vmem:[%s4180_s1 + $0x88] sm:$0xff]  ;;  %v3172_v29 = vld [vmem:[%s4180_s1 + $0x80] sm:$0xff]  ;;  %v3211_v34 = vld [vmem:[%s4180_s1 + $0x1b8] sm:$0xff] }
   0xb   :  { %1778 = vmatpush.bf16.msra.mxu2 %v3177_v9  ;;  %v3181_v26 = vld [vmem:[%s4180_s1 + $0xc8] sm:$0xff]  ;;  %v3180_v30 = vld [vmem:[%s4180_s1 + $0xc0] sm:$0xff]  ;;  %v3219_v37 = vld [vmem:[%s4180_s1 + $0x1f8] sm:$0xff] }
   0xc   :  { %1792 = vmatpush.bf16.msra.mxu3 %v3185_v10  ;;  %v3165_v27 = vld [vmem:[%s4180_s1 + $0x48] sm:$0xff]  ;;  %v2216_v32 = vld [vmem:[%s4181_s0] sm:$0xf]  ;;  %v3143_v33 = vld [vmem:[%s4181_s0 + $0x60] sm:$0xf0] }
   0xd   :  { %1764 = vmatpush.bf16.msra.mxu1 %v3169_v11  ;;  %v2224_v35 = vld [vmem:[%s4181_s0 + $0x8] sm:$0xf]  ;;  %v3144_v36 = vld [vmem:[%s4181_s0 + $0x68] sm:$0xf0]  ;;  %v2226_v39 = vld [vmem:[%s4181_s0 + $0x6c] sm:$0xf0]  ;;  %v2217_v41 = vor.u32 %v3143_v33, %v2216_v32 }
   0xe   :  { %1751 = vmatpush.bf16.msra.mxu0 %v3160_v12  ;;  %v3132_v38 = vld [vmem:[%s4181_s0 + $0xc] sm:$0xf]  ;;  %v3164_v40 = vld [vmem:[%s4180_s1 + $0x40] sm:$0xff]  ;;  %v3203_v42 = vld [vmem:[%s4180_s1 + $0x178] sm:$0xff]  ;;  %v2225_v43 = vor.u32 %v3144_v36, %v2224_v35 }
   0xf   :  { %1779 = vmatpush.bf16.msra.mxu2 %v3176_v13  ;;  %v3131_v44 = vld [vmem:[%s4181_s0 + $0x4] sm:$0xf]  ;;  %v2218_v45 = vld [vmem:[%s4181_s0 + $0x64] sm:$0xf0]  ;;  %v3194_v46 = vld [vmem:[%s4180_s1 + $0x130] sm:$0xff]  ;;  %v2229_v47 = vor.u32 %v3132_v38, %v2226_v39 }
  0x10   :  { %1793 = vmatpush.bf16.msra.mxu3 %v3184_v14  ;;  %v3210_v48 = vld [vmem:[%s4180_s1 + $0x1b0] sm:$0xff]  ;;  %v2221_v50 = vor.u32 %v3131_v44, %v2218_v45  ;;  %v3193_v52 = vld [vmem:[%s4180_s1 + $0x128] sm:$0xff]  ;;  %v3192_v56 = vld [vmem:[%s4180_s1 + $0x120] sm:$0xff] }
  0x11   :  { %1765 = vmatpush.bf16.msra.mxu1 %v3168_v15  ;;  %v3218_v49 = vld [vmem:[%s4180_s1 + $0x1f0] sm:$0xff]  ;;  %v3209_v53 = vld [vmem:[%s4180_s1 + $0x1a8] sm:$0xff]  ;;  %v3208_v57 = vld [vmem:[%s4180_s1 + $0x1a0] sm:$0xff] }
  0x12   :  { %1752 = vmatpush.bf16.msra.mxu0 %v3159_v16  ;;  %v3202_v51 = vld [vmem:[%s4180_s1 + $0x170] sm:$0xff]  ;;  %v3217_v54 = vld [vmem:[%s4180_s1 + $0x1e8] sm:$0xff]  ;;  %v3216_v58 = vld [vmem:[%s4180_s1 + $0x1e0] sm:$0xff] }
  0x13   :  { %1780 = vmatpush.bf16.msra.mxu2 %v3175_v17  ;;  %v3201_v55 = vld [vmem:[%s4180_s1 + $0x168] sm:$0xff]  ;;  %v3200_v59 = vld [vmem:[%s4180_s1 + $0x160] sm:$0xff]  ;;  %v3191_v60 = vld [vmem:[%s4180_s1 + $0x118] sm:$0xff] }
  0x14   :  { %1794 = vmatpush.bf16.msra.mxu3 %v3183_v18  ;;  %v3207_v61 = vld [vmem:[%s4180_s1 + $0x198] sm:$0xff]  ;;  %v3190_v0 = vld [vmem:[%s4180_s1 + $0x110] sm:$0xff]  ;;  %v3189_v4 = vld [vmem:[%s4180_s1 + $0x108] sm:$0xff] }
  0x15   :  { %1766 = vmatpush.bf16.msra.mxu1 %v3167_v19  ;;  %v3215_v62 = vld [vmem:[%s4180_s1 + $0x1d8] sm:$0xff]  ;;  %v3206_v1 = vld [vmem:[%s4180_s1 + $0x190] sm:$0xff]  ;;  %v3205_v5 = vld [vmem:[%s4180_s1 + $0x188] sm:$0xff] }
  0x16   :  { %1753 = vmatpush.bf16.msra.mxu0 %v3158_v20  ;;  %v3199_v63 = vld [vmem:[%s4180_s1 + $0x158] sm:$0xff]  ;;  %v3214_v2 = vld [vmem:[%s4180_s1 + $0x1d0] sm:$0xff]  ;;  %v3213_v6 = vld [vmem:[%s4180_s1 + $0x1c8] sm:$0xff] }
  0x17   :  { %1781 = vmatpush.bf16.msra.mxu2 %v3174_v21  ;;  %v3198_v3 = vld [vmem:[%s4180_s1 + $0x150] sm:$0xff]  ;;  %v3197_v7 = vld [vmem:[%s4180_s1 + $0x148] sm:$0xff]  ;;  %v3188_v8 = vld [vmem:[%s4180_s1 + $0x100] sm:$0xff] }
  0x18   :  { %1795 = vmatpush.bf16.msra.mxu3 %v3182_v22  ;;  %v3204_v9 = vld [vmem:[%s4180_s1 + $0x180] sm:$0xff]  ;;  %v3227_v11 = vld [vmem:[%s4180_s1 + $0x238] sm:$0xff]  ;;  %v2232_v13 = vld [vmem:[%s4181_s0 + $0x10] sm:$0xf] }
  0x19   :  { %1767 = vmatpush.bf16.msra.mxu1 %v3166_v23  ;;  %v3212_v10 = vld [vmem:[%s4180_s1 + $0x1c0] sm:$0xff]  ;;  %v3243_v12 = vld [vmem:[%s4180_s1 + $0x2b8] sm:$0xff]  ;;  %v3145_v14 = vld [vmem:[%s4181_s0 + $0x70] sm:$0xf0] }
  0x1a   :  { %1754 = vmatpush.bf16.msra.mxu0 %v3157_v24  ;;  %v2240_v15 = vld [vmem:[%s4181_s0 + $0x18] sm:$0xf]  ;;  %v3146_v16 = vld [vmem:[%s4181_s0 + $0x78] sm:$0xf0]  ;;  %v2242_v19 = vld [vmem:[%s4181_s0 + $0x7c] sm:$0xf0]  ;;  %v2233_v23 = vor.u32 %v3145_v14, %v2232_v13 }
  0x1b   :  { %1782 = vmatpush.bf16.msra.mxu2 %v3173_v25  ;;  %v3251_v17 = vld [vmem:[%s4180_s1 + $0x2f8] sm:$0xff]  ;;  %v3196_v20 = vld [vmem:[%s4180_s1 + $0x140] sm:$0xff]  ;;  %v3133_v21 = vld [vmem:[%s4181_s0 + $0x14] sm:$0xf]  ;;  %v2241_v24 = vor.u32 %v3146_v16, %v2240_v15 }
  0x1c   :  { %1796 = vmatpush.bf16.msra.mxu3 %v3181_v26  ;;  %v3134_v18 = vld [vmem:[%s4181_s0 + $0x1c] sm:$0xf]  ;;  %v2234_v22 = vld [vmem:[%s4181_s0 + $0x74] sm:$0xf0]  ;;  %v3225_v32 = vld [vmem:[%s4180_s1 + $0x228] sm:$0xff] }
  0x1d   :  { %1768 = vmatpush.bf16.msra.mxu1 %v3165_v27  ;;  %v3235_v25 = vld [vmem:[%s4180_s1 + $0x278] sm:$0xff]  ;;  %v2245_v26 = vor.u32 %v3134_v18, %v2242_v19  ;;  %v2237_v27 = vor.u32 %v3133_v21, %v2234_v22  ;;  %v3241_v33 = vld [vmem:[%s4180_s1 + $0x2a8] sm:$0xff]  ;;  %v3224_v36 = vld [vmem:[%s4180_s1 + $0x220] sm:$0xff] }
  0x1e   :  { %1755 = vmatpush.bf16.msra.mxu0 %v3156_v28  ;;  %v3226_v28 = vld [vmem:[%s4180_s1 + $0x230] sm:$0xff]  ;;  %v3233_v35 = vld [vmem:[%s4180_s1 + $0x268] sm:$0xff]  ;;  %v3248_v38 = vld [vmem:[%s4180_s1 + $0x2e0] sm:$0xff] }
  0x1f   :  { %1783 = vmatpush.bf16.msra.mxu2 %v3172_v29  ;;  %v3242_v29 = vld [vmem:[%s4180_s1 + $0x2b0] sm:$0xff]  ;;  %v3232_v39 = vld [vmem:[%s4180_s1 + $0x260] sm:$0xff]  ;;  %v3273_v13 = vld [vmem:[%s4180_s1 + $0x3a8] sm:$0xff] }
  0x20   :  { %1797 = vmatpush.bf16.msra.mxu3 %v3180_v30  ;;  %v3250_v30 = vld [vmem:[%s4180_s1 + $0x2f0] sm:$0xff]  ;;  %v3281_v14 = vld [vmem:[%s4180_s1 + $0x3e8] sm:$0xff]  ;;  %v3256_v16 = vld [vmem:[%s4180_s1 + $0x320] sm:$0xff] }
  0x21   :  { %1769 = vmatpush.bf16.msra.mxu1 %v3164_v40  ;;  %1756 = vmatmul.bf16.vlgmr.msra.gmra.mxu0 %v2217_v41  ;;  %v3223_v40 = vld [vmem:[%s4180_s1 + $0x218] sm:$0xff]  ;;  %v3222_v44 = vld [vmem:[%s4180_s1 + $0x210] sm:$0xff]  ;;  %v3265_v15 = vld [vmem:[%s4180_s1 + $0x368] sm:$0xff] }
  0x22   :  { %1804 = vmatpush.bf16.msrb.mxu0 %v3195_v31  ;;  %1784 = vmatmul.bf16.vlgmr.msra.gmra.mxu2 %v2225_v43  ;;  %v3234_v31 = vld [vmem:[%s4180_s1 + $0x270] sm:$0xff]  ;;  %v3239_v41 = vld [vmem:[%s4180_s1 + $0x298] sm:$0xff]  ;;  %v3280_v18 = vld [vmem:[%s4180_s1 + $0x3e0] sm:$0xff] }
  0x23   :  { %1832 = vmatpush.bf16.msrb.mxu2 %v3211_v34  ;;  %1798 = vmatmul.bf16.vlgmr.msra.gmra.mxu3 %v2229_v47  ;;  %v3249_v34 = vld [vmem:[%s4180_s1 + $0x2e8] sm:$0xff]  ;;  %v3231_v43 = vld [vmem:[%s4180_s1 + $0x258] sm:$0xff]  ;;  %v3238_v45 = vld [vmem:[%s4180_s1 + $0x290] sm:$0xff] }
  0x24   :  { %1846 = vmatpush.bf16.msrb.mxu3 %v3219_v37  ;;  %1770 = vmatmul.bf16.vlgmr.msra.gmra.mxu1 %v2221_v50  ;;  %v3240_v37 = vld [vmem:[%s4180_s1 + $0x2a0] sm:$0xff]  ;;  %v3230_v47 = vld [vmem:[%s4180_s1 + $0x250] sm:$0xff]  ;;  %v3245_v50 = vld [vmem:[%s4180_s1 + $0x2c8] sm:$0xff] }
  0x25   :  { %1818 = vmatpush.bf16.msrb.mxu1 %v3203_v42  ;;  %v3247_v42 = vld [vmem:[%s4180_s1 + $0x2d8] sm:$0xff]  ;;  %v3264_v19 = vld [vmem:[%s4180_s1 + $0x360] sm:$0xff] }
  0x26   :  { %1805 = vmatpush.bf16.msrb.mxu0 %v3194_v46  ;;  %v3246_v46 = vld [vmem:[%s4180_s1 + $0x2d0] sm:$0xff]  ;;  %v3271_v21 = vld [vmem:[%s4180_s1 + $0x398] sm:$0xff] }
  0x27   :  { %1833 = vmatpush.bf16.msrb.mxu2 %v3210_v48  ;;  %v3221_v48 = vld [vmem:[%s4180_s1 + $0x208] sm:$0xff]  ;;  %v3279_v22 = vld [vmem:[%s4180_s1 + $0x3d8] sm:$0xff] }
  0x28   :  { %1847 = vmatpush.bf16.msrb.mxu3 %v3218_v49  ;;  %v3237_v49 = vld [vmem:[%s4180_s1 + $0x288] sm:$0xff] }
  0x29   :  { %1819 = vmatpush.bf16.msrb.mxu1 %v3202_v51  ;;  %v3229_v51 = vld [vmem:[%s4180_s1 + $0x248] sm:$0xff] }
  0x2a   :  { %1806 = vmatpush.bf16.msrb.mxu0 %v3193_v52  ;;  %v3220_v52 = vld [vmem:[%s4180_s1 + $0x200] sm:$0xff] }
  0x2b   :  { %1834 = vmatpush.bf16.msrb.mxu2 %v3209_v53  ;;  %v3236_v53 = vld [vmem:[%s4180_s1 + $0x280] sm:$0xff] }
  0x2c   :  { %1848 = vmatpush.bf16.msrb.mxu3 %v3217_v54  ;;  %v3244_v54 = vld [vmem:[%s4180_s1 + $0x2c0] sm:$0xff] }
  0x2d   :  { %1820 = vmatpush.bf16.msrb.mxu1 %v3201_v55  ;;  %v3259_v55 = vld [vmem:[%s4180_s1 + $0x338] sm:$0xff] }
  0x2e   :  { %1807 = vmatpush.bf16.msrb.mxu0 %v3192_v56  ;;  %v3275_v56 = vld [vmem:[%s4180_s1 + $0x3b8] sm:$0xff] }
  0x2f   :  { %1835 = vmatpush.bf16.msrb.mxu2 %v3208_v57  ;;  %v2248_v57 = vld [vmem:[%s4181_s0 + $0x20] sm:$0xf] }
  0x30   :  { %1849 = vmatpush.bf16.msrb.mxu3 %v3216_v58  ;;  %v3147_v58 = vld [vmem:[%s4181_s0 + $0x80] sm:$0xf0] }
  0x31   :  { %1821 = vmatpush.bf16.msrb.mxu1 %v3200_v59  ;;  %v2256_v59 = vld [vmem:[%s4181_s0 + $0x28] sm:$0xf] }
  0x32   :  { %1808 = vmatpush.bf16.msrb.mxu0 %v3191_v60  ;;  %v3148_v60 = vld [vmem:[%s4181_s0 + $0x88] sm:$0xf0] }
  0x33   :  { %1836 = vmatpush.bf16.msrb.mxu2 %v3207_v61  ;;  %v3283_v61 = vld [vmem:[%s4180_s1 + $0x3f8] sm:$0xff] }
  0x34   :  { %1850 = vmatpush.bf16.msrb.mxu3 %v3215_v62  ;;  %v3136_v62 = vld [vmem:[%s4181_s0 + $0x2c] sm:$0xf] }
  0x35   :  { %1822 = vmatpush.bf16.msrb.mxu1 %v3199_v63  ;;  %v2258_v63 = vld [vmem:[%s4181_s0 + $0x8c] sm:$0xf0] }
  0x36   :  { %1809 = vmatpush.bf16.msrb.mxu0 %v3190_v0  ;;  %v3228_v0 = vld [vmem:[%s4180_s1 + $0x240] sm:$0xff] }
  0x37   :  { %1837 = vmatpush.bf16.msrb.mxu2 %v3206_v1  ;;  %v3135_v1 = vld [vmem:[%s4181_s0 + $0x24] sm:$0xf] }
  0x38   :  { %1851 = vmatpush.bf16.msrb.mxu3 %v3214_v2  ;;  %v2250_v2 = vld [vmem:[%s4181_s0 + $0x84] sm:$0xf0] }
  0x39   :  { %1823 = vmatpush.bf16.msrb.mxu1 %v3198_v3  ;;  %v2249_v3 = vor.u32 %v3147_v58, %v2248_v57  ;;  %v3305_v57 = vld [vmem:[%s4180_s1 + $0x4a8] sm:$0xff] }
  0x3a   :  { %1810 = vmatpush.bf16.msrb.mxu0 %v3189_v4  ;;  %v2257_v4 = vor.u32 %v3148_v60, %v2256_v59  ;;  %v3313_v58 = vld [vmem:[%s4180_s1 + $0x4e8] sm:$0xff]  ;;  %v3288_v60 = vld [vmem:[%s4180_s1 + $0x420] sm:$0xff] }
  0x3b   :  { %1838 = vmatpush.bf16.msrb.mxu2 %v3205_v5  ;;  %v3267_v5 = vld [vmem:[%s4180_s1 + $0x378] sm:$0xff]  ;;  %v3297_v59 = vld [vmem:[%s4180_s1 + $0x468] sm:$0xff] }
  0x3c   :  { %1852 = vmatpush.bf16.msrb.mxu3 %v3213_v6  ;;  %v2261_v6 = vor.u32 %v3136_v62, %v2258_v63  ;;  %v3312_v62 = vld [vmem:[%s4180_s1 + $0x4e0] sm:$0xff] }
  0x3d   :  { %1824 = vmatpush.bf16.msrb.mxu1 %v3197_v7  ;;  %v2253_v7 = vor.u32 %v3135_v1, %v2250_v2  ;;  %v3296_v63 = vld [vmem:[%s4180_s1 + $0x460] sm:$0xff]  ;;  %v3303_v1 = vld [vmem:[%s4180_s1 + $0x498] sm:$0xff] }
  0x3e   :  { %1811 = vmatpush.bf16.msrb.mxu0 %v3188_v8  ;;  %v3258_v8 = vld [vmem:[%s4180_s1 + $0x330] sm:$0xff]  ;;  %v3311_v2 = vld [vmem:[%s4180_s1 + $0x4d8] sm:$0xff] }
  0x3f   :  { %1839 = vmatpush.bf16.msrb.mxu2 %v3204_v9  ;;  %v3274_v9 = vld [vmem:[%s4180_s1 + $0x3b0] sm:$0xff] }
  0x40   :  { %1853 = vmatpush.bf16.msrb.mxu3 %v3212_v10  ;;  %v3282_v10 = vld [vmem:[%s4180_s1 + $0x3f0] sm:$0xff] }
  0x41   :  { %1825 = vmatpush.bf16.msrb.mxu1 %v3196_v20  ;;  %1812 = vmatmul.bf16.vlgmr.msrb.gmra.mxu0 %v2233_v23  ;;  %v3255_v20 = vld [vmem:[%s4180_s1 + $0x318] sm:$0xff] }
  0x42   :  { %1860 = vmatpush.bf16.msra.mxu0 %v3227_v11  ;;  %1840 = vmatmul.bf16.vlgmr.msrb.gmra.mxu2 %v2241_v24  ;;  %v3266_v11 = vld [vmem:[%s4180_s1 + $0x370] sm:$0xff]  ;;  %v3263_v23 = vld [vmem:[%s4180_s1 + $0x358] sm:$0xff] }
  0x43   :  { %1888 = vmatpush.bf16.msra.mxu2 %v3243_v12  ;;  %1854 = vmatmul.bf16.vlgmr.msrb.gmra.mxu3 %v2245_v26  ;;  %v3257_v12 = vld [vmem:[%s4180_s1 + $0x328] sm:$0xff]  ;;  %v3254_v24 = vld [vmem:[%s4180_s1 + $0x310] sm:$0xff] }
  0x44   :  { %1902 = vmatpush.bf16.msra.mxu3 %v3251_v17  ;;  %1826 = vmatmul.bf16.vlgmr.msrb.gmra.mxu1 %v2237_v27  ;;  %v3272_v17 = vld [vmem:[%s4180_s1 + $0x3a0] sm:$0xff]  ;;  %v3278_v26 = vld [vmem:[%s4180_s1 + $0x3d0] sm:$0xff] }
  0x45   :  { %1874 = vmatpush.bf16.msra.mxu1 %v3235_v25  ;;  %v3270_v25 = vld [vmem:[%s4180_s1 + $0x390] sm:$0xff] }
  0x46   :  { %1861 = vmatpush.bf16.msra.mxu0 %v3226_v28  ;;  %v3262_v27 = vld [vmem:[%s4180_s1 + $0x350] sm:$0xff]  ;;  %v3253_v28 = vld [vmem:[%s4180_s1 + $0x308] sm:$0xff] }
  0x47   :  { %1889 = vmatpush.bf16.msra.mxu2 %v3242_v29  ;;  %v3269_v29 = vld [vmem:[%s4180_s1 + $0x388] sm:$0xff] }
  0x48   :  { %1903 = vmatpush.bf16.msra.mxu3 %v3250_v30  ;;  %v3277_v30 = vld [vmem:[%s4180_s1 + $0x3c8] sm:$0xff] }
  0x49   :  { %1875 = vmatpush.bf16.msra.mxu1 %v3234_v31  ;;  %v3261_v31 = vld [vmem:[%s4180_s1 + $0x348] sm:$0xff] }
  0x4a   :  { %1862 = vmatpush.bf16.msra.mxu0 %v3225_v32  ;;  %v3252_v32 = vld [vmem:[%s4180_s1 + $0x300] sm:$0xff] }
  0x4b   :  { %1890 = vmatpush.bf16.msra.mxu2 %v3241_v33  ;;  %v3268_v33 = vld [vmem:[%s4180_s1 + $0x380] sm:$0xff] }
  0x4c   :  { %1904 = vmatpush.bf16.msra.mxu3 %v3249_v34  ;;  %v3276_v34 = vld [vmem:[%s4180_s1 + $0x3c0] sm:$0xff] }
  0x4d   :  { %1876 = vmatpush.bf16.msra.mxu1 %v3233_v35  ;;  %v3291_v35 = vld [vmem:[%s4180_s1 + $0x438] sm:$0xff] }
  0x4e   :  { %1863 = vmatpush.bf16.msra.mxu0 %v3224_v36  ;;  %v3307_v36 = vld [vmem:[%s4180_s1 + $0x4b8] sm:$0xff] }
  0x4f   :  { %1891 = vmatpush.bf16.msra.mxu2 %v3240_v37  ;;  %v2264_v37 = vld [vmem:[%s4181_s0 + $0x30] sm:$0xf] }
  0x50   :  { %1905 = vmatpush.bf16.msra.mxu3 %v3248_v38  ;;  %v3149_v38 = vld [vmem:[%s4181_s0 + $0x90] sm:$0xf0] }
  0x51   :  { %1877 = vmatpush.bf16.msra.mxu1 %v3232_v39  ;;  %v2272_v39 = vld [vmem:[%s4181_s0 + $0x38] sm:$0xf] }
  0x52   :  { %1864 = vmatpush.bf16.msra.mxu0 %v3223_v40  ;;  %v3150_v40 = vld [vmem:[%s4181_s0 + $0x98] sm:$0xf0] }
  0x53   :  { %1892 = vmatpush.bf16.msra.mxu2 %v3239_v41  ;;  %v3315_v41 = vld [vmem:[%s4180_s1 + $0x4f8] sm:$0xff] }
  0x54   :  { %1906 = vmatpush.bf16.msra.mxu3 %v3247_v42  ;;  %v3138_v42 = vld [vmem:[%s4181_s0 + $0x3c] sm:$0xf] }
  0x55   :  { %1878 = vmatpush.bf16.msra.mxu1 %v3231_v43  ;;  %v2274_v43 = vld [vmem:[%s4181_s0 + $0x9c] sm:$0xf0] }
  0x56   :  { %1865 = vmatpush.bf16.msra.mxu0 %v3222_v44  ;;  %v3260_v44 = vld [vmem:[%s4180_s1 + $0x340] sm:$0xff] }
  0x57   :  { %1893 = vmatpush.bf16.msra.mxu2 %v3238_v45  ;;  %v3137_v45 = vld [vmem:[%s4181_s0 + $0x34] sm:$0xf] }
  0x58   :  { %1907 = vmatpush.bf16.msra.mxu3 %v3246_v46  ;;  %v2266_v46 = vld [vmem:[%s4181_s0 + $0x94] sm:$0xf0] }
  0x59   :  { %1879 = vmatpush.bf16.msra.mxu1 %v3230_v47  ;;  %v2265_v47 = vor.u32 %v3149_v38, %v2264_v37  ;;  %v3337_v37 = vld [vmem:[%s4180_s1 + $0x5a8] sm:$0xff] }
  0x5a   :  { %1866 = vmatpush.bf16.msra.mxu0 %v3221_v48  ;;  %v2273_v48 = vor.u32 %v3150_v40, %v2272_v39  ;;  %v3345_v38 = vld [vmem:[%s4180_s1 + $0x5e8] sm:$0xff]  ;;  %v3320_v40 = vld [vmem:[%s4180_s1 + $0x520] sm:$0xff] }
  0x5b   :  { %1894 = vmatpush.bf16.msra.mxu2 %v3237_v49  ;;  %v3299_v49 = vld [vmem:[%s4180_s1 + $0x478] sm:$0xff]  ;;  %v3329_v39 = vld [vmem:[%s4180_s1 + $0x568] sm:$0xff] }
  0x5c   :  { %1908 = vmatpush.bf16.msra.mxu3 %v3245_v50  ;;  %v2277_v50 = vor.u32 %v3138_v42, %v2274_v43  ;;  %v3344_v42 = vld [vmem:[%s4180_s1 + $0x5e0] sm:$0xff] }
  0x5d   :  { %1880 = vmatpush.bf16.msra.mxu1 %v3229_v51  ;;  %v2269_v51 = vor.u32 %v3137_v45, %v2266_v46  ;;  %v3328_v43 = vld [vmem:[%s4180_s1 + $0x560] sm:$0xff]  ;;  %v3335_v45 = vld [vmem:[%s4180_s1 + $0x598] sm:$0xff] }
  0x5e   :  { %1867 = vmatpush.bf16.msra.mxu0 %v3220_v52  ;;  %v3290_v52 = vld [vmem:[%s4180_s1 + $0x430] sm:$0xff]  ;;  %v3343_v46 = vld [vmem:[%s4180_s1 + $0x5d8] sm:$0xff] }
  0x5f   :  { %1895 = vmatpush.bf16.msra.mxu2 %v3236_v53  ;;  %v3306_v53 = vld [vmem:[%s4180_s1 + $0x4b0] sm:$0xff] }
  0x60   :  { %1909 = vmatpush.bf16.msra.mxu3 %v3244_v54  ;;  %v3314_v54 = vld [vmem:[%s4180_s1 + $0x4f0] sm:$0xff] }
  0x61   :  { %1881 = vmatpush.bf16.msra.mxu1 %v3228_v0  ;;  %1868 = vmatmul.bf16.vlgmr.msra.gmra.mxu0 %v2249_v3  ;;  %v3287_v0 = vld [vmem:[%s4180_s1 + $0x418] sm:$0xff] }
  0x62   :  { %1916 = vmatpush.bf16.msrb.mxu0 %v3259_v55  ;;  %1896 = vmatmul.bf16.vlgmr.msra.gmra.mxu2 %v2257_v4  ;;  %v3298_v55 = vld [vmem:[%s4180_s1 + $0x470] sm:$0xff]  ;;  %v3295_v3 = vld [vmem:[%s4180_s1 + $0x458] sm:$0xff] }
  0x63   :  { %1944 = vmatpush.bf16.msrb.mxu2 %v3275_v56  ;;  %1910 = vmatmul.bf16.vlgmr.msra.gmra.mxu3 %v2261_v6  ;;  %v3289_v56 = vld [vmem:[%s4180_s1 + $0x428] sm:$0xff]  ;;  %v3286_v4 = vld [vmem:[%s4180_s1 + $0x410] sm:$0xff] }
  0x64   :  { %1958 = vmatpush.bf16.msrb.mxu3 %v3283_v61  ;;  %1882 = vmatmul.bf16.vlgmr.msra.gmra.mxu1 %v2253_v7  ;;  %v3304_v61 = vld [vmem:[%s4180_s1 + $0x4a0] sm:$0xff]  ;;  %v3310_v6 = vld [vmem:[%s4180_s1 + $0x4d0] sm:$0xff] }
  0x65   :  { %1930 = vmatpush.bf16.msrb.mxu1 %v3267_v5  ;;  %v3302_v5 = vld [vmem:[%s4180_s1 + $0x490] sm:$0xff] }
  0x66   :  { %1917 = vmatpush.bf16.msrb.mxu0 %v3258_v8  ;;  %v3294_v7 = vld [vmem:[%s4180_s1 + $0x450] sm:$0xff]  ;;  %v3285_v8 = vld [vmem:[%s4180_s1 + $0x408] sm:$0xff] }
  0x67   :  { %1945 = vmatpush.bf16.msrb.mxu2 %v3274_v9  ;;  %v3301_v9 = vld [vmem:[%s4180_s1 + $0x488] sm:$0xff] }
  0x68   :  { %1959 = vmatpush.bf16.msrb.mxu3 %v3282_v10  ;;  %v3309_v10 = vld [vmem:[%s4180_s1 + $0x4c8] sm:$0xff] }
  0x69   :  { %1931 = vmatpush.bf16.msrb.mxu1 %v3266_v11  ;;  %v3293_v11 = vld [vmem:[%s4180_s1 + $0x448] sm:$0xff] }
  0x6a   :  { %1918 = vmatpush.bf16.msrb.mxu0 %v3257_v12  ;;  %v3284_v12 = vld [vmem:[%s4180_s1 + $0x400] sm:$0xff] }
  0x6b   :  { %1946 = vmatpush.bf16.msrb.mxu2 %v3273_v13  ;;  %v3300_v13 = vld [vmem:[%s4180_s1 + $0x480] sm:$0xff] }
  0x6c   :  { %1960 = vmatpush.bf16.msrb.mxu3 %v3281_v14  ;;  %v3308_v14 = vld [vmem:[%s4180_s1 + $0x4c0] sm:$0xff] }
  0x6d   :  { %1932 = vmatpush.bf16.msrb.mxu1 %v3265_v15  ;;  %v3323_v15 = vld [vmem:[%s4180_s1 + $0x538] sm:$0xff] }
  0x6e   :  { %1919 = vmatpush.bf16.msrb.mxu0 %v3256_v16  ;;  %v3339_v16 = vld [vmem:[%s4180_s1 + $0x5b8] sm:$0xff] }
  0x6f   :  { %1947 = vmatpush.bf16.msrb.mxu2 %v3272_v17  ;;  %v2280_v17 = vld [vmem:[%s4181_s0 + $0x40] sm:$0xf] }
  0x70   :  { %1961 = vmatpush.bf16.msrb.mxu3 %v3280_v18  ;;  %v3151_v18 = vld [vmem:[%s4181_s0 + $0xa0] sm:$0xf0] }
  0x71   :  { %1933 = vmatpush.bf16.msrb.mxu1 %v3264_v19  ;;  %v2288_v19 = vld [vmem:[%s4181_s0 + $0x48] sm:$0xf] }
  0x72   :  { %1920 = vmatpush.bf16.msrb.mxu0 %v3255_v20  ;;  %v3152_v20 = vld [vmem:[%s4181_s0 + $0xa8] sm:$0xf0] }
  0x73   :  { %1948 = vmatpush.bf16.msrb.mxu2 %v3271_v21  ;;  %v3347_v21 = vld [vmem:[%s4180_s1 + $0x5f8] sm:$0xff] }
  0x74   :  { %1962 = vmatpush.bf16.msrb.mxu3 %v3279_v22  ;;  %v3140_v22 = vld [vmem:[%s4181_s0 + $0x4c] sm:$0xf] }
  0x75   :  { %1934 = vmatpush.bf16.msrb.mxu1 %v3263_v23  ;;  %v2290_v23 = vld [vmem:[%s4181_s0 + $0xac] sm:$0xf0] }
  0x76   :  { %1921 = vmatpush.bf16.msrb.mxu0 %v3254_v24  ;;  %v3292_v24 = vld [vmem:[%s4180_s1 + $0x440] sm:$0xff] }
  0x77   :  { %1949 = vmatpush.bf16.msrb.mxu2 %v3270_v25  ;;  %v3139_v25 = vld [vmem:[%s4181_s0 + $0x44] sm:$0xf] }
  0x78   :  { %1963 = vmatpush.bf16.msrb.mxu3 %v3278_v26  ;;  %v2282_v26 = vld [vmem:[%s4181_s0 + $0xa4] sm:$0xf0] }
  0x79   :  { %1935 = vmatpush.bf16.msrb.mxu1 %v3262_v27  ;;  %v2281_v27 = vor.u32 %v3151_v18, %v2280_v17 }
  0x7a   :  { %1922 = vmatpush.bf16.msrb.mxu0 %v3253_v28  ;;  %v2289_v28 = vor.u32 %v3152_v20, %v2288_v19 }
  0x7b   :  { %1950 = vmatpush.bf16.msrb.mxu2 %v3269_v29  ;;  %v3331_v29 = vld [vmem:[%s4180_s1 + $0x578] sm:$0xff] }
  0x7c   :  { %1964 = vmatpush.bf16.msrb.mxu3 %v3277_v30  ;;  %v2293_v30 = vor.u32 %v3140_v22, %v2290_v23 }
  0x7d   :  { %1936 = vmatpush.bf16.msrb.mxu1 %v3261_v31  ;;  %v2285_v31 = vor.u32 %v3139_v25, %v2282_v26 }
  0x7e   :  { %1923 = vmatpush.bf16.msrb.mxu0 %v3252_v32  ;;  %v3322_v32 = vld [vmem:[%s4180_s1 + $0x530] sm:$0xff] }
  0x7f   :  { %1951 = vmatpush.bf16.msrb.mxu2 %v3268_v33  ;;  %v3338_v33 = vld [vmem:[%s4180_s1 + $0x5b0] sm:$0xff] }
  0x80   :  { %1965 = vmatpush.bf16.msrb.mxu3 %v3276_v34  ;;  %v3346_v34 = vld [vmem:[%s4180_s1 + $0x5f0] sm:$0xff] }
  0x81   :  { %1937 = vmatpush.bf16.msrb.mxu1 %v3260_v44  ;;  %1924 = vmatmul.bf16.vlgmr.msrb.gmra.mxu0 %v2265_v47  ;;  %v3319_v44 = vld [vmem:[%s4180_s1 + $0x518] sm:$0xff] }
  0x82   :  { %1972 = vmatpush.bf16.msra.mxu0 %v3291_v35  ;;  %1952 = vmatmul.bf16.vlgmr.msrb.gmra.mxu2 %v2273_v48  ;;  %v3330_v35 = vld [vmem:[%s4180_s1 + $0x570] sm:$0xff]  ;;  %v3327_v47 = vld [vmem:[%s4180_s1 + $0x558] sm:$0xff] }
  0x83   :  { %2000 = vmatpush.bf16.msra.mxu2 %v3307_v36  ;;  %1966 = vmatmul.bf16.vlgmr.msrb.gmra.mxu3 %v2277_v50  ;;  %v3321_v36 = vld [vmem:[%s4180_s1 + $0x528] sm:$0xff]  ;;  %v3318_v48 = vld [vmem:[%s4180_s1 + $0x510] sm:$0xff] }
  0x84   :  { %2014 = vmatpush.bf16.msra.mxu3 %v3315_v41  ;;  %1938 = vmatmul.bf16.vlgmr.msrb.gmra.mxu1 %v2269_v51  ;;  %v3336_v41 = vld [vmem:[%s4180_s1 + $0x5a0] sm:$0xff]  ;;  %v3342_v50 = vld [vmem:[%s4180_s1 + $0x5d0] sm:$0xff] }
  0x85   :  { %1986 = vmatpush.bf16.msra.mxu1 %v3299_v49  ;;  %v3334_v49 = vld [vmem:[%s4180_s1 + $0x590] sm:$0xff] }
  0x86   :  { %1973 = vmatpush.bf16.msra.mxu0 %v3290_v52  ;;  %v3326_v51 = vld [vmem:[%s4180_s1 + $0x550] sm:$0xff]  ;;  %v3317_v52 = vld [vmem:[%s4180_s1 + $0x508] sm:$0xff] }
  0x87   :  { %2001 = vmatpush.bf16.msra.mxu2 %v3306_v53  ;;  %v3333_v53 = vld [vmem:[%s4180_s1 + $0x588] sm:$0xff] }
  0x88   :  { %2015 = vmatpush.bf16.msra.mxu3 %v3314_v54  ;;  %v3341_v54 = vld [vmem:[%s4180_s1 + $0x5c8] sm:$0xff] }
  0x89   :  { %1987 = vmatpush.bf16.msra.mxu1 %v3298_v55  ;;  %v3325_v55 = vld [vmem:[%s4180_s1 + $0x548] sm:$0xff] }
  0x8a   :  { %1974 = vmatpush.bf16.msra.mxu0 %v3289_v56  ;;  %v3316_v56 = vld [vmem:[%s4180_s1 + $0x500] sm:$0xff] }
  0x8b   :  { %2002 = vmatpush.bf16.msra.mxu2 %v3305_v57  ;;  %v3332_v57 = vld [vmem:[%s4180_s1 + $0x580] sm:$0xff] }
  0x8c   :  { %2016 = vmatpush.bf16.msra.mxu3 %v3313_v58  ;;  %v3340_v58 = vld [vmem:[%s4180_s1 + $0x5c0] sm:$0xff] }
  0x8d   :  { %1988 = vmatpush.bf16.msra.mxu1 %v3297_v59  ;;  %v2296_v59 = vld [vmem:[%s4181_s0 + $0x50] sm:$0xf] }
  0x8e   :  { %1975 = vmatpush.bf16.msra.mxu0 %v3288_v60  ;;  %v3153_v60 = vld [vmem:[%s4181_s0 + $0xb0] sm:$0xf0] }
  0x8f   :  { %2003 = vmatpush.bf16.msra.mxu2 %v3304_v61  ;;  %v2304_v61 = vld [vmem:[%s4181_s0 + $0x58] sm:$0xf] }
  0x90   :  { %2017 = vmatpush.bf16.msra.mxu3 %v3312_v62  ;;  %v3154_v62 = vld [vmem:[%s4181_s0 + $0xb8] sm:$0xf0] }
  0x91   :  { %1989 = vmatpush.bf16.msra.mxu1 %v3296_v63  ;;  %v3142_v63 = vld [vmem:[%s4181_s0 + $0x5c] sm:$0xf] }
  0x92   :  { %1976 = vmatpush.bf16.msra.mxu0 %v3287_v0  ;;  %v2306_v0 = vld [vmem:[%s4181_s0 + $0xbc] sm:$0xf0] }
  0x93   :  { %2004 = vmatpush.bf16.msra.mxu2 %v3303_v1  ;;  %v3351_v1 = vld [vmem:[%s4180_s1 + $0x618] sm:$0xff] }
  0x94   :  { %2018 = vmatpush.bf16.msra.mxu3 %v3311_v2  ;;  %v3324_v2 = vld [vmem:[%s4180_s1 + $0x540] sm:$0xff] }
  0x95   :  { %1990 = vmatpush.bf16.msra.mxu1 %v3295_v3  ;;  %v2297_v3 = vor.u32 %v3153_v60, %v2296_v59 }
  0x96   :  { %1977 = vmatpush.bf16.msra.mxu0 %v3286_v4  ;;  %v3141_v4 = vld [vmem:[%s4181_s0 + $0x54] sm:$0xf] }
  0x97   :  { %2005 = vmatpush.bf16.msra.mxu2 %v3302_v5  ;;  %v2298_v5 = vld [vmem:[%s4181_s0 + $0xb4] sm:$0xf0] }
  0x98   :  { %2019 = vmatpush.bf16.msra.mxu3 %v3310_v6  ;;  %v2305_v6 = vor.u32 %v3154_v62, %v2304_v61 }
  0x99   :  { %1991 = vmatpush.bf16.msra.mxu1 %v3294_v7  ;;  %v2309_v7 = vor.u32 %v3142_v63, %v2306_v0  ;;  %v3357_v63 = vld [vmem:[%s4184_s3 + $0x28] sm:$0xff] }
  0x9a   :  { %1978 = vmatpush.bf16.msra.mxu0 %v3285_v8  ;;  %v2301_v8 = vor.u32 %v3141_v4, %v2298_v5  ;;  %v3356_v4 = vld [vmem:[%s4184_s3 + $0x20] sm:$0xff] }
  0x9b   :  { %2006 = vmatpush.bf16.msra.mxu2 %v3301_v9  ;;  %v3350_v9 = vld [vmem:[%s4180_s1 + $0x610] sm:$0xff] }
  0x9c   :  { %2020 = vmatpush.bf16.msra.mxu3 %v3309_v10  ;;  %v3349_v10 = vld [vmem:[%s4180_s1 + $0x608] sm:$0xff] }
  0x9d   :  { %1992 = vmatpush.bf16.msra.mxu1 %v3293_v11  ;;  %v3348_v11 = vld [vmem:[%s4180_s1 + $0x600] sm:$0xff] }
  0x9e   :  { %1979 = vmatpush.bf16.msra.mxu0 %v3284_v12  ;;  %v2312_v12 = vld [vmem:[%s4181_s0 + $0x60] sm:$0xf] }
  0x9f   :  { %2007 = vmatpush.bf16.msra.mxu2 %v3300_v13  ;;  %v3155_v13 = vld [vmem:[%s4181_s0 + $0xc0] sm:$0xf0] }
  0xa0   :  { %2021 = vmatpush.bf16.msra.mxu3 %v3308_v14  ;;  %v2313_v14 = vor.u32 %v3155_v13, %v2312_v12 }
  0xa1   :  { %1993 = vmatpush.bf16.msra.mxu1 %v3292_v24  ;;  %1980 = vmatmul.bf16.vlgmr.msra.gmra.mxu0 %v2281_v27 }
  0xa2   :  { %2028 = vmatpush.bf16.msrb.mxu0 %v3323_v15  ;;  %2008 = vmatmul.bf16.vlgmr.msra.gmra.mxu2 %v2289_v28  ;;  %v1757_v15 = vpop.f32.mrf.mxu0  ;;  %v3360_v28 = vld [vmem:[%s4182_s2] ss:$0 sm:$0xff] }
  0xa3   :  { %2056 = vmatpush.bf16.msrb.mxu2 %v3339_v16  ;;  %2022 = vmatmul.bf16.vlgmr.msra.gmra.mxu3 %v2293_v30  ;;  %v1771_v16 = vpop.f32.mrf.mxu1  ;;  %v1758_v30 = vadd.f32 %v3360_v28, %v1757_v15 }
  0xa4   :  { %2070 = vmatpush.bf16.msrb.mxu3 %v3347_v21  ;;  %1994 = vmatmul.bf16.vlgmr.msra.gmra.mxu1 %v2285_v31 }
  0xa5   :  { %2042 = vmatpush.bf16.msrb.mxu1 %v3331_v29  ;;  %v1785_v17 = vpop.f32.mrf.mxu2 }
  0xa6   :  { %2029 = vmatpush.bf16.msrb.mxu0 %v3322_v32  ;;  %v1799_v19 = vpop.f32.mrf.mxu3 }
  0xa7   :  { %2057 = vmatpush.bf16.msrb.mxu2 %v3338_v33  ;;  %v1772_v33 = vadd.f32 %v1771_v16, %v1758_v30  ;;  %v3354_v16 = vld [vmem:[%s4184_s3 + $0x10] sm:$0xff] }
  0xa8   :  { %2071 = vmatpush.bf16.msrb.mxu3 %v3346_v34 }
  0xa9   :  { %2043 = vmatpush.bf16.msrb.mxu1 %v3330_v35 }
  0xaa   :  { %2030 = vmatpush.bf16.msrb.mxu0 %v3321_v36  ;;  %v1759_v18 = vpop.f32.mrf.mxu0 }
  0xab   :  { %2058 = vmatpush.bf16.msrb.mxu2 %v3337_v37  ;;  %v1773_v20 = vpop.f32.mrf.mxu1  ;;  %v1760_v36 = vadd.f32 %v3360_v28, %v1759_v18  ;;  %v1786_v37 = vadd.f32 %v1785_v17, %v1772_v33 }
  0xac   :  { %2072 = vmatpush.bf16.msrb.mxu3 %v3345_v38 }
  0xad   :  { %2044 = vmatpush.bf16.msrb.mxu1 %v3329_v39  ;;  %v1787_v21 = vpop.f32.mrf.mxu2  ;;  %v1774_v39 = vadd.f32 %v1773_v20, %v1760_v36  ;;  %v3353_v20 = vld [vmem:[%s4184_s3 + $0x8] sm:$0xff] }
  0xae   :  { %2031 = vmatpush.bf16.msrb.mxu0 %v3320_v40  ;;  %v1801_v23 = vpop.f32.mrf.mxu3 }
  0xaf   :  { %2059 = vmatpush.bf16.msrb.mxu2 %v3336_v41  ;;  %v1800_v41 = vadd.f32 %v1799_v19, %v1786_v37 }
  0xb0   :  { %2073 = vmatpush.bf16.msrb.mxu3 %v3344_v42 }
  0xb1   :  { %2045 = vmatpush.bf16.msrb.mxu1 %v3328_v43  ;;  %v1788_v43 = vadd.f32 %v1787_v21, %v1774_v39 }
  0xb2   :  { %2032 = vmatpush.bf16.msrb.mxu0 %v3319_v44 }
  0xb3   :  { %2060 = vmatpush.bf16.msrb.mxu2 %v3335_v45 }
  0xb4   :  { %2074 = vmatpush.bf16.msrb.mxu3 %v3343_v46  ;;  %v1802_v46 = vadd.f32 %v1801_v23, %v1788_v43 }
  0xb5   :  { %2046 = vmatpush.bf16.msrb.mxu1 %v3327_v47 }
  0xb6   :  { %2033 = vmatpush.bf16.msrb.mxu0 %v3318_v48 }
  0xb7   :  { %2061 = vmatpush.bf16.msrb.mxu2 %v3334_v49 }
  0xb8   :  { %2075 = vmatpush.bf16.msrb.mxu3 %v3342_v50 }
  0xb9   :  { %2047 = vmatpush.bf16.msrb.mxu1 %v3326_v51  ;;  %v3359_v51 = vld [vmem:[%s4184_s3 + $0x38] sm:$0xff] }
  0xba   :  { %2034 = vmatpush.bf16.msrb.mxu0 %v3317_v52 }
  0xbb   :  { %2062 = vmatpush.bf16.msrb.mxu2 %v3333_v53 }
  0xbc   :  { %2076 = vmatpush.bf16.msrb.mxu3 %v3341_v54 }
  0xbd   :  { %2048 = vmatpush.bf16.msrb.mxu1 %v3325_v55 }
  0xbe   :  { %2035 = vmatpush.bf16.msrb.mxu0 %v3316_v56  ;;  %v1813_v22 = vpop.f32.mrf.mxu0 }
  0xbf   :  { %2063 = vmatpush.bf16.msrb.mxu2 %v3332_v57  ;;  %v1814_v45 = vadd.f32 %v1813_v22, %v1800_v41 }
  0xc0   :  { %2077 = vmatpush.bf16.msrb.mxu3 %v3340_v58  ;;  %v3358_v58 = vld [vmem:[%s4184_s3 + $0x30] sm:$0xff] }
  0xc1   :  { %2049 = vmatpush.bf16.msrb.mxu1 %v3324_v2  ;;  %2036 = vmatmul.bf16.vlgmr.msrb.gmra.mxu0 %v2297_v3  ;;  %v1827_v24 = vpop.f32.mrf.mxu1 }
  0xc2   :  { %2088 = vmatpush.bf16.msra.mxu0 %v3351_v1  ;;  %2064 = vmatmul.bf16.vlgmr.msrb.gmra.mxu2 %v2305_v6  ;;  %v1828_v49 = vadd.f32 %v1827_v24, %v1814_v45 }
  0xc3   :  { %2078 = vmatmul.bf16.vlgmr.msrb.gmra.mxu3 %v2309_v7 }
  0xc4   :  { %2050 = vmatmul.bf16.vlgmr.msrb.gmra.mxu1 %v2301_v8 }
  0xc5   :  { %v1841_v25 = vpop.f32.mrf.mxu2  ;;  %2169 = vmatpush.bf16.msra.mxu1 %v3359_v51 }
  0xc6   :  { %2089 = vmatpush.bf16.msra.mxu0 %v3350_v9  ;;  %v1815_v26 = vpop.f32.mrf.mxu0  ;;  %v1855_v27 = vpop.f32.mrf.mxu3  ;;  %v1842_v54 = vadd.f32 %v1841_v25, %v1828_v49 }
  0xc7   :  { %v1816_v50 = vadd.f32 %v1815_v26, %v1802_v46  ;;  %v3352_v26 = vld [vmem:[%s4184_s3] sm:$0xff] }
  0xc8   :  { %v1856_v59 = vadd.f32 %v1855_v27, %v1842_v54 }
  0xc9   :  { %v1829_v29 = vpop.f32.mrf.mxu1  ;;  %2170 = vmatpush.bf16.msra.mxu1 %v3358_v58 }
  0xca   :  { %2090 = vmatpush.bf16.msra.mxu0 %v3349_v10  ;;  %v1830_v55 = vadd.f32 %v1829_v29, %v1816_v50  ;;  %v3355_v10 = vld [vmem:[%s4184_s3 + $0x18] sm:$0xff] }
  0xcd   :  { %v1843_v31 = vpop.f32.mrf.mxu2  ;;  %2171 = vmatpush.bf16.msra.mxu1 %v3357_v63  ;;  %v3361_v63 = vld [vmem:[%s4183_s4] ss:$0 sm:$0xff] }
  0xce   :  { %2091 = vmatpush.bf16.msra.mxu0 %v3348_v11  ;;  %v1857_v34 = vpop.f32.mrf.mxu3  ;;  %v1844_v56 = vadd.f32 %v1843_v31, %v1830_v55 }
  0xd0   :  { %v1858_v61 = vadd.f32 %v1857_v34, %v1844_v56 }
  0xd1   :  { %3098 = vmatmul.msk.bf16.vlgmr.msra.gmra.mxu0 %vm1744_vm0, %v2313_v14  ;;  %2172 = vmatpush.bf16.msra.mxu1 %v3356_v4 }
  0xd5   :  { %2173 = vmatpush.bf16.msra.mxu1 %v3355_v10 }
  0xd9   :  { %2174 = vmatpush.bf16.msra.mxu1 %v3354_v16 }
  0xdd   :  { %2175 = vmatpush.bf16.msra.mxu1 %v3353_v20 }
  0xde   :  { %v1869_v32 = vpop.f32.mrf.mxu0 }
  0xdf   :  { %v1870_v62 = vadd.f32 %v1869_v32, %v1856_v59 }
  0xe1   :  { %v1883_v35 = vpop.f32.mrf.mxu1  ;;  %2176 = vmatpush.bf16.msra.mxu1 %v3352_v26 }
  0xe2   :  { %v1884_v3 = vadd.f32 %v1883_v35, %v1870_v62 }
  0xe5   :  { %v1897_v38 = vpop.f32.mrf.mxu2 }
  0xe6   :  { %v1871_v40 = vpop.f32.mrf.mxu0  ;;  %v1911_v42 = vpop.f32.mrf.mxu3  ;;  %v1898_v5 = vadd.f32 %v1897_v38, %v1884_v3 }
  0xe7   :  { %v1872_v1 = vadd.f32 %v1871_v40, %v1858_v61 }
  0xe8   :  { %v1912_v11 = vadd.f32 %v1911_v42, %v1898_v5 }
  0xe9   :  { %v1885_v44 = vpop.f32.mrf.mxu1 }
  0xea   :  { %v1886_v6 = vadd.f32 %v1885_v44, %v1872_v1 }
  0xed   :  { %v1899_v47 = vpop.f32.mrf.mxu2 }
  0xee   :  { %v1913_v52 = vpop.f32.mrf.mxu3  ;;  %v1900_v9 = vadd.f32 %v1899_v47, %v1886_v6 }
  0xf0   :  { %v1914_v14 = vadd.f32 %v1913_v52, %v1900_v9 }
  0xfe   :  { %v1925_v48 = vpop.f32.mrf.mxu0 }
  0xff   :  { %v1926_v15 = vadd.f32 %v1925_v48, %v1912_v11 }
 0x101   :  { %v1939_v53 = vpop.f32.mrf.mxu1 }
 0x102   :  { %v1940_v19 = vadd.f32 %v1939_v53, %v1926_v15 }
 0x105   :  { %v1953_v57 = vpop.f32.mrf.mxu2 }
 0x106   :  { %v1927_v60 = vpop.f32.mrf.mxu0  ;;  %v1967_v0 = vpop.f32.mrf.mxu3  ;;  %v1954_v22 = vadd.f32 %v1953_v57, %v1940_v19 }
 0x107   :  { %v1928_v17 = vadd.f32 %v1927_v60, %v1914_v14 }
 0x108   :  { %v1968_v28 = vadd.f32 %v1967_v0, %v1954_v22 }
 0x109   :  { %v1941_v2 = vpop.f32.mrf.mxu1 }
 0x10a   :  { %v1942_v23 = vadd.f32 %v1941_v2, %v1928_v17 }
 0x10d   :  { %v1955_v7 = vpop.f32.mrf.mxu2 }
 0x10e   :  { %v1969_v12 = vpop.f32.mrf.mxu3  ;;  %v1956_v25 = vadd.f32 %v1955_v7, %v1942_v23 }
 0x110   :  { %v1970_v29 = vadd.f32 %v1969_v12, %v1956_v25 }
 0x11e   :  { %v1981_v8 = vpop.f32.mrf.mxu0 }
 0x11f   :  { %v1982_v30 = vadd.f32 %v1981_v8, %v1968_v28 }
 0x121   :  { %v1995_v13 = vpop.f32.mrf.mxu1 }
 0x122   :  { %v1996_v34 = vadd.f32 %v1995_v13, %v1982_v30 }
 0x125   :  { %v2009_v18 = vpop.f32.mrf.mxu2 }
 0x126   :  { %v1983_v21 = vpop.f32.mrf.mxu0  ;;  %v2023_v24 = vpop.f32.mrf.mxu3  ;;  %v2010_v37 = vadd.f32 %v2009_v18, %v1996_v34 }
 0x127   :  { %v1984_v33 = vadd.f32 %v1983_v21, %v1970_v29 }
 0x128   :  { %v2024_v42 = vadd.f32 %v2023_v24, %v2010_v37 }
 0x129   :  { %v1997_v27 = vpop.f32.mrf.mxu1 }
 0x12a   :  { %v1998_v38 = vadd.f32 %v1997_v27, %v1984_v33 }
 0x12d   :  { %v2011_v31 = vpop.f32.mrf.mxu2 }
 0x12e   :  { %v2025_v35 = vpop.f32.mrf.mxu3  ;;  %v2012_v39 = vadd.f32 %v2011_v31, %v1998_v38 }
 0x130   :  { %v2026_v43 = vadd.f32 %v2025_v35, %v2012_v39 }
 0x13e   :  { %v2037_v32 = vpop.f32.mrf.mxu0 }
 0x13f   :  { %v2038_v44 = vadd.f32 %v2037_v32, %v2024_v42 }
 0x141   :  { %v2051_v36 = vpop.f32.mrf.mxu1 }
 0x142   :  { %v2052_v48 = vadd.f32 %v2051_v36, %v2038_v44 }
 0x145   :  { %v2065_v40 = vpop.f32.mrf.mxu2 }
 0x146   :  { %v2039_v41 = vpop.f32.mrf.mxu0  ;;  %v2079_v45 = vpop.f32.mrf.mxu3  ;;  %v2066_v51 = vadd.f32 %v2065_v40, %v2052_v48 }
 0x147   :  { %v2040_v46 = vadd.f32 %v2039_v41, %v2026_v43 }
 0x148   :  { %v2080_v54 = vadd.f32 %v2079_v45, %v2066_v51 }
 0x149   :  { %v2053_v47 = vpop.f32.mrf.mxu1 }
 0x14a   :  { %v2054_v52 = vadd.f32 %v2053_v47, %v2040_v46 }
 0x14d   :  { %v2067_v49 = vpop.f32.mrf.mxu2 }
 0x14e   :  { %v2093_v50 = vpop.f32.mrf.mxu0  ;;  %v2068_v53 = vadd.f32 %v2067_v49, %v2054_v52  ;;  %v2081_v55 = vpop.f32.mrf.mxu3 }
 0x14f   :  { %v2094_v57 = vadd.f32 %v2093_v50, %v2080_v54 }
 0x150   :  { %v2082_v56 = vadd.f32 %v2081_v55, %v2068_v53 }
 0x151   :  { %v2098_v60 = vmax.f32 %v2094_v57, 0.0 }
 0x156   :  { %v2095_v58 = vpop.f32.mrf.mxu0 }
 0x157   :  { %v2096_v59 = vadd.f32 %v2095_v58, %v2082_v56 }
 0x159   :  { %v2099_v61 = vmax.f32 %v2096_v59, 0.0 }
 0x15b   :  { %v2100_v62 = vpack.c.bf16 %v2099_v61, %v2098_v60 }
 0x15d   :  { %2177 = vmatmul.bf16.vlgmr.msra.gmra.mxu1 %v2100_v62 }
 0x1da   :  { %v2178_v0 = vpop.f32.mrf.mxu1 }
 0x1db   :  { %v2179_v1 = vadd.f32 %v3361_v63, %v2178_v0 }
 0x1dd   :  { %v2184_v2 = vsel %vm2183_vm1, %v2179_v1, -inf }
 0x1de   :  { %2185 = vmax.xlane.f32.xlu0 %v2184_v2 }
 0x1e2   :  { %v2180_v3 = vpop.f32.mrf.mxu1 }
 0x1e3   :  { %v2181_v4 = vadd.f32 %v3361_v63, %v2180_v3 }
 0x1e5   :  { %v2187_v5 = vsel %vm2183_vm1, %v2181_v4, -inf }
 0x1e6   :  { %2188 = vmax.xlane.f32.xlu0 %v2187_v5 }
 0x251   :  { %v2186_v6 = vpop.xlane.xlu0 %2185 }
 0x252   :  { %v2190_v7 = vsub.f32 %v2179_v1, %v2186_v6 }
 0x254   :  { %v2192_v8 = vmul.f32 1.442695, %v2190_v7 }
 0x256   :  { %3362 = vpow2.f32 %v2192_v8 }
 0x259   :  { %v2189_v9 = vpop.xlane.xlu0 %2188 }
 0x25a   :  { %v2191_v10 = vsub.f32 %v2181_v4, %v2189_v9 }
 0x25c   :  { %v3363_v11 = vpop.eup %3362  ;;  %v2194_v12 = vmul.f32 1.442695, %v2191_v10 }
 0x25d   :  { %v2196_v13 = vsel %vm2183_vm1, %v3363_v11, 0.0 }
 0x25e   :  { %3364 = vpow2.f32 %v2194_v12  ;;  %2197 = vadd.xlane.f32.xlu1 %v2196_v13 }
 0x264   :  { %v3365_v14 = vpop.eup %3364 }
 0x265   :  { %v2199_v15 = vsel %vm2183_vm1, %v3365_v14, 0.0 }
 0x266   :  { %2200 = vadd.xlane.f32.xlu1 %v2199_v15 }
 0x2d1   :  { %v2198_v16 = vpop.xlane.xlu1 %2197 }
 0x2d2   :  { %3366 = vlog2.f32 %v2198_v16 }
 0x2d8   :  { %v3367_v17 = vpop.eup %3366 }
 0x2d9   :  { %v2203_v18 = vmul.f32 0.6931472, %v3367_v17  ;;  %v2201_v19 = vpop.xlane.xlu1 %2200 }
 0x2da   :  { %3368 = vlog2.f32 %v2201_v19 }
 0x2db   :  { %v2206_v20 = vsub.f32 %v2190_v7, %v2203_v18 }
 0x2dd   :  { %2208 = vst.msk [vmem:[%s4185_s5] sm:$0xff] %vm2183_vm1, %v2206_v20 }
 0x2e0   :  { %v3369_v21 = vpop.eup %3368 }
 0x2e1   :  { %v2205_v22 = vmul.f32 0.6931472, %v3369_v21 }
 0x2e3   :  { %v2207_v23 = vsub.f32 %v2191_v10, %v2205_v22 }
 0x2e5   :  { %2209 = vst.msk [vmem:[%s4185_s5 + $0x8] sm:$0xff] %vm2183_vm1, %v2207_v23 }

</bundles_post_ra>
